<compile_context>
chip_gen: v7x
topology: tpu7x:2x2x1
jax: 0.10.0
libtpu: 0.0.40
codegen_flags: <defaults>
</compile_context>

<pallas_src>
import functools

import jax
import jax.numpy as jnp
from jax.experimental import pallas as pl
from jax.experimental.pallas import tpu as pltpu


# ----------------------------------------------------------------------------
# Pallas kernels
# ----------------------------------------------------------------------------
def _linear_kernel(*refs, has_bias, has_residual):
    refs = list(refs)
    x_ref = refs.pop(0)
    w_ref = refs.pop(0)
    b_ref = refs.pop(0) if has_bias else None
    r_ref = refs.pop(0) if has_residual else None
    o_ref = refs.pop(0)

    acc = jnp.dot(x_ref[...], w_ref[...], preferred_element_type=jnp.float32)
    if has_bias:
        acc = acc + b_ref[...]
    if has_residual:
        acc = acc + r_ref[...].astype(jnp.float32)
    o_ref[...] = acc.astype(o_ref.dtype)


def linear_pallas(x, w, b=None, residual=None, out_dtype=jnp.float32, tm=512):
    """y = x @ w (+ b) (+ residual); x:(M,K), w:(K,N).

    bf16 operands to the MXU, f32 accumulation.  Tiled over M with a
    "parallel" 1-D grid (pipelined DMA, megacore sharding).  K and N stay
    whole blocks (<= 768 for deit_tiny), so no K-reduction axis is needed.
    """
    M, K = x.shape
    N = w.shape[1]
    TM = min(tm, M)
    grid = (pl.cdiv(M, TM),)

    has_bias = b is not None
    has_residual = residual is not None

    in_specs = [
        pl.BlockSpec((TM, K), lambda i: (i, 0)),
        pl.BlockSpec((K, N), lambda i: (0, 0)),
    ]
    args = [x.astype(jnp.bfloat16), w.astype(jnp.bfloat16)]
    if has_bias:
        in_specs.append(pl.BlockSpec((1, N), lambda i: (0, 0)))
        args.append(b.reshape(1, N).astype(jnp.float32))
    if has_residual:
        in_specs.append(pl.BlockSpec((TM, N), lambda i: (i, 0)))
        args.append(residual)

    return pl.pallas_call(
        functools.partial(
            _linear_kernel, has_bias=has_bias, has_residual=has_residual
        ),
        grid=grid,
        in_specs=in_specs,
        out_specs=pl.BlockSpec((TM, N), lambda i: (i, 0)),
        out_shape=jax.ShapeDtypeStruct((M, N), out_dtype),
        compiler_params=pltpu.CompilerParams(dimension_semantics=("parallel",)),
    )(*args)


def _layernorm_kernel(x_ref, g_ref, b_ref, o_ref, *, eps):
    x = x_ref[...].astype(jnp.float32)
    mean = jnp.mean(x, axis=-1, keepdims=True)
    cen = x - mean
    var = jnp.mean(cen * cen, axis=-1, keepdims=True)
    y = cen * jax.lax.rsqrt(var + eps)
    o_ref[...] = (y * g_ref[...] + b_ref[...]).astype(o_ref.dtype)


def layernorm_pallas(x, g, b, eps=1e-6, out_dtype=jnp.bfloat16, tm=1024):
    """Row-wise LayerNorm (f32 math), tiled over rows.  eps=1e-6 as in the model."""
    M, D = x.shape
    TM = min(tm, M)
    grid = (pl.cdiv(M, TM),)
    return pl.pallas_call(
        functools.partial(_layernorm_kernel, eps=eps),
        grid=grid,
        in_specs=[
            pl.BlockSpec((TM, D), lambda i: (i, 0)),
            pl.BlockSpec((1, D), lambda i: (0, 0)),
            pl.BlockSpec((1, D), lambda i: (0, 0)),
        ],
        out_specs=pl.BlockSpec((TM, D), lambda i: (i, 0)),
        out_shape=jax.ShapeDtypeStruct((M, D), out_dtype),
        compiler_params=pltpu.CompilerParams(dimension_semantics=("parallel",)),
    )(x, g.reshape(1, D).astype(jnp.float32), b.reshape(1, D).astype(jnp.float32))


def _mha_kernel(qkv_ref, o_ref, *, num_heads, scale):
    """Multi-head softmax(QK^T)V for one block of batch entries.

    qkv_ref: (BB, S, 3*D) packed [q | k | v] (heads contiguous inside each),
    o_ref:   (BB, S, D) head-concatenated output, ready for the proj matmul.
    """
    qkv = qkv_ref[...]                                        # (BB, S, 3D) bf16
    D3 = qkv.shape[-1]
    D = D3 // 3
    hd = D // num_heads
    outs = []
    for h in range(num_heads):                                # static unrolled loop
        q = (qkv[:, :, h * hd:(h + 1) * hd].astype(jnp.float32) * scale
             ).astype(jnp.bfloat16)
        k = qkv[:, :, D + h * hd:D + (h + 1) * hd]
        v = qkv[:, :, 2 * D + h * hd:2 * D + (h + 1) * hd]
        s = jnp.einsum("bqd,bkd->bqk", q, k, preferred_element_type=jnp.float32)
        s = s - jnp.max(s, axis=-1, keepdims=True)
        p = jnp.exp(s)
        p = p * pl.reciprocal(jnp.sum(p, axis=-1, keepdims=True), approx=True)
        outs.append(
            jnp.einsum("bqk,bkd->bqd", p.astype(jnp.bfloat16), v,
                       preferred_element_type=jnp.float32)
        )
    o_ref[...] = jnp.concatenate(outs, axis=-1).astype(o_ref.dtype)


def mha_pallas(qkv, num_heads, scale, bb=8, out_dtype=jnp.bfloat16):
    """qkv: (Bn, S, 3D) packed -> (Bn, S, D).  Gridded over Bn (parallel)."""
    Bn, S, D3 = qkv.shape
    D = D3 // 3
    BB = min(bb, Bn)
    grid = (pl.cdiv(Bn, BB),)
    return pl.pallas_call(
        functools.partial(_mha_kernel, num_heads=num_heads, scale=scale),
        grid=grid,
        in_specs=[pl.BlockSpec((BB, S, D3), lambda i: (i, 0, 0))],
        out_specs=pl.BlockSpec((BB, S, D), lambda i: (i, 0, 0)),
        out_shape=jax.ShapeDtypeStruct((Bn, S, D), out_dtype),
        compiler_params=pltpu.CompilerParams(dimension_semantics=("parallel",)),
    )(qkv)


# ----------------------------------------------------------------------------
# Model pieces (glue around the kernels)
# ----------------------------------------------------------------------------
def attention(x, qkv_w, qkv_b, proj_w, proj_b, num_heads, out_dtype=jnp.float32):
    """Attention: qkv (bias=True), fused multi-head core, output proj."""
    Bn, S, D = x.shape
    hd = D // num_heads
    scale = hd ** -0.5
    qkv = linear_pallas(x.reshape(Bn * S, D), qkv_w, qkv_b,
                        out_dtype=jnp.bfloat16)               # (Bn*S, 3D)
    qkv = qkv.reshape(Bn, S, 3 * D)                           # free reshape
    o = mha_pallas(qkv, num_heads, scale)                     # (Bn, S, D) bf16
    o = linear_pallas(o.reshape(Bn * S, D), proj_w, proj_b, out_dtype=out_dtype)
    return o.reshape(Bn, S, D)


def block_forward(x, p, B, T, num_heads):
    """Divided space-time attention block (extra_tokens == 0, eval mode)."""
    _, S1, D = x.shape
    N = (S1 - 1) // T                                         # spatial tokens / frame

    # ---- temporal attention ----
    xt0 = x[:, 1:, :]                                         # (B, N*T, D), order (n,t)
    xt_in = xt0.reshape(B * N, T, D)                          # '(b h w) t m'
    y = layernorm_pallas(xt_in.reshape(-1, D), p["tnorm_g"], p["tnorm_b"]
                         ).reshape(B * N, T, D)
    res_t = attention(y, p["tqkv_w"], p["tqkv_b"], p["tproj_w"], p["tproj_b"],
                      num_heads, out_dtype=jnp.bfloat16)      # (B*N, T, D)
    # temporal_fc fused with the residual add (xt = x[:,1:] + temporal_fc(res_t))
    xt = linear_pallas(res_t.reshape(-1, D), p["tfc_w"], p["tfc_b"],
                       residual=xt0.reshape(-1, D)).reshape(B, N * T, D)

    # ---- spatial attention ----
    init_cls = x[:, :1, :]                                    # (B,1,D)
    cls_rep = jnp.broadcast_to(init_cls, (B, T, D)).reshape(B * T, 1, D)
    xs = xt.reshape(B, N, T, D).transpose(0, 2, 1, 3).reshape(B * T, N, D)
    xs = jnp.concatenate([cls_rep, xs], axis=1)               # (B*T, 1+N, D)
    y = layernorm_pallas(xs.reshape(-1, D), p["norm1_g"], p["norm1_b"]
                         ).reshape(B * T, N + 1, D)
    res_s = attention(y, p["qkv_w"], p["qkv_b"], p["proj_w"], p["proj_b"],
                      num_heads)                              # (B*T, 1+N, D) f32
    cls_out = res_s[:, 0, :].reshape(B, T, D).mean(axis=1, keepdims=True)
    res_sp = (res_s[:, 1:, :].reshape(B, T, N, D)
              .transpose(0, 2, 1, 3).reshape(B, N * T, D))
    x_new = jnp.concatenate([init_cls, xt], axis=1) + jnp.concatenate(
        [cls_out, res_sp], axis=1)

    # ---- MLP (fc2 fused with the residual add) ----
    y = layernorm_pallas(x_new.reshape(-1, D), p["norm2_g"], p["norm2_b"])
    h = linear_pallas(y, p["fc1_w"], p["fc1_b"])              # f32
    # TODO(synk): fuse exact erf-GELU into the fc1 kernel once lax.erf lowering
    # in Mosaic is confirmed; kept as XLA glue (fused with the bf16 cast by jit).
    h = jax.nn.gelu(h, approximate=False)
    out = linear_pallas(h, p["fc2_w"], p["fc2_b"],
                        residual=x_new.reshape(-1, D)).reshape(B, S1, D)
    return out


def vit_forward(params, x, cfg):
    """x: (B, C, T, H, W) float32  ->  logits (B, num_classes)."""
    B, C, T, Himg, Wimg = x.shape
    p = cfg["patch_size"]
    D = cfg["embed_dim"]
    Hp, Wp = Himg // p, Wimg // p
    N = Hp * Wp

    # ---- PatchEmbed: Conv2d(k=p, stride=p) == unfold + Pallas matmul ----
    xf = x.transpose(0, 2, 1, 3, 4).reshape(B * T, C, Himg, Wimg)   # '(b t) c h w'
    patches = xf.reshape(B * T, C, Hp, p, Wp, p).transpose(0, 2, 4, 1, 3, 5)
    patches = patches.reshape(B * T * N, C * p * p)                 # (c,kh,kw) order
    tok = linear_pallas(patches, params["patch_w"], params["patch_b"])
    tok = tok.reshape(B * T, N, D)

    # ---- cls token + positional embedding (sizes match -> no interpolation) ----
    cls = jnp.broadcast_to(params["cls_token"], (B * T, 1, D))
    xx = jnp.concatenate([cls, tok], axis=1)                        # (B*T, 1+N, D)
    xx = xx + params["pos_embed"]

    # ---- time embedding (divided_space_time, T == num_frames -> no interp) ----
    cls_tokens = xx[:B, 0, :][:, None, :]                           # (B,1,D)
    xp = xx[:, 1:, :]
    xp = xp.reshape(B, T, N, D).transpose(0, 2, 1, 3).reshape(B * N, T, D)
    xp = xp + params["time_embed"]
    xp = xp.reshape(B, N, T, D).reshape(B, N * T, D)
    xx = jnp.concatenate([cls_tokens, xp], axis=1)                  # (B, 1+N*T, D)
    # extra_tokens == 0 -> no view/prompt token prepended.

    for blk in params["blocks"]:
        xx = block_forward(xx, blk, B, T, cfg["num_heads"])

    S1 = xx.shape[1]
    y = layernorm_pallas(
        xx.reshape(B * S1, D), params["norm_g"], params["norm_b"]
    ).reshape(B, S1, D)
    feat = y[:, 0, :]                                               # eval, extra_tokens=0
    logits = linear_pallas(feat, params["head_w"], params["head_b"])
    return logits


# ----------------------------------------------------------------------------
# Deterministic parameter initialization (mirrors __init__ / _init_weights)
# ----------------------------------------------------------------------------
def init_params(key, cfg):
    D = cfg["embed_dim"]
    C = cfg["in_chans"]
    p = cfg["patch_size"]
    hidden = int(D * cfg["mlp_ratio"])
    ncls = cfg["num_classes"]
    N = (cfg["img_size"] // p) ** 2
    keys = iter(jax.random.split(key, 256))

    def tn(shape, std=0.02):
        return std * jax.random.truncated_normal(next(keys), -2.0, 2.0, shape, jnp.float32)

    params = {
        "patch_w": tn((C * p * p, D)),          # conv kernel (flattened), synthetic init
        "patch_b": jnp.zeros((D,), jnp.float32),
        "cls_token": tn((1, 1, D)),
        "view_token": tn((1, 1, D)),            # unused when extra_tokens == 0
        "pos_embed": tn((1, N + 1, D)),
        "time_embed": jnp.zeros((1, cfg["num_frames"], D), jnp.float32),
        "norm_g": jnp.ones((D,), jnp.float32),
        "norm_b": jnp.zeros((D,), jnp.float32),
        "head_w": tn((D, ncls)),
        "head_b": jnp.zeros((ncls,), jnp.float32),
        "blocks": [],
    }
    for i in range(cfg["depth"]):
        blk = {
            "norm1_g": jnp.ones((D,), jnp.float32),
            "norm1_b": jnp.zeros((D,), jnp.float32),
            "qkv_w": tn((D, 3 * D)),                           # qkv_bias=True
            "qkv_b": jnp.zeros((3 * D,), jnp.float32),
            "proj_w": tn((D, D)),
            "proj_b": jnp.zeros((D,), jnp.float32),
            "tnorm_g": jnp.ones((D,), jnp.float32),
            "tnorm_b": jnp.zeros((D,), jnp.float32),
            "tqkv_w": tn((D, 3 * D)),
            "tqkv_b": jnp.zeros((3 * D,), jnp.float32),
            "tproj_w": tn((D, D)),
            "tproj_b": jnp.zeros((D,), jnp.float32),
            # temporal_fc zeroed for all blocks i > 0 (per __init__)
            "tfc_w": tn((D, D)) if i == 0 else jnp.zeros((D, D), jnp.float32),
            "tfc_b": jnp.zeros((D,), jnp.float32),
            "norm2_g": jnp.ones((D,), jnp.float32),
            "norm2_b": jnp.zeros((D,), jnp.float32),
            "fc1_w": tn((D, hidden)),
            "fc1_b": jnp.zeros((hidden,), jnp.float32),
            "fc2_w": tn((hidden, D)),
            "fc2_b": jnp.zeros((D,), jnp.float32),
        }
        params["blocks"].append(blk)
    return params


if __name__ == "__main__":
    cfg = dict(
        img_size=16,
        patch_size=8,
        in_chans=3,
        num_classes=10,
        embed_dim=32,
        depth=2,
        num_heads=4,
        mlp_ratio=4.0,
        num_frames=2,
        extra_tokens=0,
        attention_type="divided_space_time",
    )
    key = jax.random.PRNGKey(0)
    pkey, xkey = jax.random.split(key)
    params = init_params(pkey, cfg)
    x = jax.random.normal(
        xkey,
        (2, cfg["in_chans"], cfg["num_frames"], cfg["img_size"], cfg["img_size"]),
        jnp.float32,
    )
    fwd = jax.jit(functools.partial(vit_forward, cfg=cfg))
    logits = fwd(params, x)
    jax.block_until_ready(logits)
    assert logits.shape == (2, cfg["num_classes"]), logits.shape
    assert bool(jnp.all(jnp.isfinite(logits)))
    print("KERNEL_OK")
</pallas_src>

<mosaic_0001>
module attributes {stable_mosaic.version = 11 : i64} {
  func.func @_linear_kernel(%arg0: i32, %arg1: memref<16x192xbf16, #tpu.memory_space<vmem>>, %arg2: memref<192x32xbf16, #tpu.memory_space<vmem>>, %arg3: memref<1x32xf32, #tpu.memory_space<vmem>>, %arg4: memref<16x32xf32, #tpu.memory_space<vmem>>) attributes {dimension_semantics = [#tpu.dimension_semantics<parallel>], iteration_bounds = array<i64: 1>, scalar_prefetch = 0 : i64, scratch_operands = 0 : i64, tpu.core_type = #tpu.core_type<tc>, window_params = [{transform_indices = @transform_0, window_bounds = array<i64: 16, 192>}, {pipeline_mode = #tpu.pipeline_mode<synchronous>, transform_indices = @transform_1, window_bounds = array<i64: 192, 32>}, {pipeline_mode = #tpu.pipeline_mode<synchronous>, transform_indices = @transform_2, window_bounds = array<i64: 1, 32>}, {transform_indices = @transform_3, window_bounds = array<i64: 16, 32>}]} {
    %c0 = arith.constant 0 : index
    %c0_0 = arith.constant 0 : index
    %0 = vector.load %arg1[%c0, %c0_0] : memref<16x192xbf16, #tpu.memory_space<vmem>>, vector<16x192xbf16>
    %c0_1 = arith.constant 0 : index
    %c0_2 = arith.constant 0 : index
    %1 = vector.load %arg2[%c0_1, %c0_2] : memref<192x32xbf16, #tpu.memory_space<vmem>>, vector<192x32xbf16>
    %cst = arith.constant dense<0.000000e+00> : vector<16x32xf32>
    %2 = tpu.matmul %0, %1, %cst {dimension_numbers = #tpu.dot_dimension_numbers<[1], [0], [0], [1], [0, 0, 1, 1], [], []>} : vector<16x192xbf16>, vector<192x32xbf16>, vector<16x32xf32> -> vector<16x32xf32>
    %c0_3 = arith.constant 0 : index
    %c0_4 = arith.constant 0 : index
    %3 = vector.load %arg3[%c0_3, %c0_4] : memref<1x32xf32, #tpu.memory_space<vmem>>, vector<1x32xf32>
    %4 = vector.broadcast %3 : vector<1x32xf32> to vector<16x32xf32>
    %5 = arith.addf %2, %4 : vector<16x32xf32>
    %c0_5 = arith.constant 0 : index
    %c0_6 = arith.constant 0 : index
    %6 = vector.load %arg4[%c0_5, %c0_6] : memref<16x32xf32, #tpu.memory_space<vmem>>, vector<16x32xf32>
    tpu.vector_store %arg4[%c0_5, %c0_6], %5 {strides = array<i32>} : memref<16x32xf32, #tpu.memory_space<vmem>>, vector<16x32xf32>,
    return
  }
  func.func @transform_0(%arg0: i32) -> (i32, i32) {
    %c0_i32 = arith.constant 0 : i32
    %c0_i32_0 = arith.constant 0 : i32
    return %arg0, %c0_i32 : i32, i32
  }
  func.func @transform_1(%arg0: i32) -> (i32, i32) {
    %c0_i32 = arith.constant 0 : i32
    %c0_i32_0 = arith.constant 0 : i32
    %c0_i32_1 = arith.constant 0 : i32
    return %c0_i32, %c0_i32_0 : i32, i32
  }
  func.func @transform_2(%arg0: i32) -> (i32, i32) {
    %c0_i32 = arith.constant 0 : i32
    %c0_i32_0 = arith.constant 0 : i32
    %c0_i32_1 = arith.constant 0 : i32
    return %c0_i32, %c0_i32_0 : i32, i32
  }
  func.func @transform_3(%arg0: i32) -> (i32, i32) {
    %c0_i32 = arith.constant 0 : i32
    %c0_i32_0 = arith.constant 0 : i32
    return %arg0, %c0_i32 : i32, i32
  }
}

module attributes {stable_mosaic.version = 11 : i64} {
  func.func @_linear_kernel(%arg0: i32, %arg1: memref<16x32xbf16, #tpu.memory_space<vmem>>, %arg2: memref<32x96xbf16, #tpu.memory_space<vmem>>, %arg3: memref<1x96xf32, #tpu.memory_space<vmem>>, %arg4: memref<16x96xbf16, #tpu.memory_space<vmem>>) attributes {dimension_semantics = [#tpu.dimension_semantics<parallel>], iteration_bounds = array<i64: 1>, scalar_prefetch = 0 : i64, scratch_operands = 0 : i64, tpu.core_type = #tpu.core_type<tc>, window_params = [{transform_indices = @transform_0, window_bounds = array<i64: 16, 32>}, {pipeline_mode = #tpu.pipeline_mode<synchronous>, transform_indices = @transform_1, window_bounds = array<i64: 32, 96>}, {pipeline_mode = #tpu.pipeline_mode<synchronous>, transform_indices = @transform_2, window_bounds = array<i64: 1, 96>}, {transform_indices = @transform_3, window_bounds = array<i64: 16, 96>}]} {
    %c0 = arith.constant 0 : index
    %c0_0 = arith.constant 0 : index
    %0 = vector.load %arg1[%c0, %c0_0] : memref<16x32xbf16, #tpu.memory_space<vmem>>, vector<16x32xbf16>
    %c0_1 = arith.constant 0 : index
    %c0_2 = arith.constant 0 : index
    %1 = vector.load %arg2[%c0_1, %c0_2] : memref<32x96xbf16, #tpu.memory_space<vmem>>, vector<32x96xbf16>
    %cst = arith.constant dense<0.000000e+00> : vector<16x96xf32>
    %2 = tpu.matmul %0, %1, %cst {dimension_numbers = #tpu.dot_dimension_numbers<[1], [0], [0], [1], [0, 0, 1, 1], [], []>} : vector<16x32xbf16>, vector<32x96xbf16>, vector<16x96xf32> -> vector<16x96xf32>
    %c0_3 = arith.constant 0 : index
    %c0_4 = arith.constant 0 : index
    %3 = vector.load %arg3[%c0_3, %c0_4] : memref<1x96xf32, #tpu.memory_space<vmem>>, vector<1x96xf32>
    %4 = vector.broadcast %3 : vector<1x96xf32> to vector<16x96xf32>
    %5 = arith.addf %2, %4 : vector<16x96xf32>
    %6 = arith.truncf %5 : vector<16x96xf32> to vector<16x96xbf16>
    %c0_5 = arith.constant 0 : index
    %c0_6 = arith.constant 0 : index
    %7 = vector.load %arg4[%c0_5, %c0_6] : memref<16x96xbf16, #tpu.memory_space<vmem>>, vector<16x96xbf16>
    tpu.vector_store %arg4[%c0_5, %c0_6], %6 {strides = array<i32>} : memref<16x96xbf16, #tpu.memory_space<vmem>>, vector<16x96xbf16>,
    return
  }
  func.func @transform_0(%arg0: i32) -> (i32, i32) {
    %c0_i32 = arith.constant 0 : i32
    %c0_i32_0 = arith.constant 0 : i32
    return %arg0, %c0_i32 : i32, i32
  }
  func.func @transform_1(%arg0: i32) -> (i32, i32) {
    %c0_i32 = arith.constant 0 : i32
    %c0_i32_0 = arith.constant 0 : i32
    %c0_i32_1 = arith.constant 0 : i32
    return %c0_i32, %c0_i32_0 : i32, i32
  }
  func.func @transform_2(%arg0: i32) -> (i32, i32) {
    %c0_i32 = arith.constant 0 : i32
    %c0_i32_0 = arith.constant 0 : i32
    %c0_i32_1 = arith.constant 0 : i32
    return %c0_i32, %c0_i32_0 : i32, i32
  }
  func.func @transform_3(%arg0: i32) -> (i32, i32) {
    %c0_i32 = arith.constant 0 : i32
    %c0_i32_0 = arith.constant 0 : i32
    return %arg0, %c0_i32 : i32, i32
  }
}

module attributes {stable_mosaic.version = 11 : i64} {
  func.func @_layernorm_kernel(%arg0: i32, %arg1: memref<16x32xf32, #tpu.memory_space<vmem>>, %arg2: memref<1x32xf32, #tpu.memory_space<vmem>>, %arg3: memref<1x32xf32, #tpu.memory_space<vmem>>, %arg4: memref<16x32xbf16, #tpu.memory_space<vmem>>) attributes {dimension_semantics = [#tpu.dimension_semantics<parallel>], iteration_bounds = array<i64: 1>, scalar_prefetch = 0 : i64, scratch_operands = 0 : i64, tpu.core_type = #tpu.core_type<tc>, window_params = [{transform_indices = @transform_0, window_bounds = array<i64: 16, 32>}, {pipeline_mode = #tpu.pipeline_mode<synchronous>, transform_indices = @transform_1, window_bounds = array<i64: 1, 32>}, {pipeline_mode = #tpu.pipeline_mode<synchronous>, transform_indices = @transform_2, window_bounds = array<i64: 1, 32>}, {transform_indices = @transform_3, window_bounds = array<i64: 16, 32>}]} {
    %c0 = arith.constant 0 : index
    %c0_0 = arith.constant 0 : index
    %0 = vector.load %arg1[%c0, %c0_0] : memref<16x32xf32, #tpu.memory_space<vmem>>, vector<16x32xf32>
    %cst = arith.constant dense<0.000000e+00> : vector<16xf32>
    %1 = vector.multi_reduction <add>, %0, %cst [1] : vector<16x32xf32> to vector<16xf32>
    %2 = vector.shape_cast %1 : vector<16xf32> to vector<16x1xf32>
    %cst_1 = arith.constant 3.200000e+01 : f32
    %3 = vector.broadcast %cst_1 : f32 to vector<16x1xf32>
    %4 = arith.divf %2, %3 : vector<16x1xf32>
    %5 = vector.broadcast %4 : vector<16x1xf32> to vector<16x32xf32>
    %6 = arith.subf %0, %5 : vector<16x32xf32>
    %7 = arith.mulf %6, %6 : vector<16x32xf32>
    %cst_2 = arith.constant dense<0.000000e+00> : vector<16xf32>
    %8 = vector.multi_reduction <add>, %7, %cst_2 [1] : vector<16x32xf32> to vector<16xf32>
    %9 = vector.shape_cast %8 : vector<16xf32> to vector<16x1xf32>
    %cst_3 = arith.constant 3.200000e+01 : f32
    %10 = vector.broadcast %cst_3 : f32 to vector<16x1xf32>
    %11 = arith.divf %9, %10 : vector<16x1xf32>
    %cst_4 = arith.constant 9.99999997E-7 : f32
    %12 = vector.broadcast %cst_4 : f32 to vector<16x1xf32>
    %13 = arith.addf %11, %12 : vector<16x1xf32>
    %14 = math.rsqrt %13 : vector<16x1xf32>
    %15 = vector.broadcast %14 : vector<16x1xf32> to vector<16x32xf32>
    %16 = arith.mulf %6, %15 : vector<16x32xf32>
    %c0_5 = arith.constant 0 : index
    %c0_6 = arith.constant 0 : index
    %17 = vector.load %arg2[%c0_5, %c0_6] : memref<1x32xf32, #tpu.memory_space<vmem>>, vector<1x32xf32>
    %18 = vector.broadcast %17 : vector<1x32xf32> to vector<16x32xf32>
    %19 = arith.mulf %16, %18 : vector<16x32xf32>
    %c0_7 = arith.constant 0 : index
    %c0_8 = arith.constant 0 : index
    %20 = vector.load %arg3[%c0_7, %c0_8] : memref<1x32xf32, #tpu.memory_space<vmem>>, vector<1x32xf32>
    %21 = vector.broadcast %20 : vector<1x32xf32> to vector<16x32xf32>
    %22 = arith.addf %19, %21 : vector<16x32xf32>
    %23 = arith.truncf %22 : vector<16x32xf32> to vector<16x32xbf16>
    %c0_9 = arith.constant 0 : index
    %c0_10 = arith.constant 0 : index
    %24 = vector.load %arg4[%c0_9, %c0_10] : memref<16x32xbf16, #tpu.memory_space<vmem>>, vector<16x32xbf16>
    tpu.vector_store %arg4[%c0_9, %c0_10], %23 {strides = array<i32>} : memref<16x32xbf16, #tpu.memory_space<vmem>>, vector<16x32xbf16>,
    return
  }
  func.func @transform_0(%arg0: i32) -> (i32, i32) {
    %c0_i32 = arith.constant 0 : i32
    %c0_i32_0 = arith.constant 0 : i32
    return %arg0, %c0_i32 : i32, i32
  }
  func.func @transform_1(%arg0: i32) -> (i32, i32) {
    %c0_i32 = arith.constant 0 : i32
    %c0_i32_0 = arith.constant 0 : i32
    %c0_i32_1 = arith.constant 0 : i32
    return %c0_i32, %c0_i32_0 : i32, i32
  }
  func.func @transform_2(%arg0: i32) -> (i32, i32) {
    %c0_i32 = arith.constant 0 : i32
    %c0_i32_0 = arith.constant 0 : i32
    %c0_i32_1 = arith.constant 0 : i32
    return %c0_i32, %c0_i32_0 : i32, i32
  }
  func.func @transform_3(%arg0: i32) -> (i32, i32) {
    %c0_i32 = arith.constant 0 : i32
    %c0_i32_0 = arith.constant 0 : i32
    return %arg0, %c0_i32 : i32, i32
  }
}

module attributes {stable_mosaic.version = 11 : i64} {
  func.func @_mha_kernel(%arg0: i32, %arg1: memref<8x2x96xbf16, #tpu.memory_space<vmem>>, %arg2: memref<8x2x32xbf16, #tpu.memory_space<vmem>>) attributes {dimension_semantics = [#tpu.dimension_semantics<parallel>], iteration_bounds = array<i64: 1>, scalar_prefetch = 0 : i64, scratch_operands = 0 : i64, tpu.core_type = #tpu.core_type<tc>, window_params = [{transform_indices = @transform_0, window_bounds = array<i64: 8, 2, 96>}, {transform_indices = @transform_1, window_bounds = array<i64: 8, 2, 32>}]} {
    %c0 = arith.constant 0 : index
    %c0_0 = arith.constant 0 : index
    %c0_1 = arith.constant 0 : index
    %0 = vector.load %arg1[%c0, %c0_0, %c0_1] : memref<8x2x96xbf16, #tpu.memory_space<vmem>>, vector<8x2x96xbf16>
    %1 = vector.extract_strided_slice %0 {offsets = [0, 0, 0], sizes = [8, 2, 8], strides = [1, 1, 1]} : vector<8x2x96xbf16> to vector<8x2x8xbf16>
    %2 = arith.extf %1 : vector<8x2x8xbf16> to vector<8x2x8xf32>
    %cst = arith.constant 0.353553385 : f32
    %3 = vector.broadcast %cst : f32 to vector<8x2x8xf32>
    %4 = arith.mulf %2, %3 : vector<8x2x8xf32>
    %5 = arith.truncf %4 : vector<8x2x8xf32> to vector<8x2x8xbf16>
    %6 = vector.extract_strided_slice %0 {offsets = [0, 0, 32], sizes = [8, 2, 8], strides = [1, 1, 1]} : vector<8x2x96xbf16> to vector<8x2x8xbf16>
    %7 = vector.extract_strided_slice %0 {offsets = [0, 0, 64], sizes = [8, 2, 8], strides = [1, 1, 1]} : vector<8x2x96xbf16> to vector<8x2x8xbf16>
    "tpu.trace_start"() <{level = 10 : i32, message = "bqd,bkd->bqk"}> : () -> ()
    %cst_2 = arith.constant dense<0.000000e+00> : vector<8x2x2xf32>
    %8 = tpu.matmul %5, %6, %cst_2 {dimension_numbers = #tpu.dot_dimension_numbers<[2], [2], [1], [1], [0, 0, 0, 1, 1, 1], [0], [0]>} : vector<8x2x8xbf16>, vector<8x2x8xbf16>, vector<8x2x2xf32> -> vector<8x2x2xf32>
    "tpu.trace_stop"() : () -> ()
    %cst_3 = arith.constant dense<0xFF800000> : vector<8x2xf32>
    %9 = vector.multi_reduction <maximumf>, %8, %cst_3 [2] : vector<8x2x2xf32> to vector<8x2xf32>
    %10 = vector.shape_cast %9 : vector<8x2xf32> to vector<8x2x1xf32>
    %11 = vector.broadcast %10 : vector<8x2x1xf32> to vector<8x2x2xf32>
    %12 = arith.subf %8, %11 : vector<8x2x2xf32>
    %13 = math.exp %12 : vector<8x2x2xf32>
    %cst_4 = arith.constant dense<0.000000e+00> : vector<8x2xf32>
    %14 = vector.multi_reduction <add>, %13, %cst_4 [2] : vector<8x2x2xf32> to vector<8x2xf32>
    %15 = vector.shape_cast %14 : vector<8x2xf32> to vector<8x2x1xf32>
    %16 = tpu.reciprocal %15 {approx = true} : vector<8x2x1xf32> -> vector<8x2x1xf32>
    %17 = vector.broadcast %16 : vector<8x2x1xf32> to vector<8x2x2xf32>
    %18 = arith.mulf %13, %17 : vector<8x2x2xf32>
    %19 = arith.truncf %18 : vector<8x2x2xf32> to vector<8x2x2xbf16>
    "tpu.trace_start"() <{level = 10 : i32, message = "bqk,bkd->bqd"}> : () -> ()
    %cst_5 = arith.constant dense<0.000000e+00> : vector<8x2x8xf32>
    %20 = tpu.matmul %19, %7, %cst_5 {dimension_numbers = #tpu.dot_dimension_numbers<[2], [1], [1], [2], [0, 0, 0, 1, 1, 2], [0], [0]>} : vector<8x2x2xbf16>, vector<8x2x8xbf16>, vector<8x2x8xf32> -> vector<8x2x8xf32>
    "tpu.trace_stop"() : () -> ()
    %21 = vector.extract_strided_slice %0 {offsets = [0, 0, 8], sizes = [8, 2, 8], strides = [1, 1, 1]} : vector<8x2x96xbf16> to vector<8x2x8xbf16>
    %22 = arith.extf %21 : vector<8x2x8xbf16> to vector<8x2x8xf32>
    %cst_6 = arith.constant 0.353553385 : f32
    %23 = vector.broadcast %cst_6 : f32 to vector<8x2x8xf32>
    %24 = arith.mulf %22, %23 : vector<8x2x8xf32>
    %25 = arith.truncf %24 : vector<8x2x8xf32> to vector<8x2x8xbf16>
    %26 = vector.extract_strided_slice %0 {offsets = [0, 0, 40], sizes = [8, 2, 8], strides = [1, 1, 1]} : vector<8x2x96xbf16> to vector<8x2x8xbf16>
    %27 = vector.extract_strided_slice %0 {offsets = [0, 0, 72], sizes = [8, 2, 8], strides = [1, 1, 1]} : vector<8x2x96xbf16> to vector<8x2x8xbf16>
    "tpu.trace_start"() <{level = 10 : i32, message = "bqd,bkd->bqk"}> : () -> ()
    %cst_7 = arith.constant dense<0.000000e+00> : vector<8x2x2xf32>
    %28 = tpu.matmul %25, %26, %cst_7 {dimension_numbers = #tpu.dot_dimension_numbers<[2], [2], [1], [1], [0, 0, 0, 1, 1, 1], [0], [0]>} : vector<8x2x8xbf16>, vector<8x2x8xbf16>, vector<8x2x2xf32> -> vector<8x2x2xf32>
    "tpu.trace_stop"() : () -> ()
    %cst_8 = arith.constant dense<0xFF800000> : vector<8x2xf32>
    %29 = vector.multi_reduction <maximumf>, %28, %cst_8 [2] : vector<8x2x2xf32> to vector<8x2xf32>
    %30 = vector.shape_cast %29 : vector<8x2xf32> to vector<8x2x1xf32>
    %31 = vector.broadcast %30 : vector<8x2x1xf32> to vector<8x2x2xf32>
    %32 = arith.subf %28, %31 : vector<8x2x2xf32>
    %33 = math.exp %32 : vector<8x2x2xf32>
    %cst_9 = arith.constant dense<0.000000e+00> : vector<8x2xf32>
    %34 = vector.multi_reduction <add>, %33, %cst_9 [2] : vector<8x2x2xf32> to vector<8x2xf32>
    %35 = vector.shape_cast %34 : vector<8x2xf32> to vector<8x2x1xf32>
    %36 = tpu.reciprocal %35 {approx = true} : vector<8x2x1xf32> -> vector<8x2x1xf32>
    %37 = vector.broadcast %36 : vector<8x2x1xf32> to vector<8x2x2xf32>
    %38 = arith.mulf %33, %37 : vector<8x2x2xf32>
    %39 = arith.truncf %38 : vector<8x2x2xf32> to vector<8x2x2xbf16>
    "tpu.trace_start"() <{level = 10 : i32, message = "bqk,bkd->bqd"}> : () -> ()
    %cst_10 = arith.constant dense<0.000000e+00> : vector<8x2x8xf32>
    %40 = tpu.matmul %39, %27, %cst_10 {dimension_numbers = #tpu.dot_dimension_numbers<[2], [1], [1], [2], [0, 0, 0, 1, 1, 2], [0], [0]>} : vector<8x2x2xbf16>, vector<8x2x8xbf16>, vector<8x2x8xf32> -> vector<8x2x8xf32>
    "tpu.trace_stop"() : () -> ()
    %41 = vector.extract_strided_slice %0 {offsets = [0, 0, 16], sizes = [8, 2, 8], strides = [1, 1, 1]} : vector<8x2x96xbf16> to vector<8x2x8xbf16>
    %42 = arith.extf %41 : vector<8x2x8xbf16> to vector<8x2x8xf32>
    %cst_11 = arith.constant 0.353553385 : f32
    %43 = vector.broadcast %cst_11 : f32 to vector<8x2x8xf32>
    %44 = arith.mulf %42, %43 : vector<8x2x8xf32>
    %45 = arith.truncf %44 : vector<8x2x8xf32> to vector<8x2x8xbf16>
    %46 = vector.extract_strided_slice %0 {offsets = [0, 0, 48], sizes = [8, 2, 8], strides = [1, 1, 1]} : vector<8x2x96xbf16> to vector<8x2x8xbf16>
    %47 = vector.extract_strided_slice %0 {offsets = [0, 0, 80], sizes = [8, 2, 8], strides = [1, 1, 1]} : vector<8x2x96xbf16> to vector<8x2x8xbf16>
    "tpu.trace_start"() <{level = 10 : i32, message = "bqd,bkd->bqk"}> : () -> ()
    %cst_12 = arith.constant dense<0.000000e+00> : vector<8x2x2xf32>
    %48 = tpu.matmul %45, %46, %cst_12 {dimension_numbers = #tpu.dot_dimension_numbers<[2], [2], [1], [1], [0, 0, 0, 1, 1, 1], [0], [0]>} : vector<8x2x8xbf16>, vector<8x2x8xbf16>, vector<8x2x2xf32> -> vector<8x2x2xf32>
    "tpu.trace_stop"() : () -> ()
    %cst_13 = arith.constant dense<0xFF800000> : vector<8x2xf32>
    %49 = vector.multi_reduction <maximumf>, %48, %cst_13 [2] : vector<8x2x2xf32> to vector<8x2xf32>
    %50 = vector.shape_cast %49 : vector<8x2xf32> to vector<8x2x1xf32>
    %51 = vector.broadcast %50 : vector<8x2x1xf32> to vector<8x2x2xf32>
    %52 = arith.subf %48, %51 : vector<8x2x2xf32>
    %53 = math.exp %52 : vector<8x2x2xf32>
    %cst_14 = arith.constant dense<0.000000e+00> : vector<8x2xf32>
    %54 = vector.multi_reduction <add>, %53, %cst_14 [2] : vector<8x2x2xf32> to vector<8x2xf32>
    %55 = vector.shape_cast %54 : vector<8x2xf32> to vector<8x2x1xf32>
    %56 = tpu.reciprocal %55 {approx = true} : vector<8x2x1xf32> -> vector<8x2x1xf32>
    %57 = vector.broadcast %56 : vector<8x2x1xf32> to vector<8x2x2xf32>
    %58 = arith.mulf %53, %57 : vector<8x2x2xf32>
    %59 = arith.truncf %58 : vector<8x2x2xf32> to vector<8x2x2xbf16>
    "tpu.trace_start"() <{level = 10 : i32, message = "bqk,bkd->bqd"}> : () -> ()
    %cst_15 = arith.constant dense<0.000000e+00> : vector<8x2x8xf32>
    %60 = tpu.matmul %59, %47, %cst_15 {dimension_numbers = #tpu.dot_dimension_numbers<[2], [1], [1], [2], [0, 0, 0, 1, 1, 2], [0], [0]>} : vector<8x2x2xbf16>, vector<8x2x8xbf16>, vector<8x2x8xf32> -> vector<8x2x8xf32>
    "tpu.trace_stop"() : () -> ()
    %61 = vector.extract_strided_slice %0 {offsets = [0, 0, 24], sizes = [8, 2, 8], strides = [1, 1, 1]} : vector<8x2x96xbf16> to vector<8x2x8xbf16>
    %62 = arith.extf %61 : vector<8x2x8xbf16> to vector<8x2x8xf32>
    %cst_16 = arith.constant 0.353553385 : f32
    %63 = vector.broadcast %cst_16 : f32 to vector<8x2x8xf32>
    %64 = arith.mulf %62, %63 : vector<8x2x8xf32>
    %65 = arith.truncf %64 : vector<8x2x8xf32> to vector<8x2x8xbf16>
    %66 = vector.extract_strided_slice %0 {offsets = [0, 0, 56], sizes = [8, 2, 8], strides = [1, 1, 1]} : vector<8x2x96xbf16> to vector<8x2x8xbf16>
    %67 = vector.extract_strided_slice %0 {offsets = [0, 0, 88], sizes = [8, 2, 8], strides = [1, 1, 1]} : vector<8x2x96xbf16> to vector<8x2x8xbf16>
    "tpu.trace_start"() <{level = 10 : i32, message = "bqd,bkd->bqk"}> : () -> ()
    %cst_17 = arith.constant dense<0.000000e+00> : vector<8x2x2xf32>
    %68 = tpu.matmul %65, %66, %cst_17 {dimension_numbers = #tpu.dot_dimension_numbers<[2], [2], [1], [1], [0, 0, 0, 1, 1, 1], [0], [0]>} : vector<8x2x8xbf16>, vector<8x2x8xbf16>, vector<8x2x2xf32> -> vector<8x2x2xf32>
    "tpu.trace_stop"() : () -> ()
    %cst_18 = arith.constant dense<0xFF800000> : vector<8x2xf32>
    %69 = vector.multi_reduction <maximumf>, %68, %cst_18 [2] : vector<8x2x2xf32> to vector<8x2xf32>
    %70 = vector.shape_cast %69 : vector<8x2xf32> to vector<8x2x1xf32>
    %71 = vector.broadcast %70 : vector<8x2x1xf32> to vector<8x2x2xf32>
    %72 = arith.subf %68, %71 : vector<8x2x2xf32>
    %73 = math.exp %72 : vector<8x2x2xf32>
    %cst_19 = arith.constant dense<0.000000e+00> : vector<8x2xf32>
    %74 = vector.multi_reduction <add>, %73, %cst_19 [2] : vector<8x2x2xf32> to vector<8x2xf32>
    %75 = vector.shape_cast %74 : vector<8x2xf32> to vector<8x2x1xf32>
    %76 = tpu.reciprocal %75 {approx = true} : vector<8x2x1xf32> -> vector<8x2x1xf32>
    %77 = vector.broadcast %76 : vector<8x2x1xf32> to vector<8x2x2xf32>
    %78 = arith.mulf %73, %77 : vector<8x2x2xf32>
    %79 = arith.truncf %78 : vector<8x2x2xf32> to vector<8x2x2xbf16>
    "tpu.trace_start"() <{level = 10 : i32, message = "bqk,bkd->bqd"}> : () -> ()
    %cst_20 = arith.constant dense<0.000000e+00> : vector<8x2x8xf32>
    %80 = tpu.matmul %79, %67, %cst_20 {dimension_numbers = #tpu.dot_dimension_numbers<[2], [1], [1], [2], [0, 0, 0, 1, 1, 2], [0], [0]>} : vector<8x2x2xbf16>, vector<8x2x8xbf16>, vector<8x2x8xf32> -> vector<8x2x8xf32>
    "tpu.trace_stop"() : () -> ()
    %81 = tpu.concatenate %20, %40, %60, %80 in 2 : vector<8x2x8xf32>, vector<8x2x8xf32>, vector<8x2x8xf32>, vector<8x2x8xf32> -> vector<8x2x32xf32>
    %82 = arith.truncf %81 : vector<8x2x32xf32> to vector<8x2x32xbf16>
    %c0_21 = arith.constant 0 : index
    %c0_22 = arith.constant 0 : index
    %c0_23 = arith.constant 0 : index
    %83 = vector.load %arg2[%c0_21, %c0_22, %c0_23] : memref<8x2x32xbf16, #tpu.memory_space<vmem>>, vector<8x2x32xbf16>
    tpu.vector_store %arg2[%c0_21, %c0_22, %c0_23], %82 {strides = array<i32>} : memref<8x2x32xbf16, #tpu.memory_space<vmem>>, vector<8x2x32xbf16>,
    return
  }
  func.func @transform_0(%arg0: i32) -> (i32, i32, i32) {
    %c0_i32 = arith.constant 0 : i32
    %c0_i32_0 = arith.constant 0 : i32
    %c0_i32_1 = arith.constant 0 : i32
    return %arg0, %c0_i32, %c0_i32_0 : i32, i32, i32
  }
  func.func @transform_1(%arg0: i32) -> (i32, i32, i32) {
    %c0_i32 = arith.constant 0 : i32
    %c0_i32_0 = arith.constant 0 : i32
    %c0_i32_1 = arith.constant 0 : i32
    return %arg0, %c0_i32, %c0_i32_0 : i32, i32, i32
  }
}

module attributes {stable_mosaic.version = 11 : i64} {
  func.func @_linear_kernel(%arg0: i32, %arg1: memref<16x32xbf16, #tpu.memory_space<vmem>>, %arg2: memref<32x32xbf16, #tpu.memory_space<vmem>>, %arg3: memref<1x32xf32, #tpu.memory_space<vmem>>, %arg4: memref<16x32xf32, #tpu.memory_space<vmem>>, %arg5: memref<16x32xf32, #tpu.memory_space<vmem>>) attributes {dimension_semantics = [#tpu.dimension_semantics<parallel>], iteration_bounds = array<i64: 1>, scalar_prefetch = 0 : i64, scratch_operands = 0 : i64, tpu.core_type = #tpu.core_type<tc>, window_params = [{transform_indices = @transform_0, window_bounds = array<i64: 16, 32>}, {pipeline_mode = #tpu.pipeline_mode<synchronous>, transform_indices = @transform_1, window_bounds = array<i64: 32, 32>}, {pipeline_mode = #tpu.pipeline_mode<synchronous>, transform_indices = @transform_2, window_bounds = array<i64: 1, 32>}, {transform_indices = @transform_3, window_bounds = array<i64: 16, 32>}, {transform_indices = @transform_4, window_bounds = array<i64: 16, 32>}]} {
    %c0 = arith.constant 0 : index
    %c0_0 = arith.constant 0 : index
    %0 = vector.load %arg1[%c0, %c0_0] : memref<16x32xbf16, #tpu.memory_space<vmem>>, vector<16x32xbf16>
    %c0_1 = arith.constant 0 : index
    %c0_2 = arith.constant 0 : index
    %1 = vector.load %arg2[%c0_1, %c0_2] : memref<32x32xbf16, #tpu.memory_space<vmem>>, vector<32x32xbf16>
    %cst = arith.constant dense<0.000000e+00> : vector<16x32xf32>
    %2 = tpu.matmul %0, %1, %cst {dimension_numbers = #tpu.dot_dimension_numbers<[1], [0], [0], [1], [0, 0, 1, 1], [], []>} : vector<16x32xbf16>, vector<32x32xbf16>, vector<16x32xf32> -> vector<16x32xf32>
    %c0_3 = arith.constant 0 : index
    %c0_4 = arith.constant 0 : index
    %3 = vector.load %arg3[%c0_3, %c0_4] : memref<1x32xf32, #tpu.memory_space<vmem>>, vector<1x32xf32>
    %4 = vector.broadcast %3 : vector<1x32xf32> to vector<16x32xf32>
    %5 = arith.addf %2, %4 : vector<16x32xf32>
    %c0_5 = arith.constant 0 : index
    %c0_6 = arith.constant 0 : index
    %6 = vector.load %arg4[%c0_5, %c0_6] : memref<16x32xf32, #tpu.memory_space<vmem>>, vector<16x32xf32>
    %7 = arith.addf %5, %6 : vector<16x32xf32>
    %c0_7 = arith.constant 0 : index
    %c0_8 = arith.constant 0 : index
    %8 = vector.load %arg5[%c0_7, %c0_8] : memref<16x32xf32, #tpu.memory_space<vmem>>, vector<16x32xf32>
    tpu.vector_store %arg5[%c0_7, %c0_8], %7 {strides = array<i32>} : memref<16x32xf32, #tpu.memory_space<vmem>>, vector<16x32xf32>,
    return
  }
  func.func @transform_0(%arg0: i32) -> (i32, i32) {
    %c0_i32 = arith.constant 0 : i32
    %c0_i32_0 = arith.constant 0 : i32
    return %arg0, %c0_i32 : i32, i32
  }
  func.func @transform_1(%arg0: i32) -> (i32, i32) {
    %c0_i32 = arith.constant 0 : i32
    %c0_i32_0 = arith.constant 0 : i32
    %c0_i32_1 = arith.constant 0 : i32
    return %c0_i32, %c0_i32_0 : i32, i32
  }
  func.func @transform_2(%arg0: i32) -> (i32, i32) {
    %c0_i32 = arith.constant 0 : i32
    %c0_i32_0 = arith.constant 0 : i32
    %c0_i32_1 = arith.constant 0 : i32
    return %c0_i32, %c0_i32_0 : i32, i32
  }
  func.func @transform_3(%arg0: i32) -> (i32, i32) {
    %c0_i32 = arith.constant 0 : i32
    %c0_i32_0 = arith.constant 0 : i32
    return %arg0, %c0_i32 : i32, i32
  }
  func.func @transform_4(%arg0: i32) -> (i32, i32) {
    %c0_i32 = arith.constant 0 : i32
    %c0_i32_0 = arith.constant 0 : i32
    return %arg0, %c0_i32 : i32, i32
  }
}

module attributes {stable_mosaic.version = 11 : i64} {
  func.func @_linear_kernel(%arg0: i32, %arg1: memref<16x32xbf16, #tpu.memory_space<vmem>>, %arg2: memref<32x32xbf16, #tpu.memory_space<vmem>>, %arg3: memref<1x32xf32, #tpu.memory_space<vmem>>, %arg4: memref<16x32xbf16, #tpu.memory_space<vmem>>) attributes {dimension_semantics = [#tpu.dimension_semantics<parallel>], iteration_bounds = array<i64: 1>, scalar_prefetch = 0 : i64, scratch_operands = 0 : i64, tpu.core_type = #tpu.core_type<tc>, window_params = [{transform_indices = @transform_0, window_bounds = array<i64: 16, 32>}, {pipeline_mode = #tpu.pipeline_mode<synchronous>, transform_indices = @transform_1, window_bounds = array<i64: 32, 32>}, {pipeline_mode = #tpu.pipeline_mode<synchronous>, transform_indices = @transform_2, window_bounds = array<i64: 1, 32>}, {transform_indices = @transform_3, window_bounds = array<i64: 16, 32>}]} {
    %c0 = arith.constant 0 : index
    %c0_0 = arith.constant 0 : index
    %0 = vector.load %arg1[%c0, %c0_0] : memref<16x32xbf16, #tpu.memory_space<vmem>>, vector<16x32xbf16>
    %c0_1 = arith.constant 0 : index
    %c0_2 = arith.constant 0 : index
    %1 = vector.load %arg2[%c0_1, %c0_2] : memref<32x32xbf16, #tpu.memory_space<vmem>>, vector<32x32xbf16>
    %cst = arith.constant dense<0.000000e+00> : vector<16x32xf32>
    %2 = tpu.matmul %0, %1, %cst {dimension_numbers = #tpu.dot_dimension_numbers<[1], [0], [0], [1], [0, 0, 1, 1], [], []>} : vector<16x32xbf16>, vector<32x32xbf16>, vector<16x32xf32> -> vector<16x32xf32>
    %c0_3 = arith.constant 0 : index
    %c0_4 = arith.constant 0 : index
    %3 = vector.load %arg3[%c0_3, %c0_4] : memref<1x32xf32, #tpu.memory_space<vmem>>, vector<1x32xf32>
    %4 = vector.broadcast %3 : vector<1x32xf32> to vector<16x32xf32>
    %5 = arith.addf %2, %4 : vector<16x32xf32>
    %6 = arith.truncf %5 : vector<16x32xf32> to vector<16x32xbf16>
    %c0_5 = arith.constant 0 : index
    %c0_6 = arith.constant 0 : index
    %7 = vector.load %arg4[%c0_5, %c0_6] : memref<16x32xbf16, #tpu.memory_space<vmem>>, vector<16x32xbf16>
    tpu.vector_store %arg4[%c0_5, %c0_6], %6 {strides = array<i32>} : memref<16x32xbf16, #tpu.memory_space<vmem>>, vector<16x32xbf16>,
    return
  }
  func.func @transform_0(%arg0: i32) -> (i32, i32) {
    %c0_i32 = arith.constant 0 : i32
    %c0_i32_0 = arith.constant 0 : i32
    return %arg0, %c0_i32 : i32, i32
  }
  func.func @transform_1(%arg0: i32) -> (i32, i32) {
    %c0_i32 = arith.constant 0 : i32
    %c0_i32_0 = arith.constant 0 : i32
    %c0_i32_1 = arith.constant 0 : i32
    return %c0_i32, %c0_i32_0 : i32, i32
  }
  func.func @transform_2(%arg0: i32) -> (i32, i32) {
    %c0_i32 = arith.constant 0 : i32
    %c0_i32_0 = arith.constant 0 : i32
    %c0_i32_1 = arith.constant 0 : i32
    return %c0_i32, %c0_i32_0 : i32, i32
  }
  func.func @transform_3(%arg0: i32) -> (i32, i32) {
    %c0_i32 = arith.constant 0 : i32
    %c0_i32_0 = arith.constant 0 : i32
    return %arg0, %c0_i32 : i32, i32
  }
}

module attributes {stable_mosaic.version = 11 : i64} {
  func.func @_layernorm_kernel(%arg0: i32, %arg1: memref<20x32xf32, #tpu.memory_space<vmem>>, %arg2: memref<1x32xf32, #tpu.memory_space<vmem>>, %arg3: memref<1x32xf32, #tpu.memory_space<vmem>>, %arg4: memref<20x32xbf16, #tpu.memory_space<vmem>>) attributes {dimension_semantics = [#tpu.dimension_semantics<parallel>], iteration_bounds = array<i64: 1>, scalar_prefetch = 0 : i64, scratch_operands = 0 : i64, tpu.core_type = #tpu.core_type<tc>, window_params = [{transform_indices = @transform_0, window_bounds = array<i64: 20, 32>}, {pipeline_mode = #tpu.pipeline_mode<synchronous>, transform_indices = @transform_1, window_bounds = array<i64: 1, 32>}, {pipeline_mode = #tpu.pipeline_mode<synchronous>, transform_indices = @transform_2, window_bounds = array<i64: 1, 32>}, {transform_indices = @transform_3, window_bounds = array<i64: 20, 32>}]} {
    %c0 = arith.constant 0 : index
    %c0_0 = arith.constant 0 : index
    %0 = vector.load %arg1[%c0, %c0_0] : memref<20x32xf32, #tpu.memory_space<vmem>>, vector<20x32xf32>
    %cst = arith.constant dense<0.000000e+00> : vector<20xf32>
    %1 = vector.multi_reduction <add>, %0, %cst [1] : vector<20x32xf32> to vector<20xf32>
    %2 = vector.shape_cast %1 : vector<20xf32> to vector<20x1xf32>
    %cst_1 = arith.constant 3.200000e+01 : f32
    %3 = vector.broadcast %cst_1 : f32 to vector<20x1xf32>
    %4 = arith.divf %2, %3 : vector<20x1xf32>
    %5 = vector.broadcast %4 : vector<20x1xf32> to vector<20x32xf32>
    %6 = arith.subf %0, %5 : vector<20x32xf32>
    %7 = arith.mulf %6, %6 : vector<20x32xf32>
    %cst_2 = arith.constant dense<0.000000e+00> : vector<20xf32>
    %8 = vector.multi_reduction <add>, %7, %cst_2 [1] : vector<20x32xf32> to vector<20xf32>
    %9 = vector.shape_cast %8 : vector<20xf32> to vector<20x1xf32>
    %cst_3 = arith.constant 3.200000e+01 : f32
    %10 = vector.broadcast %cst_3 : f32 to vector<20x1xf32>
    %11 = arith.divf %9, %10 : vector<20x1xf32>
    %cst_4 = arith.constant 9.99999997E-7 : f32
    %12 = vector.broadcast %cst_4 : f32 to vector<20x1xf32>
    %13 = arith.addf %11, %12 : vector<20x1xf32>
    %14 = math.rsqrt %13 : vector<20x1xf32>
    %15 = vector.broadcast %14 : vector<20x1xf32> to vector<20x32xf32>
    %16 = arith.mulf %6, %15 : vector<20x32xf32>
    %c0_5 = arith.constant 0 : index
    %c0_6 = arith.constant 0 : index
    %17 = vector.load %arg2[%c0_5, %c0_6] : memref<1x32xf32, #tpu.memory_space<vmem>>, vector<1x32xf32>
    %18 = vector.broadcast %17 : vector<1x32xf32> to vector<20x32xf32>
    %19 = arith.mulf %16, %18 : vector<20x32xf32>
    %c0_7 = arith.constant 0 : index
    %c0_8 = arith.constant 0 : index
    %20 = vector.load %arg3[%c0_7, %c0_8] : memref<1x32xf32, #tpu.memory_space<vmem>>, vector<1x32xf32>
    %21 = vector.broadcast %20 : vector<1x32xf32> to vector<20x32xf32>
    %22 = arith.addf %19, %21 : vector<20x32xf32>
    %23 = arith.truncf %22 : vector<20x32xf32> to vector<20x32xbf16>
    %c0_9 = arith.constant 0 : index
    %c0_10 = arith.constant 0 : index
    %24 = vector.load %arg4[%c0_9, %c0_10] : memref<20x32xbf16, #tpu.memory_space<vmem>>, vector<20x32xbf16>
    tpu.vector_store %arg4[%c0_9, %c0_10], %23 {strides = array<i32>} : memref<20x32xbf16, #tpu.memory_space<vmem>>, vector<20x32xbf16>,
    return
  }
  func.func @transform_0(%arg0: i32) -> (i32, i32) {
    %c0_i32 = arith.constant 0 : i32
    %c0_i32_0 = arith.constant 0 : i32
    return %arg0, %c0_i32 : i32, i32
  }
  func.func @transform_1(%arg0: i32) -> (i32, i32) {
    %c0_i32 = arith.constant 0 : i32
    %c0_i32_0 = arith.constant 0 : i32
    %c0_i32_1 = arith.constant 0 : i32
    return %c0_i32, %c0_i32_0 : i32, i32
  }
  func.func @transform_2(%arg0: i32) -> (i32, i32) {
    %c0_i32 = arith.constant 0 : i32
    %c0_i32_0 = arith.constant 0 : i32
    %c0_i32_1 = arith.constant 0 : i32
    return %c0_i32, %c0_i32_0 : i32, i32
  }
  func.func @transform_3(%arg0: i32) -> (i32, i32) {
    %c0_i32 = arith.constant 0 : i32
    %c0_i32_0 = arith.constant 0 : i32
    return %arg0, %c0_i32 : i32, i32
  }
}

module attributes {stable_mosaic.version = 11 : i64} {
  func.func @_linear_kernel(%arg0: i32, %arg1: memref<20x32xbf16, #tpu.memory_space<vmem>>, %arg2: memref<32x96xbf16, #tpu.memory_space<vmem>>, %arg3: memref<1x96xf32, #tpu.memory_space<vmem>>, %arg4: memref<20x96xbf16, #tpu.memory_space<vmem>>) attributes {dimension_semantics = [#tpu.dimension_semantics<parallel>], iteration_bounds = array<i64: 1>, scalar_prefetch = 0 : i64, scratch_operands = 0 : i64, tpu.core_type = #tpu.core_type<tc>, window_params = [{transform_indices = @transform_0, window_bounds = array<i64: 20, 32>}, {pipeline_mode = #tpu.pipeline_mode<synchronous>, transform_indices = @transform_1, window_bounds = array<i64: 32, 96>}, {pipeline_mode = #tpu.pipeline_mode<synchronous>, transform_indices = @transform_2, window_bounds = array<i64: 1, 96>}, {transform_indices = @transform_3, window_bounds = array<i64: 20, 96>}]} {
    %c0 = arith.constant 0 : index
    %c0_0 = arith.constant 0 : index
    %0 = vector.load %arg1[%c0, %c0_0] : memref<20x32xbf16, #tpu.memory_space<vmem>>, vector<20x32xbf16>
    %c0_1 = arith.constant 0 : index
    %c0_2 = arith.constant 0 : index
    %1 = vector.load %arg2[%c0_1, %c0_2] : memref<32x96xbf16, #tpu.memory_space<vmem>>, vector<32x96xbf16>
    %cst = arith.constant dense<0.000000e+00> : vector<20x96xf32>
    %2 = tpu.matmul %0, %1, %cst {dimension_numbers = #tpu.dot_dimension_numbers<[1], [0], [0], [1], [0, 0, 1, 1], [], []>} : vector<20x32xbf16>, vector<32x96xbf16>, vector<20x96xf32> -> vector<20x96xf32>
    %c0_3 = arith.constant 0 : index
    %c0_4 = arith.constant 0 : index
    %3 = vector.load %arg3[%c0_3, %c0_4] : memref<1x96xf32, #tpu.memory_space<vmem>>, vector<1x96xf32>
    %4 = vector.broadcast %3 : vector<1x96xf32> to vector<20x96xf32>
    %5 = arith.addf %2, %4 : vector<20x96xf32>
    %6 = arith.truncf %5 : vector<20x96xf32> to vector<20x96xbf16>
    %c0_5 = arith.constant 0 : index
    %c0_6 = arith.constant 0 : index
    %7 = vector.load %arg4[%c0_5, %c0_6] : memref<20x96xbf16, #tpu.memory_space<vmem>>, vector<20x96xbf16>
    tpu.vector_store %arg4[%c0_5, %c0_6], %6 {strides = array<i32>} : memref<20x96xbf16, #tpu.memory_space<vmem>>, vector<20x96xbf16>,
    return
  }
  func.func @transform_0(%arg0: i32) -> (i32, i32) {
    %c0_i32 = arith.constant 0 : i32
    %c0_i32_0 = arith.constant 0 : i32
    return %arg0, %c0_i32 : i32, i32
  }
  func.func @transform_1(%arg0: i32) -> (i32, i32) {
    %c0_i32 = arith.constant 0 : i32
    %c0_i32_0 = arith.constant 0 : i32
    %c0_i32_1 = arith.constant 0 : i32
    return %c0_i32, %c0_i32_0 : i32, i32
  }
  func.func @transform_2(%arg0: i32) -> (i32, i32) {
    %c0_i32 = arith.constant 0 : i32
    %c0_i32_0 = arith.constant 0 : i32
    %c0_i32_1 = arith.constant 0 : i32
    return %c0_i32, %c0_i32_0 : i32, i32
  }
  func.func @transform_3(%arg0: i32) -> (i32, i32) {
    %c0_i32 = arith.constant 0 : i32
    %c0_i32_0 = arith.constant 0 : i32
    return %arg0, %c0_i32 : i32, i32
  }
}

module attributes {stable_mosaic.version = 11 : i64} {
  func.func @_mha_kernel(%arg0: i32, %arg1: memref<4x5x96xbf16, #tpu.memory_space<vmem>>, %arg2: memref<4x5x32xbf16, #tpu.memory_space<vmem>>) attributes {dimension_semantics = [#tpu.dimension_semantics<parallel>], iteration_bounds = array<i64: 1>, scalar_prefetch = 0 : i64, scratch_operands = 0 : i64, tpu.core_type = #tpu.core_type<tc>, window_params = [{transform_indices = @transform_0, window_bounds = array<i64: 4, 5, 96>}, {transform_indices = @transform_1, window_bounds = array<i64: 4, 5, 32>}]} {
    %c0 = arith.constant 0 : index
    %c0_0 = arith.constant 0 : index
    %c0_1 = arith.constant 0 : index
    %0 = vector.load %arg1[%c0, %c0_0, %c0_1] : memref<4x5x96xbf16, #tpu.memory_space<vmem>>, vector<4x5x96xbf16>
    %1 = vector.extract_strided_slice %0 {offsets = [0, 0, 0], sizes = [4, 5, 8], strides = [1, 1, 1]} : vector<4x5x96xbf16> to vector<4x5x8xbf16>
    %2 = arith.extf %1 : vector<4x5x8xbf16> to vector<4x5x8xf32>
    %cst = arith.constant 0.353553385 : f32
    %3 = vector.broadcast %cst : f32 to vector<4x5x8xf32>
    %4 = arith.mulf %2, %3 : vector<4x5x8xf32>
    %5 = arith.truncf %4 : vector<4x5x8xf32> to vector<4x5x8xbf16>
    %6 = vector.extract_strided_slice %0 {offsets = [0, 0, 32], sizes = [4, 5, 8], strides = [1, 1, 1]} : vector<4x5x96xbf16> to vector<4x5x8xbf16>
    %7 = vector.extract_strided_slice %0 {offsets = [0, 0, 64], sizes = [4, 5, 8], strides = [1, 1, 1]} : vector<4x5x96xbf16> to vector<4x5x8xbf16>
    "tpu.trace_start"() <{level = 10 : i32, message = "bqd,bkd->bqk"}> : () -> ()
    %cst_2 = arith.constant dense<0.000000e+00> : vector<4x5x5xf32>
    %8 = tpu.matmul %5, %6, %cst_2 {dimension_numbers = #tpu.dot_dimension_numbers<[2], [2], [1], [1], [0, 0, 0, 1, 1, 1], [0], [0]>} : vector<4x5x8xbf16>, vector<4x5x8xbf16>, vector<4x5x5xf32> -> vector<4x5x5xf32>
    "tpu.trace_stop"() : () -> ()
    %cst_3 = arith.constant dense<0xFF800000> : vector<4x5xf32>
    %9 = vector.multi_reduction <maximumf>, %8, %cst_3 [2] : vector<4x5x5xf32> to vector<4x5xf32>
    %10 = vector.shape_cast %9 : vector<4x5xf32> to vector<4x5x1xf32>
    %11 = vector.broadcast %10 : vector<4x5x1xf32> to vector<4x5x5xf32>
    %12 = arith.subf %8, %11 : vector<4x5x5xf32>
    %13 = math.exp %12 : vector<4x5x5xf32>
    %cst_4 = arith.constant dense<0.000000e+00> : vector<4x5xf32>
    %14 = vector.multi_reduction <add>, %13, %cst_4 [2] : vector<4x5x5xf32> to vector<4x5xf32>
    %15 = vector.shape_cast %14 : vector<4x5xf32> to vector<4x5x1xf32>
    %16 = tpu.reciprocal %15 {approx = true} : vector<4x5x1xf32> -> vector<4x5x1xf32>
    %17 = vector.broadcast %16 : vector<4x5x1xf32> to vector<4x5x5xf32>
    %18 = arith.mulf %13, %17 : vector<4x5x5xf32>
    %19 = arith.truncf %18 : vector<4x5x5xf32> to vector<4x5x5xbf16>
    "tpu.trace_start"() <{level = 10 : i32, message = "bqk,bkd->bqd"}> : () -> ()
    %cst_5 = arith.constant dense<0.000000e+00> : vector<4x5x8xf32>
    %20 = tpu.matmul %19, %7, %cst_5 {dimension_numbers = #tpu.dot_dimension_numbers<[2], [1], [1], [2], [0, 0, 0, 1, 1, 2], [0], [0]>} : vector<4x5x5xbf16>, vector<4x5x8xbf16>, vector<4x5x8xf32> -> vector<4x5x8xf32>
    "tpu.trace_stop"() : () -> ()
    %21 = vector.extract_strided_slice %0 {offsets = [0, 0, 8], sizes = [4, 5, 8], strides = [1, 1, 1]} : vector<4x5x96xbf16> to vector<4x5x8xbf16>
    %22 = arith.extf %21 : vector<4x5x8xbf16> to vector<4x5x8xf32>
    %cst_6 = arith.constant 0.353553385 : f32
    %23 = vector.broadcast %cst_6 : f32 to vector<4x5x8xf32>
    %24 = arith.mulf %22, %23 : vector<4x5x8xf32>
    %25 = arith.truncf %24 : vector<4x5x8xf32> to vector<4x5x8xbf16>
    %26 = vector.extract_strided_slice %0 {offsets = [0, 0, 40], sizes = [4, 5, 8], strides = [1, 1, 1]} : vector<4x5x96xbf16> to vector<4x5x8xbf16>
    %27 = vector.extract_strided_slice %0 {offsets = [0, 0, 72], sizes = [4, 5, 8], strides = [1, 1, 1]} : vector<4x5x96xbf16> to vector<4x5x8xbf16>
    "tpu.trace_start"() <{level = 10 : i32, message = "bqd,bkd->bqk"}> : () -> ()
    %cst_7 = arith.constant dense<0.000000e+00> : vector<4x5x5xf32>
    %28 = tpu.matmul %25, %26, %cst_7 {dimension_numbers = #tpu.dot_dimension_numbers<[2], [2], [1], [1], [0, 0, 0, 1, 1, 1], [0], [0]>} : vector<4x5x8xbf16>, vector<4x5x8xbf16>, vector<4x5x5xf32> -> vector<4x5x5xf32>
    "tpu.trace_stop"() : () -> ()
    %cst_8 = arith.constant dense<0xFF800000> : vector<4x5xf32>
    %29 = vector.multi_reduction <maximumf>, %28, %cst_8 [2] : vector<4x5x5xf32> to vector<4x5xf32>
    %30 = vector.shape_cast %29 : vector<4x5xf32> to vector<4x5x1xf32>
    %31 = vector.broadcast %30 : vector<4x5x1xf32> to vector<4x5x5xf32>
    %32 = arith.subf %28, %31 : vector<4x5x5xf32>
    %33 = math.exp %32 : vector<4x5x5xf32>
    %cst_9 = arith.constant dense<0.000000e+00> : vector<4x5xf32>
    %34 = vector.multi_reduction <add>, %33, %cst_9 [2] : vector<4x5x5xf32> to vector<4x5xf32>
    %35 = vector.shape_cast %34 : vector<4x5xf32> to vector<4x5x1xf32>
    %36 = tpu.reciprocal %35 {approx = true} : vector<4x5x1xf32> -> vector<4x5x1xf32>
    %37 = vector.broadcast %36 : vector<4x5x1xf32> to vector<4x5x5xf32>
    %38 = arith.mulf %33, %37 : vector<4x5x5xf32>
    %39 = arith.truncf %38 : vector<4x5x5xf32> to vector<4x5x5xbf16>
    "tpu.trace_start"() <{level = 10 : i32, message = "bqk,bkd->bqd"}> : () -> ()
    %cst_10 = arith.constant dense<0.000000e+00> : vector<4x5x8xf32>
    %40 = tpu.matmul %39, %27, %cst_10 {dimension_numbers = #tpu.dot_dimension_numbers<[2], [1], [1], [2], [0, 0, 0, 1, 1, 2], [0], [0]>} : vector<4x5x5xbf16>, vector<4x5x8xbf16>, vector<4x5x8xf32> -> vector<4x5x8xf32>
    "tpu.trace_stop"() : () -> ()
    %41 = vector.extract_strided_slice %0 {offsets = [0, 0, 16], sizes = [4, 5, 8], strides = [1, 1, 1]} : vector<4x5x96xbf16> to vector<4x5x8xbf16>
    %42 = arith.extf %41 : vector<4x5x8xbf16> to vector<4x5x8xf32>
    %cst_11 = arith.constant 0.353553385 : f32
    %43 = vector.broadcast %cst_11 : f32 to vector<4x5x8xf32>
    %44 = arith.mulf %42, %43 : vector<4x5x8xf32>
    %45 = arith.truncf %44 : vector<4x5x8xf32> to vector<4x5x8xbf16>
    %46 = vector.extract_strided_slice %0 {offsets = [0, 0, 48], sizes = [4, 5, 8], strides = [1, 1, 1]} : vector<4x5x96xbf16> to vector<4x5x8xbf16>
    %47 = vector.extract_strided_slice %0 {offsets = [0, 0, 80], sizes = [4, 5, 8], strides = [1, 1, 1]} : vector<4x5x96xbf16> to vector<4x5x8xbf16>
    "tpu.trace_start"() <{level = 10 : i32, message = "bqd,bkd->bqk"}> : () -> ()
    %cst_12 = arith.constant dense<0.000000e+00> : vector<4x5x5xf32>
    %48 = tpu.matmul %45, %46, %cst_12 {dimension_numbers = #tpu.dot_dimension_numbers<[2], [2], [1], [1], [0, 0, 0, 1, 1, 1], [0], [0]>} : vector<4x5x8xbf16>, vector<4x5x8xbf16>, vector<4x5x5xf32> -> vector<4x5x5xf32>
    "tpu.trace_stop"() : () -> ()
    %cst_13 = arith.constant dense<0xFF800000> : vector<4x5xf32>
    %49 = vector.multi_reduction <maximumf>, %48, %cst_13 [2] : vector<4x5x5xf32> to vector<4x5xf32>
    %50 = vector.shape_cast %49 : vector<4x5xf32> to vector<4x5x1xf32>
    %51 = vector.broadcast %50 : vector<4x5x1xf32> to vector<4x5x5xf32>
    %52 = arith.subf %48, %51 : vector<4x5x5xf32>
    %53 = math.exp %52 : vector<4x5x5xf32>
    %cst_14 = arith.constant dense<0.000000e+00> : vector<4x5xf32>
    %54 = vector.multi_reduction <add>, %53, %cst_14 [2] : vector<4x5x5xf32> to vector<4x5xf32>
    %55 = vector.shape_cast %54 : vector<4x5xf32> to vector<4x5x1xf32>
    %56 = tpu.reciprocal %55 {approx = true} : vector<4x5x1xf32> -> vector<4x5x1xf32>
    %57 = vector.broadcast %56 : vector<4x5x1xf32> to vector<4x5x5xf32>
    %58 = arith.mulf %53, %57 : vector<4x5x5xf32>
    %59 = arith.truncf %58 : vector<4x5x5xf32> to vector<4x5x5xbf16>
    "tpu.trace_start"() <{level = 10 : i32, message = "bqk,bkd->bqd"}> : () -> ()
    %cst_15 = arith.constant dense<0.000000e+00> : vector<4x5x8xf32>
    %60 = tpu.matmul %59, %47, %cst_15 {dimension_numbers = #tpu.dot_dimension_numbers<[2], [1], [1], [2], [0, 0, 0, 1, 1, 2], [0], [0]>} : vector<4x5x5xbf16>, vector<4x5x8xbf16>, vector<4x5x8xf32> -> vector<4x5x8xf32>
    "tpu.trace_stop"() : () -> ()
    %61 = vector.extract_strided_slice %0 {offsets = [0, 0, 24], sizes = [4, 5, 8], strides = [1, 1, 1]} : vector<4x5x96xbf16> to vector<4x5x8xbf16>
    %62 = arith.extf %61 : vector<4x5x8xbf16> to vector<4x5x8xf32>
    %cst_16 = arith.constant 0.353553385 : f32
    %63 = vector.broadcast %cst_16 : f32 to vector<4x5x8xf32>
    %64 = arith.mulf %62, %63 : vector<4x5x8xf32>
    %65 = arith.truncf %64 : vector<4x5x8xf32> to vector<4x5x8xbf16>
    %66 = vector.extract_strided_slice %0 {offsets = [0, 0, 56], sizes = [4, 5, 8], strides = [1, 1, 1]} : vector<4x5x96xbf16> to vector<4x5x8xbf16>
    %67 = vector.extract_strided_slice %0 {offsets = [0, 0, 88], sizes = [4, 5, 8], strides = [1, 1, 1]} : vector<4x5x96xbf16> to vector<4x5x8xbf16>
    "tpu.trace_start"() <{level = 10 : i32, message = "bqd,bkd->bqk"}> : () -> ()
    %cst_17 = arith.constant dense<0.000000e+00> : vector<4x5x5xf32>
    %68 = tpu.matmul %65, %66, %cst_17 {dimension_numbers = #tpu.dot_dimension_numbers<[2], [2], [1], [1], [0, 0, 0, 1, 1, 1], [0], [0]>} : vector<4x5x8xbf16>, vector<4x5x8xbf16>, vector<4x5x5xf32> -> vector<4x5x5xf32>
    "tpu.trace_stop"() : () -> ()
    %cst_18 = arith.constant dense<0xFF800000> : vector<4x5xf32>
    %69 = vector.multi_reduction <maximumf>, %68, %cst_18 [2] : vector<4x5x5xf32> to vector<4x5xf32>
    %70 = vector.shape_cast %69 : vector<4x5xf32> to vector<4x5x1xf32>
    %71 = vector.broadcast %70 : vector<4x5x1xf32> to vector<4x5x5xf32>
    %72 = arith.subf %68, %71 : vector<4x5x5xf32>
    %73 = math.exp %72 : vector<4x5x5xf32>
    %cst_19 = arith.constant dense<0.000000e+00> : vector<4x5xf32>
    %74 = vector.multi_reduction <add>, %73, %cst_19 [2] : vector<4x5x5xf32> to vector<4x5xf32>
    %75 = vector.shape_cast %74 : vector<4x5xf32> to vector<4x5x1xf32>
    %76 = tpu.reciprocal %75 {approx = true} : vector<4x5x1xf32> -> vector<4x5x1xf32>
    %77 = vector.broadcast %76 : vector<4x5x1xf32> to vector<4x5x5xf32>
    %78 = arith.mulf %73, %77 : vector<4x5x5xf32>
    %79 = arith.truncf %78 : vector<4x5x5xf32> to vector<4x5x5xbf16>
    "tpu.trace_start"() <{level = 10 : i32, message = "bqk,bkd->bqd"}> : () -> ()
    %cst_20 = arith.constant dense<0.000000e+00> : vector<4x5x8xf32>
    %80 = tpu.matmul %79, %67, %cst_20 {dimension_numbers = #tpu.dot_dimension_numbers<[2], [1], [1], [2], [0, 0, 0, 1, 1, 2], [0], [0]>} : vector<4x5x5xbf16>, vector<4x5x8xbf16>, vector<4x5x8xf32> -> vector<4x5x8xf32>
    "tpu.trace_stop"() : () -> ()
    %81 = tpu.concatenate %20, %40, %60, %80 in 2 : vector<4x5x8xf32>, vector<4x5x8xf32>, vector<4x5x8xf32>, vector<4x5x8xf32> -> vector<4x5x32xf32>
    %82 = arith.truncf %81 : vector<4x5x32xf32> to vector<4x5x32xbf16>
    %c0_21 = arith.constant 0 : index
    %c0_22 = arith.constant 0 : index
    %c0_23 = arith.constant 0 : index
    %83 = vector.load %arg2[%c0_21, %c0_22, %c0_23] : memref<4x5x32xbf16, #tpu.memory_space<vmem>>, vector<4x5x32xbf16>
    tpu.vector_store %arg2[%c0_21, %c0_22, %c0_23], %82 {strides = array<i32>} : memref<4x5x32xbf16, #tpu.memory_space<vmem>>, vector<4x5x32xbf16>,
    return
  }
  func.func @transform_0(%arg0: i32) -> (i32, i32, i32) {
    %c0_i32 = arith.constant 0 : i32
    %c0_i32_0 = arith.constant 0 : i32
    %c0_i32_1 = arith.constant 0 : i32
    return %arg0, %c0_i32, %c0_i32_0 : i32, i32, i32
  }
  func.func @transform_1(%arg0: i32) -> (i32, i32, i32) {
    %c0_i32 = arith.constant 0 : i32
    %c0_i32_0 = arith.constant 0 : i32
    %c0_i32_1 = arith.constant 0 : i32
    return %arg0, %c0_i32, %c0_i32_0 : i32, i32, i32
  }
}

module attributes {stable_mosaic.version = 11 : i64} {
  func.func @_linear_kernel(%arg0: i32, %arg1: memref<20x32xbf16, #tpu.memory_space<vmem>>, %arg2: memref<32x32xbf16, #tpu.memory_space<vmem>>, %arg3: memref<1x32xf32, #tpu.memory_space<vmem>>, %arg4: memref<20x32xf32, #tpu.memory_space<vmem>>) attributes {dimension_semantics = [#tpu.dimension_semantics<parallel>], iteration_bounds = array<i64: 1>, scalar_prefetch = 0 : i64, scratch_operands = 0 : i64, tpu.core_type = #tpu.core_type<tc>, window_params = [{transform_indices = @transform_0, window_bounds = array<i64: 20, 32>}, {pipeline_mode = #tpu.pipeline_mode<synchronous>, transform_indices = @transform_1, window_bounds = array<i64: 32, 32>}, {pipeline_mode = #tpu.pipeline_mode<synchronous>, transform_indices = @transform_2, window_bounds = array<i64: 1, 32>}, {transform_indices = @transform_3, window_bounds = array<i64: 20, 32>}]} {
    %c0 = arith.constant 0 : index
    %c0_0 = arith.constant 0 : index
    %0 = vector.load %arg1[%c0, %c0_0] : memref<20x32xbf16, #tpu.memory_space<vmem>>, vector<20x32xbf16>
    %c0_1 = arith.constant 0 : index
    %c0_2 = arith.constant 0 : index
    %1 = vector.load %arg2[%c0_1, %c0_2] : memref<32x32xbf16, #tpu.memory_space<vmem>>, vector<32x32xbf16>
    %cst = arith.constant dense<0.000000e+00> : vector<20x32xf32>
    %2 = tpu.matmul %0, %1, %cst {dimension_numbers = #tpu.dot_dimension_numbers<[1], [0], [0], [1], [0, 0, 1, 1], [], []>} : vector<20x32xbf16>, vector<32x32xbf16>, vector<20x32xf32> -> vector<20x32xf32>
    %c0_3 = arith.constant 0 : index
    %c0_4 = arith.constant 0 : index
    %3 = vector.load %arg3[%c0_3, %c0_4] : memref<1x32xf32, #tpu.memory_space<vmem>>, vector<1x32xf32>
    %4 = vector.broadcast %3 : vector<1x32xf32> to vector<20x32xf32>
    %5 = arith.addf %2, %4 : vector<20x32xf32>
    %c0_5 = arith.constant 0 : index
    %c0_6 = arith.constant 0 : index
    %6 = vector.load %arg4[%c0_5, %c0_6] : memref<20x32xf32, #tpu.memory_space<vmem>>, vector<20x32xf32>
    tpu.vector_store %arg4[%c0_5, %c0_6], %5 {strides = array<i32>} : memref<20x32xf32, #tpu.memory_space<vmem>>, vector<20x32xf32>,
    return
  }
  func.func @transform_0(%arg0: i32) -> (i32, i32) {
    %c0_i32 = arith.constant 0 : i32
    %c0_i32_0 = arith.constant 0 : i32
    return %arg0, %c0_i32 : i32, i32
  }
  func.func @transform_1(%arg0: i32) -> (i32, i32) {
    %c0_i32 = arith.constant 0 : i32
    %c0_i32_0 = arith.constant 0 : i32
    %c0_i32_1 = arith.constant 0 : i32
    return %c0_i32, %c0_i32_0 : i32, i32
  }
  func.func @transform_2(%arg0: i32) -> (i32, i32) {
    %c0_i32 = arith.constant 0 : i32
    %c0_i32_0 = arith.constant 0 : i32
    %c0_i32_1 = arith.constant 0 : i32
    return %c0_i32, %c0_i32_0 : i32, i32
  }
  func.func @transform_3(%arg0: i32) -> (i32, i32) {
    %c0_i32 = arith.constant 0 : i32
    %c0_i32_0 = arith.constant 0 : i32
    return %arg0, %c0_i32 : i32, i32
  }
}

module attributes {stable_mosaic.version = 11 : i64} {
  func.func @_layernorm_kernel(%arg0: i32, %arg1: memref<18x32xf32, #tpu.memory_space<vmem>>, %arg2: memref<1x32xf32, #tpu.memory_space<vmem>>, %arg3: memref<1x32xf32, #tpu.memory_space<vmem>>, %arg4: memref<18x32xbf16, #tpu.memory_space<vmem>>) attributes {dimension_semantics = [#tpu.dimension_semantics<parallel>], iteration_bounds = array<i64: 1>, scalar_prefetch = 0 : i64, scratch_operands = 0 : i64, tpu.core_type = #tpu.core_type<tc>, window_params = [{transform_indices = @transform_0, window_bounds = array<i64: 18, 32>}, {pipeline_mode = #tpu.pipeline_mode<synchronous>, transform_indices = @transform_1, window_bounds = array<i64: 1, 32>}, {pipeline_mode = #tpu.pipeline_mode<synchronous>, transform_indices = @transform_2, window_bounds = array<i64: 1, 32>}, {transform_indices = @transform_3, window_bounds = array<i64: 18, 32>}]} {
    %c0 = arith.constant 0 : index
    %c0_0 = arith.constant 0 : index
    %0 = vector.load %arg1[%c0, %c0_0] : memref<18x32xf32, #tpu.memory_space<vmem>>, vector<18x32xf32>
    %cst = arith.constant dense<0.000000e+00> : vector<18xf32>
    %1 = vector.multi_reduction <add>, %0, %cst [1] : vector<18x32xf32> to vector<18xf32>
    %2 = vector.shape_cast %1 : vector<18xf32> to vector<18x1xf32>
    %cst_1 = arith.constant 3.200000e+01 : f32
    %3 = vector.broadcast %cst_1 : f32 to vector<18x1xf32>
    %4 = arith.divf %2, %3 : vector<18x1xf32>
    %5 = vector.broadcast %4 : vector<18x1xf32> to vector<18x32xf32>
    %6 = arith.subf %0, %5 : vector<18x32xf32>
    %7 = arith.mulf %6, %6 : vector<18x32xf32>
    %cst_2 = arith.constant dense<0.000000e+00> : vector<18xf32>
    %8 = vector.multi_reduction <add>, %7, %cst_2 [1] : vector<18x32xf32> to vector<18xf32>
    %9 = vector.shape_cast %8 : vector<18xf32> to vector<18x1xf32>
    %cst_3 = arith.constant 3.200000e+01 : f32
    %10 = vector.broadcast %cst_3 : f32 to vector<18x1xf32>
    %11 = arith.divf %9, %10 : vector<18x1xf32>
    %cst_4 = arith.constant 9.99999997E-7 : f32
    %12 = vector.broadcast %cst_4 : f32 to vector<18x1xf32>
    %13 = arith.addf %11, %12 : vector<18x1xf32>
    %14 = math.rsqrt %13 : vector<18x1xf32>
    %15 = vector.broadcast %14 : vector<18x1xf32> to vector<18x32xf32>
    %16 = arith.mulf %6, %15 : vector<18x32xf32>
    %c0_5 = arith.constant 0 : index
    %c0_6 = arith.constant 0 : index
    %17 = vector.load %arg2[%c0_5, %c0_6] : memref<1x32xf32, #tpu.memory_space<vmem>>, vector<1x32xf32>
    %18 = vector.broadcast %17 : vector<1x32xf32> to vector<18x32xf32>
    %19 = arith.mulf %16, %18 : vector<18x32xf32>
    %c0_7 = arith.constant 0 : index
    %c0_8 = arith.constant 0 : index
    %20 = vector.load %arg3[%c0_7, %c0_8] : memref<1x32xf32, #tpu.memory_space<vmem>>, vector<1x32xf32>
    %21 = vector.broadcast %20 : vector<1x32xf32> to vector<18x32xf32>
    %22 = arith.addf %19, %21 : vector<18x32xf32>
    %23 = arith.truncf %22 : vector<18x32xf32> to vector<18x32xbf16>
    %c0_9 = arith.constant 0 : index
    %c0_10 = arith.constant 0 : index
    %24 = vector.load %arg4[%c0_9, %c0_10] : memref<18x32xbf16, #tpu.memory_space<vmem>>, vector<18x32xbf16>
    tpu.vector_store %arg4[%c0_9, %c0_10], %23 {strides = array<i32>} : memref<18x32xbf16, #tpu.memory_space<vmem>>, vector<18x32xbf16>,
    return
  }
  func.func @transform_0(%arg0: i32) -> (i32, i32) {
    %c0_i32 = arith.constant 0 : i32
    %c0_i32_0 = arith.constant 0 : i32
    return %arg0, %c0_i32 : i32, i32
  }
  func.func @transform_1(%arg0: i32) -> (i32, i32) {
    %c0_i32 = arith.constant 0 : i32
    %c0_i32_0 = arith.constant 0 : i32
    %c0_i32_1 = arith.constant 0 : i32
    return %c0_i32, %c0_i32_0 : i32, i32
  }
  func.func @transform_2(%arg0: i32) -> (i32, i32) {
    %c0_i32 = arith.constant 0 : i32
    %c0_i32_0 = arith.constant 0 : i32
    %c0_i32_1 = arith.constant 0 : i32
    return %c0_i32, %c0_i32_0 : i32, i32
  }
  func.func @transform_3(%arg0: i32) -> (i32, i32) {
    %c0_i32 = arith.constant 0 : i32
    %c0_i32_0 = arith.constant 0 : i32
    return %arg0, %c0_i32 : i32, i32
  }
}

module attributes {stable_mosaic.version = 11 : i64} {
  func.func @_linear_kernel(%arg0: i32, %arg1: memref<18x32xbf16, #tpu.memory_space<vmem>>, %arg2: memref<32x128xbf16, #tpu.memory_space<vmem>>, %arg3: memref<1x128xf32, #tpu.memory_space<vmem>>, %arg4: memref<18x128xf32, #tpu.memory_space<vmem>>) attributes {dimension_semantics = [#tpu.dimension_semantics<parallel>], iteration_bounds = array<i64: 1>, scalar_prefetch = 0 : i64, scratch_operands = 0 : i64, tpu.core_type = #tpu.core_type<tc>, window_params = [{transform_indices = @transform_0, window_bounds = array<i64: 18, 32>}, {pipeline_mode = #tpu.pipeline_mode<synchronous>, transform_indices = @transform_1, window_bounds = array<i64: 32, 128>}, {pipeline_mode = #tpu.pipeline_mode<synchronous>, transform_indices = @transform_2, window_bounds = array<i64: 1, 128>}, {transform_indices = @transform_3, window_bounds = array<i64: 18, 128>}]} {
    %c0 = arith.constant 0 : index
    %c0_0 = arith.constant 0 : index
    %0 = vector.load %arg1[%c0, %c0_0] : memref<18x32xbf16, #tpu.memory_space<vmem>>, vector<18x32xbf16>
    %c0_1 = arith.constant 0 : index
    %c0_2 = arith.constant 0 : index
    %1 = vector.load %arg2[%c0_1, %c0_2] : memref<32x128xbf16, #tpu.memory_space<vmem>>, vector<32x128xbf16>
    %cst = arith.constant dense<0.000000e+00> : vector<18x128xf32>
    %2 = tpu.matmul %0, %1, %cst {dimension_numbers = #tpu.dot_dimension_numbers<[1], [0], [0], [1], [0, 0, 1, 1], [], []>} : vector<18x32xbf16>, vector<32x128xbf16>, vector<18x128xf32> -> vector<18x128xf32>
    %c0_3 = arith.constant 0 : index
    %c0_4 = arith.constant 0 : index
    %3 = vector.load %arg3[%c0_3, %c0_4] : memref<1x128xf32, #tpu.memory_space<vmem>>, vector<1x128xf32>
    %4 = vector.broadcast %3 : vector<1x128xf32> to vector<18x128xf32>
    %5 = arith.addf %2, %4 : vector<18x128xf32>
    %c0_5 = arith.constant 0 : index
    %c0_6 = arith.constant 0 : index
    %6 = vector.load %arg4[%c0_5, %c0_6] : memref<18x128xf32, #tpu.memory_space<vmem>>, vector<18x128xf32>
    tpu.vector_store %arg4[%c0_5, %c0_6], %5 {strides = array<i32>} : memref<18x128xf32, #tpu.memory_space<vmem>>, vector<18x128xf32>,
    return
  }
  func.func @transform_0(%arg0: i32) -> (i32, i32) {
    %c0_i32 = arith.constant 0 : i32
    %c0_i32_0 = arith.constant 0 : i32
    return %arg0, %c0_i32 : i32, i32
  }
  func.func @transform_1(%arg0: i32) -> (i32, i32) {
    %c0_i32 = arith.constant 0 : i32
    %c0_i32_0 = arith.constant 0 : i32
    %c0_i32_1 = arith.constant 0 : i32
    return %c0_i32, %c0_i32_0 : i32, i32
  }
  func.func @transform_2(%arg0: i32) -> (i32, i32) {
    %c0_i32 = arith.constant 0 : i32
    %c0_i32_0 = arith.constant 0 : i32
    %c0_i32_1 = arith.constant 0 : i32
    return %c0_i32, %c0_i32_0 : i32, i32
  }
  func.func @transform_3(%arg0: i32) -> (i32, i32) {
    %c0_i32 = arith.constant 0 : i32
    %c0_i32_0 = arith.constant 0 : i32
    return %arg0, %c0_i32 : i32, i32
  }
}

module attributes {stable_mosaic.version = 11 : i64} {
  func.func @_linear_kernel(%arg0: i32, %arg1: memref<18x128xbf16, #tpu.memory_space<vmem>>, %arg2: memref<128x32xbf16, #tpu.memory_space<vmem>>, %arg3: memref<1x32xf32, #tpu.memory_space<vmem>>, %arg4: memref<18x32xf32, #tpu.memory_space<vmem>>, %arg5: memref<18x32xf32, #tpu.memory_space<vmem>>) attributes {dimension_semantics = [#tpu.dimension_semantics<parallel>], iteration_bounds = array<i64: 1>, scalar_prefetch = 0 : i64, scratch_operands = 0 : i64, tpu.core_type = #tpu.core_type<tc>, window_params = [{transform_indices = @transform_0, window_bounds = array<i64: 18, 128>}, {pipeline_mode = #tpu.pipeline_mode<synchronous>, transform_indices = @transform_1, window_bounds = array<i64: 128, 32>}, {pipeline_mode = #tpu.pipeline_mode<synchronous>, transform_indices = @transform_2, window_bounds = array<i64: 1, 32>}, {transform_indices = @transform_3, window_bounds = array<i64: 18, 32>}, {transform_indices = @transform_4, window_bounds = array<i64: 18, 32>}]} {
    %c0 = arith.constant 0 : index
    %c0_0 = arith.constant 0 : index
    %0 = vector.load %arg1[%c0, %c0_0] : memref<18x128xbf16, #tpu.memory_space<vmem>>, vector<18x128xbf16>
    %c0_1 = arith.constant 0 : index
    %c0_2 = arith.constant 0 : index
    %1 = vector.load %arg2[%c0_1, %c0_2] : memref<128x32xbf16, #tpu.memory_space<vmem>>, vector<128x32xbf16>
    %cst = arith.constant dense<0.000000e+00> : vector<18x32xf32>
    %2 = tpu.matmul %0, %1, %cst {dimension_numbers = #tpu.dot_dimension_numbers<[1], [0], [0], [1], [0, 0, 1, 1], [], []>} : vector<18x128xbf16>, vector<128x32xbf16>, vector<18x32xf32> -> vector<18x32xf32>
    %c0_3 = arith.constant 0 : index
    %c0_4 = arith.constant 0 : index
    %3 = vector.load %arg3[%c0_3, %c0_4] : memref<1x32xf32, #tpu.memory_space<vmem>>, vector<1x32xf32>
    %4 = vector.broadcast %3 : vector<1x32xf32> to vector<18x32xf32>
    %5 = arith.addf %2, %4 : vector<18x32xf32>
    %c0_5 = arith.constant 0 : index
    %c0_6 = arith.constant 0 : index
    %6 = vector.load %arg4[%c0_5, %c0_6] : memref<18x32xf32, #tpu.memory_space<vmem>>, vector<18x32xf32>
    %7 = arith.addf %5, %6 : vector<18x32xf32>
    %c0_7 = arith.constant 0 : index
    %c0_8 = arith.constant 0 : index
    %8 = vector.load %arg5[%c0_7, %c0_8] : memref<18x32xf32, #tpu.memory_space<vmem>>, vector<18x32xf32>
    tpu.vector_store %arg5[%c0_7, %c0_8], %7 {strides = array<i32>} : memref<18x32xf32, #tpu.memory_space<vmem>>, vector<18x32xf32>,
    return
  }
  func.func @transform_0(%arg0: i32) -> (i32, i32) {
    %c0_i32 = arith.constant 0 : i32
    %c0_i32_0 = arith.constant 0 : i32
    return %arg0, %c0_i32 : i32, i32
  }
  func.func @transform_1(%arg0: i32) -> (i32, i32) {
    %c0_i32 = arith.constant 0 : i32
    %c0_i32_0 = arith.constant 0 : i32
    %c0_i32_1 = arith.constant 0 : i32
    return %c0_i32, %c0_i32_0 : i32, i32
  }
  func.func @transform_2(%arg0: i32) -> (i32, i32) {
    %c0_i32 = arith.constant 0 : i32
    %c0_i32_0 = arith.constant 0 : i32
    %c0_i32_1 = arith.constant 0 : i32
    return %c0_i32, %c0_i32_0 : i32, i32
  }
  func.func @transform_3(%arg0: i32) -> (i32, i32) {
    %c0_i32 = arith.constant 0 : i32
    %c0_i32_0 = arith.constant 0 : i32
    return %arg0, %c0_i32 : i32, i32
  }
  func.func @transform_4(%arg0: i32) -> (i32, i32) {
    %c0_i32 = arith.constant 0 : i32
    %c0_i32_0 = arith.constant 0 : i32
    return %arg0, %c0_i32 : i32, i32
  }
}

module attributes {stable_mosaic.version = 11 : i64} {
  func.func @_linear_kernel(%arg0: i32, %arg1: memref<2x32xbf16, #tpu.memory_space<vmem>>, %arg2: memref<32x10xbf16, #tpu.memory_space<vmem>>, %arg3: memref<1x10xf32, #tpu.memory_space<vmem>>, %arg4: memref<2x10xf32, #tpu.memory_space<vmem>>) attributes {dimension_semantics = [#tpu.dimension_semantics<parallel>], iteration_bounds = array<i64: 1>, scalar_prefetch = 0 : i64, scratch_operands = 0 : i64, tpu.core_type = #tpu.core_type<tc>, window_params = [{transform_indices = @transform_0, window_bounds = array<i64: 2, 32>}, {pipeline_mode = #tpu.pipeline_mode<synchronous>, transform_indices = @transform_1, window_bounds = array<i64: 32, 10>}, {pipeline_mode = #tpu.pipeline_mode<synchronous>, transform_indices = @transform_2, window_bounds = array<i64: 1, 10>}, {transform_indices = @transform_3, window_bounds = array<i64: 2, 10>}]} {
    %c0 = arith.constant 0 : index
    %c0_0 = arith.constant 0 : index
    %0 = vector.load %arg1[%c0, %c0_0] : memref<2x32xbf16, #tpu.memory_space<vmem>>, vector<2x32xbf16>
    %c0_1 = arith.constant 0 : index
    %c0_2 = arith.constant 0 : index
    %1 = vector.load %arg2[%c0_1, %c0_2] : memref<32x10xbf16, #tpu.memory_space<vmem>>, vector<32x10xbf16>
    %cst = arith.constant dense<0.000000e+00> : vector<2x10xf32>
    %2 = tpu.matmul %0, %1, %cst {dimension_numbers = #tpu.dot_dimension_numbers<[1], [0], [0], [1], [0, 0, 1, 1], [], []>} : vector<2x32xbf16>, vector<32x10xbf16>, vector<2x10xf32> -> vector<2x10xf32>
    %c0_3 = arith.constant 0 : index
    %c0_4 = arith.constant 0 : index
    %3 = vector.load %arg3[%c0_3, %c0_4] : memref<1x10xf32, #tpu.memory_space<vmem>>, vector<1x10xf32>
    %4 = vector.broadcast %3 : vector<1x10xf32> to vector<2x10xf32>
    %5 = arith.addf %2, %4 : vector<2x10xf32>
    %c0_5 = arith.constant 0 : index
    %c0_6 = arith.constant 0 : index
    %6 = vector.load %arg4[%c0_5, %c0_6] : memref<2x10xf32, #tpu.memory_space<vmem>>, vector<2x10xf32>
    tpu.vector_store %arg4[%c0_5, %c0_6], %5 {strides = array<i32>} : memref<2x10xf32, #tpu.memory_space<vmem>>, vector<2x10xf32>,
    return
  }
  func.func @transform_0(%arg0: i32) -> (i32, i32) {
    %c0_i32 = arith.constant 0 : i32
    %c0_i32_0 = arith.constant 0 : i32
    return %arg0, %c0_i32 : i32, i32
  }
  func.func @transform_1(%arg0: i32) -> (i32, i32) {
    %c0_i32 = arith.constant 0 : i32
    %c0_i32_0 = arith.constant 0 : i32
    %c0_i32_1 = arith.constant 0 : i32
    return %c0_i32, %c0_i32_0 : i32, i32
  }
  func.func @transform_2(%arg0: i32) -> (i32, i32) {
    %c0_i32 = arith.constant 0 : i32
    %c0_i32_0 = arith.constant 0 : i32
    %c0_i32_1 = arith.constant 0 : i32
    return %c0_i32, %c0_i32_0 : i32, i32
  }
  func.func @transform_3(%arg0: i32) -> (i32, i32) {
    %c0_i32 = arith.constant 0 : i32
    %c0_i32_0 = arith.constant 0 : i32
    return %arg0, %c0_i32 : i32, i32
  }
}

</mosaic_0001>

<bundles_post_ra>
// kernel: vit_forward.29
= control target key start
LH: loop header
LB: loop body
LE: loop exit
PB: predicated region body
PF: predicated region fallthrough
CT: control target
= control target key end

     0   :  { %v130_v0 = vmov 0.0   ;;  %vm131_vm0 = vmmov 0   ;;  %vm45_vm1 = vcmask 261120   ;;  %vm98_vm2 = vcmask 781312   ;;  %s170_s1 = inlined_call_operand.vmem [shape: bf16[32,96], index: 1, kind: input, shape index: {}]   ;;  %s171_s0 = inlined_call_operand.vmem [shape: bf16[16,32], index: 0, kind: input, shape index: {}]   ;;  %s172_s2 = inlined_call_operand.vmem [shape: f32[1,96], index: 2, kind: input, shape index: {}]   ;;  %s173_s3 = inlined_call_operand.vmem [shape: bf16[16,96], index: 3, kind: output, shape index: {}]  }
   0x1   :  { %117 = vmatprep.subr.bf16.mxu0 %v130_v0  ;;  %v127_v1 = vld [vmem:[%s170_s1] sm:$0xff]   ;;  %121 = vmatprep.mubr.msk.bf16.mxu0 %vm131_vm0, %v130_v0  ;;  %v128_v2 = vld [vmem:[%s170_s1 + $0x8] sm:$0xff]  }
   0x2   :  { %118 = vmatpush3.bf16.msra.mxu0 %v127_v1  ;;  %v129_v3 = vld [vmem:[%s171_s0] sm:$0xff]  }
   0x3   :  { %119 = vmatprep.subr.bf16.mxu0 %v130_v0  ;;  %v105_v4 = vld [vmem:[%s172_s2] ss:$0 sm:$0xff] }
   0x6   :  { %120 = vmatpush3.bf16.msra.mxu0 %v128_v2 }
   0x9   :  { %122 = vmatmul.mubr.msk.bf16.vlgmr.msra.gmra.mrb[0].mxu0 %vm45_vm1, %v129_v3 }
  0xdc   :  { %v83_v5 = vpop.f32.mrb[0].mxu0 }
  0xdd   :  { %v84_v6 = vadd.f32 %v105_v4, %v83_v5  ;;  %v123_v7 = vpop.f32.mrb[1].mxu0 }
  0xde   :  { %v86_v8 = vpop.f32.mrb[2].mxu0 }
  0xdf   :  { %v112_v9 = vpack.c.bf16 %v84_v6, %v84_v6  ;;  %v87_v10 = vadd.f32 %v105_v4, %v86_v8  ;;  %v124_v11 = vpop.f32.mrb[3].mxu0 }
  0xe1   :  { %99 = vst.msk [vmem:[%s173_s3] sm:$0xf] %vm98_vm2, %v112_v9  ;;  %v113_v12 = vpack.c.bf16 %v87_v10, %v87_v10 }
  0xe3   :  { %100 = vst.msk [vmem:[%s173_s3 + $0x4] sm:$0xf] %vm98_vm2, %v113_v12 }

// kernel: vit_forward.28
= control target key start
LH: loop header
LB: loop body
LE: loop exit
PB: predicated region body
PF: predicated region fallthrough
CT: control target
= control target key end

     0   :  { %vm16_vm0 = vcmask 261120   ;;  %vm70_vm1 = vcmask 257024   ;;  %s129_s0 = inlined_call_operand.vmem [shape: f32[16,32], index: 0, kind: input, shape index: {}]   ;;  %s130_s1 = inlined_call_operand.vmem [shape: f32[1,32], index: 1, kind: input, shape index: {}]   ;;  %s131_s2 = inlined_call_operand.vmem [shape: f32[1,32], index: 2, kind: input, shape index: {}]   ;;  %s132_s3 = inlined_call_operand.vmem [shape: bf16[16,32], index: 3, kind: output, shape index: {}]  }
   0x1   :  { %v14_v0 = vld [vmem:[%s129_s0] sm:$0xff]  ;;  %v15_v1 = vld [vmem:[%s129_s0 + $0x8] sm:$0xff] }
   0x2   :  { %v17_v2 = vsel %vm16_vm0, %v14_v0, 0.0  ;;  %v20_v3 = vsel %vm16_vm0, %v15_v1, 0.0  ;;  %v77_v21 = vld [vmem:[%s130_s1] ss:$0 sm:$0xff] }
   0x3   :  { %18 = vadd.xlane.f32.xlu0 %v17_v2  ;;  %v78_v23 = vld [vmem:[%s131_s2] ss:$0 sm:$0xff] }
   0x7   :  { %21 = vadd.xlane.f32.xlu0 %v20_v3 }
  0x90   :  { %v19_v4 = vpop.xlane.xlu0 %18 }
  0x91   :  { %v24_v5 = vmul.f32 0.03125, %v19_v4 }
  0x93   :  { %v26_v6 = vsub.f32 %v14_v0, %v24_v5 }
  0x94   :  { %v22_v7 = vpop.xlane.xlu0 %21 }
  0x95   :  { %v25_v8 = vmul.f32 0.03125, %v22_v7  ;;  %v28_v9 = vmul.f32 %v26_v6, %v26_v6 }
  0x97   :  { %v27_v10 = vsub.f32 %v15_v1, %v25_v8  ;;  %v30_v11 = vsel %vm16_vm0, %v28_v9, 0.0 }
  0x98   :  { %31 = vadd.xlane.f32.xlu1 %v30_v11 }
  0x99   :  { %v29_v12 = vmul.f32 %v27_v10, %v27_v10 }
  0x9b   :  { %v33_v13 = vsel %vm16_vm0, %v29_v12, 0.0 }
  0x9c   :  { %34 = vadd.xlane.f32.xlu1 %v33_v13 }
 0x125   :  { %v32_v14 = vpop.xlane.xlu1 %31 }
 0x126   :  { %v36_v15 = vmul.f32 0.03125, %v32_v14 }
 0x128   :  { %v38_v16 = vadd.f32 1e-06, %v36_v15 }
 0x129   :  { %v35_v17 = vpop.xlane.xlu1 %34 }
 0x12a   :  { %83 = vrsqrt.f32 %v38_v16  ;;  %v37_v18 = vmul.f32 0.03125, %v35_v17 }
 0x12c   :  { %v39_v19 = vadd.f32 1e-06, %v37_v18 }
 0x12e   :  { %85 = vrsqrt.f32 %v39_v19 }
 0x134   :  { %v84_v20 = vpop.eup %83 }
 0x135   :  { %v42_v22 = vmul.f32 %v84_v20, %v26_v6 }
 0x137   :  { %v51_v24 = vmul.f32 %v77_v21, %v42_v22 }
 0x138   :  { %v86_v25 = vpop.eup %85 }
 0x139   :  { %v60_v26 = vadd.f32 %v78_v23, %v51_v24  ;;  %v43_v27 = vmul.f32 %v86_v25, %v27_v10 }
 0x13b   :  { %v81_v28 = vpack.c.bf16 %v60_v26, %v60_v26  ;;  %v52_v29 = vmul.f32 %v77_v21, %v43_v27 }
 0x13d   :  { %71 = vst.msk [vmem:[%s132_s3] sm:$0xf] %vm70_vm1, %v81_v28  ;;  %v61_v30 = vadd.f32 %v78_v23, %v52_v29 }
 0x13f   :  { %v82_v31 = vpack.c.bf16 %v61_v30, %v61_v30 }
 0x141   :  { %72 = vst.msk [vmem:[%s132_s3 + $0x4] sm:$0xf] %vm70_vm1, %v82_v31 }

// kernel: vit_forward.27
= control target key start
LH: loop header
LB: loop body
LE: loop exit
PB: predicated region body
PF: predicated region fallthrough
CT: control target
= control target key end

     0   :  { %v213_v0 = vmov 0   ;;  %vm129_vm0 = vcmask 523264   ;;  %vm174_vm1 = vcmask 261120   ;;  %s285_s1 = inlined_call_operand.vmem [shape: bf16[192,32], index: 1, kind: input, shape index: {}]   ;;  %s286_s0 = inlined_call_operand.vmem [shape: bf16[16,192], index: 0, kind: input, shape index: {}]   ;;  %s287_s2 = inlined_call_operand.vmem [shape: f32[1,32], index: 2, kind: input, shape index: {}]   ;;  %s288_s3 = inlined_call_operand.vmem [shape: f32[16,32], index: 3, kind: output, shape index: {}]  }
   0x1   :  { %133 = vmatprep.subr.bf16.mxu0 %v213_v0  ;;  %v198_v1 = vld [vmem:[%s285_s1] sm:$0xff]   ;;  %v199_v2 = vld [vmem:[%s285_s1 + $0x8] sm:$0xff]   ;;  %v200_v3 = vld [vmem:[%s285_s1 + $0x10] sm:$0xff]  }
   0x2   :  { %134 = vmatpush1.bf16.msra.mxu0 %v198_v1  ;;  %v201_v4 = vld [vmem:[%s285_s1 + $0x18] sm:$0xff]   ;;  %v212_v5 = vld [vmem:[%s286_s0 + $0x4] ss:$8 sps:$4 sm:$0xff]   ;;  %v204_v8 = vld [vmem:[%s285_s1 + $0x30] sm:$0xff]  }
   0x3   :  { %135 = vmatprep.subr.bf16.mxu0 %v213_v0  ;;  %v202_v6 = vld [vmem:[%s285_s1 + $0x20] sm:$0xff]   ;;  %196 = vmatprep.mubr.msk.bf16.mxu0 %vm129_vm0, %v212_v5  ;;  %v203_v7 = vld [vmem:[%s285_s1 + $0x28] sm:$0xff]   ;;  %v205_v9 = vld [vmem:[%s285_s1 + $0x38] sm:$0xff]  }
   0x4   :  { %v206_v10 = vld [vmem:[%s285_s1 + $0x40] sm:$0xff]   ;;  %v207_v11 = vld [vmem:[%s285_s1 + $0x48] sm:$0xff]   ;;  %v208_v12 = vld [vmem:[%s285_s1 + $0x50] sm:$0xff]  }
   0x5   :  { %v209_v13 = vld [vmem:[%s285_s1 + $0x58] sm:$0xff]   ;;  %v210_v14 = vld [vmem:[%s286_s0] ss:$8 sps:$4 sm:$0xff]  }
   0x6   :  { %136 = vmatpush1.bf16.msra.mxu0 %v199_v2  ;;  %v181_v15 = vld [vmem:[%s287_s2] ss:$0 sm:$0xff] }
   0x7   :  { %137 = vmatprep.subr.bf16.mxu0 %v213_v0 }
   0xa   :  { %138 = vmatpush1.bf16.msra.mxu0 %v200_v3 }
   0xb   :  { %139 = vmatprep.subr.bf16.mxu0 %v213_v0 }
   0xe   :  { %140 = vmatpush1.bf16.msra.mxu0 %v201_v4 }
   0xf   :  { %141 = vmatprep.subr.bf16.mxu0 %v213_v0 }
  0x12   :  { %142 = vmatpush1.bf16.msra.mxu0 %v202_v6 }
  0x13   :  { %143 = vmatprep.subr.bf16.mxu0 %v213_v0 }
  0x16   :  { %144 = vmatpush1.bf16.msra.mxu0 %v203_v7 }
  0x17   :  { %145 = vmatprep.subr.bf16.mxu0 %v213_v0 }
  0x1a   :  { %146 = vmatpush1.bf16.msra.mxu0 %v204_v8 }
  0x1b   :  { %147 = vmatprep.subr.bf16.mxu0 %v213_v0 }
  0x1e   :  { %148 = vmatpush1.bf16.msra.mxu0 %v205_v9 }
  0x1f   :  { %149 = vmatprep.subr.bf16.mxu0 %v213_v0 }
  0x22   :  { %150 = vmatpush1.bf16.msra.mxu0 %v206_v10 }
  0x23   :  { %151 = vmatprep.subr.bf16.mxu0 %v213_v0 }
  0x26   :  { %152 = vmatpush1.bf16.msra.mxu0 %v207_v11 }
  0x27   :  { %153 = vmatprep.subr.bf16.mxu0 %v213_v0 }
  0x2a   :  { %154 = vmatpush1.bf16.msra.mxu0 %v208_v12 }
  0x2b   :  { %155 = vmatprep.subr.bf16.mxu0 %v213_v0 }
  0x2e   :  { %156 = vmatpush1.bf16.msra.mxu0 %v209_v13 }
  0x31   :  { %166 = vmatmul.mubr.bf16.vlgmr.msra.gmra.mrb[0].mxu0 %v210_v14 }
 0x104   :  { %v167_v16 = vpop.f32.mrb[0].mxu0 }
 0x105   :  { %v168_v17 = vadd.f32 %v181_v15, %v167_v16  ;;  %v169_v18 = vpop.f32.mrb[1].mxu0 }
 0x106   :  { %v170_v19 = vpop.f32.mrb[2].mxu0 }
 0x107   :  { %175 = vst.msk [vmem:[%s288_s3] sm:$0xff] %vm174_vm1, %v168_v17  ;;  %v171_v20 = vadd.f32 %v181_v15, %v170_v19  ;;  %v172_v21 = vpop.f32.mrb[3].mxu0 }
 0x109   :  { %176 = vst.msk [vmem:[%s288_s3 + $0x8] sm:$0xff] %vm174_vm1, %v171_v20 }

// kernel: vit_forward.32
= control target key start
LH: loop header
LB: loop body
LE: loop exit
PB: predicated region body
PF: predicated region fallthrough
CT: control target
= control target key end

     0   :  { %v124_v0 = vmov 0.0   ;;  %vm125_vm0 = vmmov 0   ;;  %vm48_vm1 = vcmask 261120   ;;  %s178_s1 = inlined_call_operand.vmem [shape: bf16[32,32], index: 1, kind: input, shape index: {}]   ;;  %s179_s0 = inlined_call_operand.vmem [shape: bf16[16,32], index: 0, kind: input, shape index: {}]   ;;  %s180_s2 = inlined_call_operand.vmem [shape: f32[1,32], index: 2, kind: input, shape index: {}]   ;;  %s181_s3 = inlined_call_operand.vmem [shape: f32[16,32], index: 3, kind: input, shape index: {}]   ;;  %s182_s4 = inlined_call_operand.vmem [shape: f32[16,32], index: 4, kind: output, shape index: {}]  }
   0x1   :  { %111 = vmatprep.subr.bf16.mxu0 %v124_v0  ;;  %v121_v1 = vld [vmem:[%s178_s1] sm:$0xff]   ;;  %115 = vmatprep.mubr.msk.bf16.mxu0 %vm125_vm0, %v124_v0  ;;  %v122_v2 = vld [vmem:[%s178_s1 + $0x8] sm:$0xff]  }
   0x2   :  { %112 = vmatpush3.bf16.msra.mxu0 %v121_v1  ;;  %v123_v3 = vld [vmem:[%s179_s0] sm:$0xff]   ;;  %v94_v10 = vld [vmem:[%s181_s3 + $0x8] sm:$0xff] }
   0x3   :  { %113 = vmatprep.subr.bf16.mxu0 %v124_v0  ;;  %v103_v4 = vld [vmem:[%s180_s2] ss:$0 sm:$0xff] }
   0x4   :  { %v93_v6 = vld [vmem:[%s181_s3] sm:$0xff] }
   0x6   :  { %114 = vmatpush3.bf16.msra.mxu0 %v122_v2 }
   0x9   :  { %116 = vmatmul.mubr.msk.bf16.vlgmr.msra.gmra.mrb[0].mxu0 %vm48_vm1, %v123_v3 }
  0xdc   :  { %v86_v5 = vpop.f32.mrb[0].mxu0 }
  0xdd   :  { %v87_v7 = vadd.f32 %v103_v4, %v86_v5  ;;  %v117_v8 = vpop.f32.mrb[1].mxu0 }
  0xde   :  { %v89_v9 = vpop.f32.mrb[2].mxu0 }
  0xdf   :  { %v95_v11 = vadd.f32 %v93_v6, %v87_v7  ;;  %v90_v12 = vadd.f32 %v103_v4, %v89_v9  ;;  %v118_v13 = vpop.f32.mrb[3].mxu0 }
  0xe1   :  { %97 = vst.msk [vmem:[%s182_s4] sm:$0xff] %vm48_vm1, %v95_v11  ;;  %v96_v14 = vadd.f32 %v94_v10, %v90_v12 }
  0xe3   :  { %98 = vst.msk [vmem:[%s182_s4 + $0x8] sm:$0xff] %vm48_vm1, %v96_v14 }

// kernel: vit_forward.31
= control target key start
LH: loop header
LB: loop body
LE: loop exit
PB: predicated region body
PF: predicated region fallthrough
CT: control target
= control target key end

     0   :  { %v130_v0 = vmov 0.0   ;;  %vm131_vm0 = vmmov 0   ;;  %vm45_vm1 = vcmask 261120   ;;  %vm98_vm2 = vcmask 257024   ;;  %s170_s1 = inlined_call_operand.vmem [shape: bf16[32,32], index: 1, kind: input, shape index: {}]   ;;  %s171_s0 = inlined_call_operand.vmem [shape: bf16[16,32], index: 0, kind: input, shape index: {}]   ;;  %s172_s2 = inlined_call_operand.vmem [shape: f32[1,32], index: 2, kind: input, shape index: {}]   ;;  %s173_s3 = inlined_call_operand.vmem [shape: bf16[16,32], index: 3, kind: output, shape index: {}]  }
   0x1   :  { %117 = vmatprep.subr.bf16.mxu0 %v130_v0  ;;  %v127_v1 = vld [vmem:[%s170_s1] sm:$0xff]   ;;  %121 = vmatprep.mubr.msk.bf16.mxu0 %vm131_vm0, %v130_v0  ;;  %v128_v2 = vld [vmem:[%s170_s1 + $0x8] sm:$0xff]  }
   0x2   :  { %118 = vmatpush3.bf16.msra.mxu0 %v127_v1  ;;  %v129_v3 = vld [vmem:[%s171_s0] sm:$0xff]  }
   0x3   :  { %119 = vmatprep.subr.bf16.mxu0 %v130_v0  ;;  %v105_v4 = vld [vmem:[%s172_s2] ss:$0 sm:$0xff] }
   0x6   :  { %120 = vmatpush3.bf16.msra.mxu0 %v128_v2 }
   0x9   :  { %122 = vmatmul.mubr.msk.bf16.vlgmr.msra.gmra.mrb[0].mxu0 %vm45_vm1, %v129_v3 }
  0xdc   :  { %v83_v5 = vpop.f32.mrb[0].mxu0 }
  0xdd   :  { %v84_v6 = vadd.f32 %v105_v4, %v83_v5  ;;  %v123_v7 = vpop.f32.mrb[1].mxu0 }
  0xde   :  { %v86_v8 = vpop.f32.mrb[2].mxu0 }
  0xdf   :  { %v112_v9 = vpack.c.bf16 %v84_v6, %v84_v6  ;;  %v87_v10 = vadd.f32 %v105_v4, %v86_v8  ;;  %v124_v11 = vpop.f32.mrb[3].mxu0 }
  0xe1   :  { %99 = vst.msk [vmem:[%s173_s3] sm:$0xf] %vm98_vm2, %v112_v9  ;;  %v113_v12 = vpack.c.bf16 %v87_v10, %v87_v10 }
  0xe3   :  { %100 = vst.msk [vmem:[%s173_s3 + $0x4] sm:$0xf] %vm98_vm2, %v113_v12 }

// kernel: vit_forward.33
= control target key start
LH: loop header
LB: loop body
LE: loop exit
PB: predicated region body
PF: predicated region fallthrough
CT: control target
= control target key end

     0   :  { %vm17_vm0 = vcmask 261120   ;;  %vm24_vm1 = vcmask 257024   ;;  %vm94_vm2 = vcmask 254976   ;;  %s166_s0 = inlined_call_operand.vmem [shape: f32[20,32], index: 0, kind: input, shape index: {}]   ;;  %s167_s1 = inlined_call_operand.vmem [shape: f32[1,32], index: 1, kind: input, shape index: {}]   ;;  %s168_s2 = inlined_call_operand.vmem [shape: f32[1,32], index: 2, kind: input, shape index: {}]   ;;  %s169_s3 = inlined_call_operand.vmem [shape: bf16[20,32], index: 3, kind: output, shape index: {}]  }
   0x1   :  { %v14_v0 = vld [vmem:[%s166_s0] sm:$0xff]  ;;  %v16_v1 = vld [vmem:[%s166_s0 + $0x10] sm:$0xf]  ;;  %v15_v2 = vld [vmem:[%s166_s0 + $0x8] sm:$0xff] }
   0x2   :  { %v18_v3 = vsel %vm17_vm0, %v14_v0, 0.0  ;;  %v25_v4 = vsel %vm24_vm1, %v16_v1, 0.0  ;;  %v21_v5 = vsel %vm17_vm0, %v15_v2, 0.0  ;;  %v100_v31 = vld [vmem:[%s167_s1] ss:$0 sm:$0xff] }
   0x3   :  { %19 = vadd.xlane.f32.xlu0 %v18_v3  ;;  %26 = vadd.xlane.f32.xlu1 %v25_v4  ;;  %v101_v33 = vld [vmem:[%s168_s2] ss:$0 sm:$0xff] }
   0x7   :  { %22 = vadd.xlane.f32.xlu0 %v21_v5 }
  0x90   :  { %v20_v6 = vpop.xlane.xlu0 %19  ;;  %v27_v7 = vpop.xlane.xlu1 %26 }
  0x91   :  { %v29_v8 = vmul.f32 0.03125, %v20_v6  ;;  %v31_v9 = vmul.f32 0.03125, %v27_v7 }
  0x93   :  { %v32_v10 = vsub.f32 %v14_v0, %v29_v8  ;;  %v34_v11 = vsub.f32 %v16_v1, %v31_v9 }
  0x94   :  { %v23_v12 = vpop.xlane.xlu0 %22 }
  0x95   :  { %v30_v13 = vmul.f32 0.03125, %v23_v12  ;;  %v35_v14 = vmul.f32 %v32_v10, %v32_v10  ;;  %v37_v15 = vmul.f32 %v34_v11, %v34_v11 }
  0x97   :  { %v33_v16 = vsub.f32 %v15_v2, %v30_v13  ;;  %v38_v17 = vsel %vm17_vm0, %v35_v14, 0.0  ;;  %v44_v18 = vsel %vm24_vm1, %v37_v15, 0.0 }
  0x98   :  { %39 = vadd.xlane.f32.xlu1 %v38_v17 }
  0x99   :  { %v36_v19 = vmul.f32 %v33_v16, %v33_v16 }
  0x9b   :  { %v41_v20 = vsel %vm17_vm0, %v36_v19, 0.0 }
  0x9c   :  { %45 = vadd.xlane.f32.xlu1 %v44_v18  ;;  %42 = vadd.xlane.f32.xlu0 %v41_v20 }
 0x125   :  { %v40_v21 = vpop.xlane.xlu1 %39 }
 0x126   :  { %v47_v22 = vmul.f32 0.03125, %v40_v21 }
 0x128   :  { %v50_v23 = vadd.f32 1e-06, %v47_v22 }
 0x129   :  { %v46_v24 = vpop.xlane.xlu1 %45  ;;  %v43_v25 = vpop.xlane.xlu0 %42 }
 0x12a   :  { %108 = vrsqrt.f32 %v50_v23  ;;  %v49_v26 = vmul.f32 0.03125, %v46_v24  ;;  %v48_v27 = vmul.f32 0.03125, %v43_v25 }
 0x12c   :  { %v52_v28 = vadd.f32 1e-06, %v49_v26  ;;  %v51_v29 = vadd.f32 1e-06, %v48_v27 }
 0x12e   :  { %110 = vrsqrt.f32 %v52_v28 }
 0x12f   :  { %112 = vrsqrt.f32 %v51_v29 }
 0x134   :  { %v109_v30 = vpop.eup %108 }
 0x135   :  { %v56_v32 = vmul.f32 %v109_v30, %v32_v10 }
 0x137   :  { %v66_v34 = vmul.f32 %v100_v31, %v56_v32 }
 0x138   :  { %v111_v35 = vpop.eup %110 }
 0x139   :  { %v113_v36 = vpop.eup %112  ;;  %v76_v37 = vadd.f32 %v101_v33, %v66_v34  ;;  %v58_v38 = vmul.f32 %v111_v35, %v34_v11 }
 0x13a   :  { %v57_v39 = vmul.f32 %v113_v36, %v33_v16 }
 0x13b   :  { %v105_v40 = vpack.c.bf16 %v76_v37, %v76_v37  ;;  %v68_v41 = vmul.f32 %v100_v31, %v58_v38 }
 0x13c   :  { %v67_v42 = vmul.f32 %v100_v31, %v57_v39 }
 0x13d   :  { %92 = vst.msk [vmem:[%s169_s3] sm:$0xf] %vm24_vm1, %v105_v40  ;;  %v78_v43 = vadd.f32 %v101_v33, %v68_v41 }
 0x13e   :  { %v77_v44 = vadd.f32 %v101_v33, %v67_v42 }
 0x13f   :  { %v107_v45 = vpack.c.bf16 %v78_v43, %v78_v43 }
 0x140   :  { %v106_v46 = vpack.c.bf16 %v77_v44, %v77_v44 }
 0x141   :  { %95 = vst.msk [vmem:[%s169_s3 + $0x8] sm:$0x3] %vm94_vm2, %v107_v45 }
 0x142   :  { %93 = vst.msk [vmem:[%s169_s3 + $0x4] sm:$0xf] %vm24_vm1, %v106_v46 }

// kernel: vit_forward.34
= control target key start
LH: loop header
LB: loop body
LE: loop exit
PB: predicated region body
PF: predicated region fallthrough
CT: control target
= control target key end

     0   :  { %vm49_vm0 = vcmask 261120   ;;  %vm120_vm1 = vcmask 779264   ;;  %vm117_vm2 = vcmask 781312   ;;  %s199_s1 = inlined_call_operand.vmem [shape: bf16[32,96], index: 1, kind: input, shape index: {}]   ;;  %s200_s0 = inlined_call_operand.vmem [shape: bf16[20,32], index: 0, kind: input, shape index: {}]   ;;  %s201_s2 = inlined_call_operand.vmem [shape: f32[1,96], index: 2, kind: input, shape index: {}]   ;;  %s202_s3 = inlined_call_operand.vmem [shape: bf16[20,96], index: 3, kind: output, shape index: {}]  }
   0x1   :  { %v151_v0 = vld [vmem:[%s199_s1] sm:$0xff]   ;;  %v152_v1 = vld [vmem:[%s199_s1 + $0x8] sm:$0xff]  }
   0x2   :  { %143 = vmatprep.subr.bf16.mxu0 %v151_v0  ;;  %v153_v2 = vld [vmem:[%s200_s0] sm:$0xff]   ;;  %v154_v3 = vld [vmem:[%s200_s0 + $0x8] ss:$0 sps:$4 sm:$0x33]  }
   0x3   :  { %144 = vmatpush3.bf16.msra.mxu0 %v151_v0  ;;  %147 = vmatprep.mubr.msk.bf16.mxu0 %vm49_vm0, %v153_v2  ;;  %v126_v4 = vld [vmem:[%s201_s2] ss:$0 sm:$0xff] }
   0x4   :  { %145 = vmatprep.subr.bf16.mxu0 %v152_v1 }
   0x7   :  { %146 = vmatpush3.bf16.msra.mxu0 %v152_v1 }
   0xa   :  { %148 = vmatmul.mubr.msk.bf16.vlgmr.msra.gmra.mrb[0].mxu0 %vm49_vm0, %v154_v3 }
  0xdd   :  { %v149_v5 = vpop.f32.mrb[0].mxu0 }
  0xde   :  { %v99_v6 = vadd.f32 %v149_v5, %v126_v4  ;;  %v90_v7 = vpop.f32.mrb[1].mxu0 }
  0xdf   :  { %v91_v8 = vadd.f32 %v126_v4, %v90_v7  ;;  %v150_v9 = vpop.f32.mrb[2].mxu0 }
  0xe0   :  { %v138_v10 = vpack.c.bf16 %v99_v6, %v99_v6  ;;  %v93_v11 = vpop.f32.mrb[3].mxu0 }
  0xe1   :  { %v136_v12 = vpack.c.bf16 %v91_v8, %v91_v8  ;;  %v94_v13 = vadd.f32 %v126_v4, %v93_v11 }
  0xe2   :  { %121 = vst.msk [vmem:[%s202_s3 + $0x8] sm:$0x3] %vm120_vm1, %v138_v10 }
  0xe3   :  { %118 = vst.msk [vmem:[%s202_s3] sm:$0xf] %vm117_vm2, %v136_v12  ;;  %v137_v14 = vpack.c.bf16 %v94_v13, %v94_v13 }
  0xe5   :  { %119 = vst.msk [vmem:[%s202_s3 + $0x4] sm:$0xf] %vm117_vm2, %v137_v14 }

// kernel: vit_forward.36
= control target key start
LH: loop header
LB: loop body
LE: loop exit
PB: predicated region body
PF: predicated region fallthrough
CT: control target
= control target key end

     0   :  { %vm49_vm0 = vcmask 261120   ;;  %vm106_vm1 = vcmask 257024   ;;  %s183_s1 = inlined_call_operand.vmem [shape: bf16[32,32], index: 1, kind: input, shape index: {}]   ;;  %s184_s0 = inlined_call_operand.vmem [shape: bf16[20,32], index: 0, kind: input, shape index: {}]   ;;  %s185_s2 = inlined_call_operand.vmem [shape: f32[1,32], index: 2, kind: input, shape index: {}]   ;;  %s186_s3 = inlined_call_operand.vmem [shape: f32[20,32], index: 3, kind: output, shape index: {}]  }
   0x1   :  { %v131_v0 = vld [vmem:[%s183_s1] sm:$0xff]   ;;  %v132_v1 = vld [vmem:[%s183_s1 + $0x8] sm:$0xff]  }
   0x2   :  { %123 = vmatprep.subr.bf16.mxu0 %v131_v0  ;;  %v133_v2 = vld [vmem:[%s184_s0] sm:$0xff]   ;;  %v134_v3 = vld [vmem:[%s184_s0 + $0x8] ss:$0 sps:$4 sm:$0x33]  }
   0x3   :  { %124 = vmatpush3.bf16.msra.mxu0 %v131_v0  ;;  %127 = vmatprep.mubr.msk.bf16.mxu0 %vm49_vm0, %v133_v2  ;;  %v112_v4 = vld [vmem:[%s185_s2] ss:$0 sm:$0xff] }
   0x4   :  { %125 = vmatprep.subr.bf16.mxu0 %v132_v1 }
   0x7   :  { %126 = vmatpush3.bf16.msra.mxu0 %v132_v1 }
   0xa   :  { %128 = vmatmul.mubr.msk.bf16.vlgmr.msra.gmra.mrb[0].mxu0 %vm49_vm0, %v134_v3 }
  0xdd   :  { %v129_v5 = vpop.f32.mrb[0].mxu0 }
  0xde   :  { %v99_v6 = vadd.f32 %v129_v5, %v112_v4  ;;  %v90_v7 = vpop.f32.mrb[1].mxu0 }
  0xdf   :  { %v91_v8 = vadd.f32 %v112_v4, %v90_v7  ;;  %v130_v9 = vpop.f32.mrb[2].mxu0 }
  0xe0   :  { %107 = vst.msk [vmem:[%s186_s3 + $0x10] sm:$0xf] %vm106_vm1, %v99_v6  ;;  %v93_v10 = vpop.f32.mrb[3].mxu0 }
  0xe1   :  { %104 = vst.msk [vmem:[%s186_s3] sm:$0xff] %vm49_vm0, %v91_v8  ;;  %v94_v11 = vadd.f32 %v112_v4, %v93_v10 }
  0xe3   :  { %105 = vst.msk [vmem:[%s186_s3 + $0x8] sm:$0xff] %vm49_vm0, %v94_v11 }

// kernel: vit_forward.30
= control target key start
LH: loop header
LB: loop body
LE: loop exit
PB: predicated region body
PF: predicated region fallthrough
CT: control target
= control target key end

     0   :  { %v45_v0 = vlaneseq  ;;  %v4601_v1 = vmov 1966171168   ;;  %v4602_v3 = vmov 0.0   ;;  %vm4603_vm0 = vmmov 0   ;;  %s4604_s18 = smov 96   ;;  %s4606_s23 = smov 88   ;;  %s5566_s0 = inlined_call_operand.vmem [shape: bf16[8,2,96], index: 0, kind: input, shape index: {}]   ;;  %s5567_s1 = inlined_call_operand.vmem [shape: bf16[8,2,32], index: 1, kind: output, shape index: {}]  }
   0x1   :  { %v43_v2 = vunpack.c.l.s4 %v4601_v1  ;;  %4012 = vmatprep.subr.bf16.mxu0 %v4602_v3  ;;  %4018 = vmatprep.subr.bf16.mxu1 %v4602_v3  ;;  %v9_v5 = vld [vmem:[%s5566_s0] sm:$0x1]  ;;  %v10_v7 = vld [vmem:[%s5566_s0 + $0x1] sm:$0x1]  ;;  %v11_v8 = vld [vmem:[%s5566_s0 + $0x2] sm:$0x1] }
   0x2   :  { %v46_v4 = vshrl.u32 %v45_v0, 7  ;;  %v4642_v9 = vld [vmem:[%s5566_s0 + $0x3] sm:$0x1]  ;;  %4014 = vmatprep.mubr.msk.bf16.mxu0 %vm4603_vm0, %v4602_v3  ;;  %4020 = vmatprep.mubr.msk.bf16.mxu1 %vm4603_vm0, %v4602_v3  ;;  %v4652_v15 = vld [vmem:[%s5566_s0 + $0x4] sm:$0x1]  ;;  %v17_v31 = vunpack.c.l.bf16 %v9_v5  ;;  %vm58_vm1 = vcmask 64512   ;;  %v18_v35 = vunpack.c.l.bf16 %v10_v7 }
   0x3   :  { %v44_v6 = vunpack.c.0.s8 %v43_v2  ;;  %v4657_v16 = vld [vmem:[%s5566_s0 + $0x5] sm:$0x1]  ;;  %v4674_v23 = vld [vmem:[%s5566_s0 + $0x6] sm:$0x1]  ;;  %v4679_v24 = vld [vmem:[%s5566_s0 + $0x7] sm:$0x1]  ;;  %v19_v41 = vunpack.c.l.bf16 %v11_v8  ;;  %v20_v46 = vunpack.c.l.bf16 %v4642_v9  ;;  %v21_v51 = vunpack.c.l.bf16 %v4652_v15 }
   0x4   :  { %s4605_s0 = smov 64   ;;  %v25_v34 = vmul.f32 0.35355338, %v17_v31  ;;  %v26_v40 = vmul.f32 0.35355338, %v18_v35  ;;  %v22_v56 = vunpack.c.l.bf16 %v4657_v16  ;;  %v23_v61 = vunpack.c.l.bf16 %v4674_v23  ;;  %s4607_s24 = smov 120  }
   0x5   :  { %v47_v10 = vsub.s32 %v44_v6, %v46_v4  ;;  %v27_v45 = vmul.f32 0.35355338, %v19_v41  ;;  %v28_v50 = vmul.f32 0.35355338, %v20_v46  ;;  %v29_v55 = vmul.f32 0.35355338, %v21_v51 }
   0x6   :  { %v4708_v39 = vpack.c.bf16 %v25_v34, %v25_v34  ;;  %v4714_v44 = vpack.c.bf16 %v26_v40, %v26_v40  ;;  %v30_v60 = vmul.f32 0.35355338, %v22_v56  ;;  %v31_v1 = vmul.f32 0.35355338, %v23_v61  ;;  %s4608_s25 = smov 56   ;;  %s4609_s26 = smov 80  }
   0x7   :  { %v48_v11 = vrot.slane %v9_v5, %v47_v10  ;;  %v112_v12 = vrot.slane %v10_v7, %v47_v10  ;;  %v175_v13 = vrot.slane %v11_v8, %v47_v10  ;;  %v238_v14 = vrot.slane %v4642_v9, %v47_v10  ;;  %s4610_s27 = smov 112   ;;  %s4611_s28 = smov 48  }
   0x8   :  { %v301_v19 = vrot.slane %v4652_v15, %v47_v10  ;;  %v364_v22 = vrot.slane %v4657_v16, %v47_v10  ;;  %v427_v25 = vrot.slane %v4674_v23, %v47_v10  ;;  %v490_v28 = vrot.slane %v4679_v24, %v47_v10  ;;  %s4612_s29 = smov 72   ;;  %s4613_s30 = smov 104  }
   0x9   :  { %v4659_v17 = vrot.slane %v48_v11, %v47_v10  ;;  %v4661_v18 = vrot.slane %v175_v13, %v47_v10  ;;  %v4665_v20 = vrot.slane %v112_v12, %v47_v10  ;;  %v4668_v21 = vrot.slane %v238_v14, %v47_v10  ;;  %s4614_s2 = smov 40   ;;  %s4615_s3 = smov 8  }
   0xa   :  { %v4684_v26 = vrot.slane %v301_v19, %v47_v10  ;;  %v4686_v27 = vrot.slane %v364_v22, %v47_v10  ;;  %v4691_v29 = vrot.slane %v427_v25, %v47_v10  ;;  %v4693_v30 = vrot.slane %v490_v28, %v47_v10  ;;  %s4616_s4 = smov 16   ;;  %s4617_s5 = smov 24  }
   0xb   :  { %56 = vrot.lane.b32.xlu0 %v4659_v17, %s4604_s18  ;;  %183 = vrot.lane.b32.xlu1 %v4661_v18, %s4604_s18  ;;  %v4723_v49 = vpack.c.bf16 %v27_v45, %v27_v45  ;;  %v4732_v54 = vpack.c.bf16 %v28_v50, %v28_v50  ;;  %v4741_v59 = vpack.c.bf16 %v29_v55, %v29_v55  ;;  %v24_v2 = vunpack.c.l.bf16 %v4679_v24 }
   0xc   :  { %v4750_v0 = vpack.c.bf16 %v30_v60, %v30_v60  ;;  %v4759_v5 = vpack.c.bf16 %v31_v1, %v31_v1  ;;  %vm649_vm2 = vcmask 1040384   ;;  %vm546_vm3 = vcmask 9216  }
   0xd   :  { %v32_v6 = vmul.f32 0.35355338, %v24_v2  ;;  %vm645_vm4 = vcmask 15360   ;;  %vm3781_vm5 = vcmask 130048   ;;  %vm3790_vm6 = vcmask 195584  }
   0xe   :  { %vm3807_vm7 = vcmask 253952  }
   0xf   :  { %120 = vrot.lane.b32.xlu0 %v4665_v20, %s4604_s18  ;;  %246 = vrot.lane.b32.xlu1 %v4668_v21, %s4604_s18  ;;  %v4766_v7 = vpack.c.bf16 %v32_v6, %v32_v6 }
  0x13   :  { %309 = vrot.lane.b32.xlu0 %v4684_v26, %s4604_s18  ;;  %372 = vrot.lane.b32.xlu1 %v4686_v27, %s4604_s18 }
  0x17   :  { %435 = vrot.lane.b32.xlu0 %v4691_v29, %s4604_s18  ;;  %498 = vrot.lane.b32.xlu1 %v4693_v30, %s4604_s18 }
  0x1b   :  { %643 = vrot.lane.b32.xlu1 %v4659_v17, %s4605_s0  ;;  %693 = vrot.lane.b32.xlu0 %v4665_v20, %s4605_s0 }
  0x1f   :  { %741 = vrot.lane.b32.xlu1 %v4661_v18, %s4605_s0 }
  0x23   :  { %789 = vrot.lane.b32.xlu1 %v4668_v21, %s4605_s0 }
  0x7d   :  { %v57_v32 = vpop.permute.xlu0 %56  ;;  %v184_v36 = vpop.permute.xlu1 %183 }
  0x7e   :  { %v63_v33 = vsel %vm58_vm1, %v57_v32, 0  ;;  %v189_v42 = vsel %vm58_vm1, %v184_v36, 0 }
  0x7f   :  { %4013 = vmatpush3.bf16.xpose.msra.mxu0 %v63_v33 }
  0x80   :  { %4024 = vmatprep.subr.bf16.mxu0 %v4602_v3 }
  0x81   :  { %v121_v37 = vpop.permute.xlu0 %120  ;;  %v247_v43 = vpop.permute.xlu1 %246 }
  0x82   :  { %v126_v38 = vsel %vm58_vm1, %v121_v37, 0  ;;  %v252_v47 = vsel %vm58_vm1, %v247_v43, 0 }
  0x83   :  { %4019 = vmatpush3.bf16.xpose.msra.mxu1 %v126_v38 }
  0x84   :  { %4030 = vmatprep.subr.bf16.mxu1 %v4602_v3 }
  0x85   :  { %v310_v48 = vpop.permute.xlu0 %309  ;;  %v373_v53 = vpop.permute.xlu1 %372 }
  0x86   :  { %4015 = vmatmul.mubr.msk.bf16.vlgmr.msra.gmra.mrb[0].mxu0 %vm58_vm1, %v4708_v39  ;;  %v315_v52 = vsel %vm58_vm1, %v310_v48, 0  ;;  %v378_v57 = vsel %vm58_vm1, %v373_v53, 0 }
  0x87   :  { %4025 = vmatpush3.bf16.xpose.msra.mxu0 %v189_v42  ;;  %4026 = vmatprep.mubr.msk.bf16.mxu0 %vm4603_vm0, %v4602_v3 }
  0x88   :  { %4036 = vmatprep.subr.bf16.mxu0 %v4602_v3 }
  0x89   :  { %v436_v58 = vpop.permute.xlu0 %435  ;;  %v499_v63 = vpop.permute.xlu1 %498 }
  0x8a   :  { %4021 = vmatmul.mubr.msk.bf16.vlgmr.msra.gmra.mrb[0].mxu1 %vm58_vm1, %v4714_v44  ;;  %v441_v62 = vsel %vm58_vm1, %v436_v58, 0  ;;  %v504_v4 = vsel %vm58_vm1, %v499_v63, 0 }
  0x8b   :  { %4031 = vmatpush3.bf16.xpose.msra.mxu1 %v252_v47  ;;  %4032 = vmatprep.mubr.msk.bf16.mxu1 %vm4603_vm0, %v4602_v3 }
  0x8c   :  { %4042 = vmatprep.subr.bf16.mxu1 %v4602_v3 }
  0x8d   :  { %v644_v8 = vpop.permute.xlu1 %643  ;;  %v694_v9 = vpop.permute.xlu0 %693 }
  0x8e   :  { %4027 = vmatmul.mubr.msk.bf16.vlgmr.msra.gmra.mrb[4].mxu0 %vm58_vm1, %v4723_v49  ;;  %v651_v10 = vsel %vm649_vm2, %v644_v8, 0  ;;  %v699_v11 = vsel %vm649_vm2, %v694_v9, 0 }
  0x8f   :  { %4037 = vmatpush3.bf16.xpose.msra.mxu0 %v315_v52  ;;  %4038 = vmatprep.mubr.msk.bf16.mxu0 %vm4603_vm0, %v4602_v3 }
  0x90   :  { %4048 = vmatprep.subr.bf16.mxu0 %v4602_v3 }
  0x91   :  { %v4793_v2 = vpop.permute.xlu1 %741 }
  0x92   :  { %4033 = vmatmul.mubr.msk.bf16.vlgmr.msra.gmra.mrb[4].mxu1 %vm58_vm1, %v4732_v54 }
  0x93   :  { %4043 = vmatpush3.bf16.xpose.msra.mxu1 %v378_v57  ;;  %4044 = vmatprep.mubr.msk.bf16.mxu1 %vm4603_vm0, %v4602_v3 }
  0x94   :  { %4054 = vmatprep.subr.bf16.mxu1 %v4602_v3 }
  0x96   :  { %4039 = vmatmul.mubr.msk.bf16.vlgmr.msra.gmra.mrb[8].mxu0 %vm58_vm1, %v4741_v59 }
  0x97   :  { %4049 = vmatpush3.bf16.xpose.msra.mxu0 %v441_v62  ;;  %4050 = vmatprep.mubr.msk.bf16.mxu0 %vm4603_vm0, %v4602_v3 }
  0x98   :  { %4060 = vmatprep.subr.bf16.mxu0 %v4602_v3 }
  0x9a   :  { %4045 = vmatmul.mubr.msk.bf16.vlgmr.msra.gmra.mrb[8].mxu1 %vm58_vm1, %v4750_v0 }
  0x9b   :  { %4055 = vmatpush3.bf16.xpose.msra.mxu1 %v504_v4  ;;  %4056 = vmatprep.mubr.msk.bf16.mxu1 %vm4603_vm0, %v4602_v3  ;;  %v4795_v4 = vpop.permute.xlu1 %789 }
  0x9c   :  { %4066 = vmatprep.subr.bf16.mxu1 %v4602_v3 }
  0x9e   :  { %4051 = vmatmul.mubr.msk.bf16.vlgmr.msra.gmra.mrb[12].mxu0 %vm58_vm1, %v4759_v5 }
  0x9f   :  { %4062 = vmatprep.mubr.msk.bf16.mxu0 %vm4603_vm0, %v4602_v3  ;;  %4061 = vmatpush3.bf16.msra.mxu0 %v651_v10 }
  0xa0   :  { %4072 = vmatprep.subr.bf16.mxu0 %v4602_v3 }
  0xa2   :  { %4057 = vmatmul.mubr.msk.bf16.vlgmr.msra.gmra.mrb[12].mxu1 %vm58_vm1, %v4766_v7 }
  0xa3   :  { %4068 = vmatprep.mubr.msk.bf16.mxu1 %vm4603_vm0, %v4602_v3  ;;  %4067 = vmatpush3.bf16.msra.mxu1 %v699_v11 }
  0xa4   :  { %4078 = vmatprep.subr.bf16.mxu1 %v4602_v3 }
 0x159   :  { %v99_v12 = vpop.f32.mrb[0].mxu0 }
 0x15a   :  { %v4016_v13 = vpop.f32.mrb[1].mxu0  ;;  %v547_v14 = vsel %vm546_vm3, %v99_v12, -inf }
 0x15b   :  { %548 = vmax.xlane.f32.xlu0 %v547_v14  ;;  %v102_v15 = vpop.f32.mrb[2].mxu0 }
 0x15c   :  { %v4017_v16 = vpop.f32.mrb[3].mxu0 }
 0x15d   :  { %v162_v19 = vpop.f32.mrb[0].mxu1 }
 0x15e   :  { %v4022_v22 = vpop.f32.mrb[1].mxu1  ;;  %v550_v23 = vsel %vm546_vm3, %v162_v19, -inf }
 0x15f   :  { %551 = vmax.xlane.f32.xlu1 %v550_v23  ;;  %v165_v24 = vpop.f32.mrb[2].mxu1 }
 0x160   :  { %v4023_v25 = vpop.f32.mrb[3].mxu1 }
 0x161   :  { %v225_v28 = vpop.f32.mrb[4].mxu0 }
 0x162   :  { %v4028_v31 = vpop.f32.mrb[5].mxu0  ;;  %v553_v32 = vsel %vm546_vm3, %v225_v28, -inf }
 0x163   :  { %554 = vmax.xlane.f32.xlu0 %v553_v32  ;;  %v228_v33 = vpop.f32.mrb[6].mxu0 }
 0x164   :  { %v4029_v34 = vpop.f32.mrb[7].mxu0 }
 0x165   :  { %v288_v35 = vpop.f32.mrb[4].mxu1 }
 0x166   :  { %v4034_v36 = vpop.f32.mrb[5].mxu1  ;;  %v556_v37 = vsel %vm546_vm3, %v288_v35, -inf }
 0x167   :  { %v291_v38 = vpop.f32.mrb[6].mxu1  ;;  %557 = vmax.xlane.f32.xlu0 %v556_v37 }
 0x168   :  { %v4035_v40 = vpop.f32.mrb[7].mxu1 }
 0x169   :  { %v351_v41 = vpop.f32.mrb[8].mxu0 }
 0x16a   :  { %v4040_v42 = vpop.f32.mrb[9].mxu0  ;;  %v559_v43 = vsel %vm546_vm3, %v351_v41, -inf }
 0x16b   :  { %560 = vmax.xlane.f32.xlu1 %v559_v43  ;;  %v354_v45 = vpop.f32.mrb[10].mxu0 }
 0x16c   :  { %v4041_v46 = vpop.f32.mrb[11].mxu0 }
 0x16d   :  { %v414_v47 = vpop.f32.mrb[8].mxu1 }
 0x16e   :  { %v4046_v48 = vpop.f32.mrb[9].mxu1  ;;  %v562_v50 = vsel %vm546_vm3, %v414_v47, -inf }
 0x16f   :  { %v417_v51 = vpop.f32.mrb[10].mxu1  ;;  %563 = vmax.xlane.f32.xlu0 %v562_v50 }
 0x170   :  { %v4047_v52 = vpop.f32.mrb[11].mxu1 }
 0x171   :  { %v4784_v53 = vpop.f32.mrb[12].mxu0 }
 0x172   :  { %v565_v55 = vsel %vm546_vm3, %v4784_v53, -inf  ;;  %v4052_v56 = vpop.f32.mrb[13].mxu0 }
 0x173   :  { %566 = vmax.xlane.f32.xlu1 %v565_v55  ;;  %v480_v57 = vpop.f32.mrb[14].mxu0 }
 0x174   :  { %v4053_v58 = vpop.f32.mrb[15].mxu0 }
 0x175   :  { %v540_v60 = vpop.f32.mrb[12].mxu1 }
 0x176   :  { %v568_v61 = vsel %vm546_vm3, %v540_v60, -inf  ;;  %v4058_v62 = vpop.f32.mrb[13].mxu1 }
 0x177   :  { %569 = vmax.xlane.f32.xlu0 %v568_v61  ;;  %v543_v63 = vpop.f32.mrb[14].mxu1 }
 0x178   :  { %v4059_v1 = vpop.f32.mrb[15].mxu1 }
 0x184   :  { %885 = vrot.lane.b32.xlu1 %v4686_v27, %s4605_s0 }
 0x18d   :  { %837 = vrot.lane.b32.xlu0 %v4684_v26, %s4605_s0 }
 0x1e8   :  { %v549_v6 = vpop.xlane.xlu0 %548 }
 0x1e9   :  { %v571_v8 = vsub.f32 %v99_v12, %v549_v6 }
 0x1eb   :  { %v579_v9 = vmul.f32 1.442695, %v571_v8 }
 0x1ec   :  { %v552_v10 = vpop.xlane.xlu1 %551 }
 0x1ed   :  { %4473 = vpow2.f32 %v579_v9  ;;  %v572_v11 = vsub.f32 %v162_v19, %v552_v10 }
 0x1ef   :  { %v581_v13 = vmul.f32 1.442695, %v572_v11 }
 0x1f0   :  { %v555_v14 = vpop.xlane.xlu0 %554 }
 0x1f1   :  { %4475 = vpow2.f32 %v581_v13  ;;  %v573_v15 = vsub.f32 %v225_v28, %v555_v14  ;;  %v747_v13 = vsel %vm649_vm2, %v4793_v2, 0 }
 0x1f3   :  { %v583_v16 = vmul.f32 1.442695, %v573_v15 }
 0x1f4   :  { %v558_v22 = vpop.xlane.xlu0 %557 }
 0x1f5   :  { %4477 = vpow2.f32 %v583_v16  ;;  %v574_v23 = vsub.f32 %v288_v35, %v558_v22 }
 0x1f7   :  { %v4797_v24 = vpop.eup %4473  ;;  %v585_v25 = vmul.f32 1.442695, %v574_v23  ;;  %v795_v23 = vsel %vm649_vm2, %v4795_v4, 0 }
 0x1f8   :  { %v561_v31 = vpop.xlane.xlu1 %560  ;;  %v595_v32 = vsel %vm546_vm3, %v4797_v24, 0.0 }
 0x1f9   :  { %4479 = vpow2.f32 %v585_v25  ;;  %v575_v12 = vsub.f32 %v351_v41, %v561_v31  ;;  %596 = vadd.xlane.f32.xlu1 %v595_v32 }
 0x1fb   :  { %v4801_v33 = vpop.eup %4475  ;;  %v587_v19 = vmul.f32 1.442695, %v575_v12 }
 0x1fc   :  { %v564_v34 = vpop.xlane.xlu0 %563  ;;  %v598_v28 = vsel %vm546_vm3, %v4801_v33, 0.0 }
 0x1fd   :  { %4481 = vpow2.f32 %v587_v19  ;;  %v576_v36 = vsub.f32 %v414_v47, %v564_v34  ;;  %599 = vadd.xlane.f32.xlu0 %v598_v28 }
 0x1ff   :  { %v4805_v35 = vpop.eup %4477  ;;  %v589_v37 = vmul.f32 1.442695, %v576_v36 }
 0x200   :  { %v601_v38 = vsel %vm546_vm3, %v4805_v35, 0.0  ;;  %v567_v47 = vpop.xlane.xlu1 %566 }
 0x201   :  { %4483 = vpow2.f32 %v589_v37  ;;  %602 = vadd.xlane.f32.xlu1 %v601_v38  ;;  %v577_v48 = vsub.f32 %v4784_v53, %v567_v47 }
 0x203   :  { %v4809_v40 = vpop.eup %4479  ;;  %v591_v51 = vmul.f32 1.442695, %v577_v48 }
 0x204   :  { %v604_v41 = vsel %vm546_vm3, %v4809_v40, 0.0  ;;  %v570_v50 = vpop.xlane.xlu0 %569  ;;  %v886_v53 = vpop.permute.xlu1 %885 }
 0x205   :  { %605 = vadd.xlane.f32.xlu0 %v604_v41  ;;  %v578_v52 = vsub.f32 %v540_v60, %v570_v50  ;;  %4485 = vpow2.f32 %v591_v51  ;;  %v891_v19 = vsel %vm649_vm2, %v886_v53, 0 }
 0x207   :  { %v4813_v42 = vpop.eup %4481  ;;  %v593_v55 = vmul.f32 1.442695, %v578_v52 }
 0x208   :  { %v607_v43 = vsel %vm546_vm3, %v4813_v42, 0.0  ;;  %v838_v60 = vpop.permute.xlu0 %837 }
 0x209   :  { %608 = vadd.xlane.f32.xlu1 %v607_v43  ;;  %4487 = vpow2.f32 %v593_v55  ;;  %v843_v32 = vsel %vm649_vm2, %v838_v60, 0 }
 0x20b   :  { %v4817_v45 = vpop.eup %4483 }
 0x20c   :  { %v610_v46 = vsel %vm546_vm3, %v4817_v45, 0.0 }
 0x20d   :  { %611 = vadd.xlane.f32.xlu0 %v610_v46 }
 0x20f   :  { %v4826_v56 = vpop.eup %4485 }
 0x210   :  { %v613_v57 = vsel %vm546_vm3, %v4826_v56, 0.0 }
 0x213   :  { %v4830_v58 = vpop.eup %4487 }
 0x214   :  { %v616_v61 = vsel %vm546_vm3, %v4830_v58, 0.0 }
 0x21a   :  { %981 = vrot.lane.b32.xlu1 %v4693_v30, %s4605_s0 }
 0x223   :  { %933 = vrot.lane.b32.xlu0 %v4691_v29, %s4605_s0 }
 0x23e   :  { %614 = vadd.xlane.f32.xlu1 %v613_v57 }
 0x242   :  { %617 = vadd.xlane.f32.xlu0 %v616_v61 }
 0x24f   :  { %1083 = vrot.lane.b32.xlu1 %v4665_v20, %s4606_s23 }
 0x253   :  { %1081 = vrot.lane.b32.xlu1 %v4714_v44, %s4607_s24 }
 0x257   :  { %1185 = vrot.lane.b32.xlu1 %v4668_v21, %s4606_s23 }
 0x258   :  { %1032 = vrot.lane.b32.xlu0 %v4659_v17, %s4606_s23 }
 0x25b   :  { %1183 = vrot.lane.b32.xlu1 %v4732_v54, %s4607_s24 }
 0x25c   :  { %1030 = vrot.lane.b32.xlu0 %v4708_v39, %s4607_s24 }
 0x25f   :  { %1287 = vrot.lane.b32.xlu1 %v4686_v27, %s4606_s23 }
 0x260   :  { %1134 = vrot.lane.b32.xlu0 %v4661_v18, %s4606_s23 }
 0x263   :  { %1285 = vrot.lane.b32.xlu1 %v4750_v0, %s4607_s24 }
 0x264   :  { %1132 = vrot.lane.b32.xlu0 %v4723_v49, %s4607_s24 }
 0x267   :  { %1389 = vrot.lane.b32.xlu1 %v4693_v30, %s4606_s23 }
 0x268   :  { %1236 = vrot.lane.b32.xlu0 %v4684_v26, %s4606_s23 }
 0x26b   :  { %1387 = vrot.lane.b32.xlu1 %v4766_v7, %s4607_s24 }
 0x26c   :  { %1234 = vrot.lane.b32.xlu0 %v4741_v59, %s4607_s24 }
 0x26f   :  { %1533 = vrot.lane.b32.xlu1 %v4659_v17, %s4608_s25 }
 0x270   :  { %1338 = vrot.lane.b32.xlu0 %v4691_v29, %s4606_s23 }
 0x273   :  { %1629 = vrot.lane.b32.xlu1 %v4661_v18, %s4608_s25 }
 0x274   :  { %1336 = vrot.lane.b32.xlu0 %v4759_v5, %s4607_s24 }
 0x277   :  { %1677 = vrot.lane.b32.xlu1 %v4668_v21, %s4608_s25 }
 0x278   :  { %1581 = vrot.lane.b32.xlu0 %v4665_v20, %s4608_s25 }
 0x286   :  { %v597_v62 = vpop.xlane.xlu1 %596 }
 0x287   :  { %4489 = vrcp.f32 %v597_v62 }
 0x28a   :  { %v600_v63 = vpop.xlane.xlu0 %599 }
 0x28b   :  { %4491 = vrcp.f32 %v600_v63 }
 0x28e   :  { %v603_v1 = vpop.xlane.xlu1 %602 }
 0x28f   :  { %4493 = vrcp.f32 %v603_v1 }
 0x291   :  { %v4490_v6 = vpop.eup %4489 }
 0x292   :  { %v606_v8 = vpop.xlane.xlu0 %605  ;;  %v627_v9 = vmul.f32 %v4490_v6, %v4797_v24 }
 0x293   :  { %4495 = vrcp.f32 %v606_v8 }
 0x294   :  { %v635_v10 = vpack.c.bf16 %v627_v9, %v627_v9 }
 0x295   :  { %v4492_v11 = vpop.eup %4491 }
 0x296   :  { %4063 = vmatmul.mubr.msk.bf16.vlgmr.msra.gmra.mrb[16].mxu0 %vm645_vm4, %v635_v10  ;;  %v609_v14 = vpop.xlane.xlu1 %608  ;;  %v628_v15 = vmul.f32 %v4492_v11, %v4801_v33 }
 0x297   :  { %4073 = vmatpush3.bf16.msra.mxu0 %v747_v13  ;;  %4497 = vrcp.f32 %v609_v14  ;;  %4074 = vmatprep.mubr.msk.bf16.mxu0 %vm4603_vm0, %v4602_v3 }
 0x298   :  { %v636_v16 = vpack.c.bf16 %v628_v15, %v628_v15  ;;  %4084 = vmatprep.subr.bf16.mxu0 %v4602_v3 }
 0x299   :  { %v4494_v22 = vpop.eup %4493 }
 0x29a   :  { %4069 = vmatmul.mubr.msk.bf16.vlgmr.msra.gmra.mrb[16].mxu1 %vm645_vm4, %v636_v16  ;;  %v612_v2 = vpop.xlane.xlu0 %611  ;;  %v629_v24 = vmul.f32 %v4494_v22, %v4805_v35 }
 0x29b   :  { %4079 = vmatpush3.bf16.msra.mxu1 %v795_v23  ;;  %4499 = vrcp.f32 %v612_v2  ;;  %4080 = vmatprep.mubr.msk.bf16.mxu1 %vm4603_vm0, %v4602_v3 }
 0x29c   :  { %v637_v25 = vpack.c.bf16 %v629_v24, %v629_v24  ;;  %4090 = vmatprep.subr.bf16.mxu1 %v4602_v3 }
 0x29d   :  { %v4496_v31 = vpop.eup %4495 }
 0x29e   :  { %4075 = vmatmul.mubr.msk.bf16.vlgmr.msra.gmra.mrb[20].mxu0 %vm645_vm4, %v637_v25  ;;  %v630_v4 = vmul.f32 %v4496_v31, %v4809_v40  ;;  %v934_v28 = vpop.permute.xlu0 %933  ;;  %v982_v40 = vpop.permute.xlu1 %981 }
 0x29f   :  { %4085 = vmatpush3.bf16.msra.mxu0 %v843_v32  ;;  %4086 = vmatprep.mubr.msk.bf16.mxu0 %vm4603_vm0, %v4602_v3  ;;  %v939_v37 = vsel %vm649_vm2, %v934_v28, 0 }
 0x2a0   :  { %v638_v12 = vpack.c.bf16 %v630_v4, %v630_v4  ;;  %4096 = vmatprep.subr.bf16.mxu0 %v4602_v3 }
 0x2a1   :  { %v4498_v33 = vpop.eup %4497 }
 0x2a2   :  { %4081 = vmatmul.mubr.msk.bf16.vlgmr.msra.gmra.mrb[20].mxu1 %vm645_vm4, %v638_v12  ;;  %v631_v34 = vmul.f32 %v4498_v33, %v4813_v42  ;;  %v987_v42 = vsel %vm649_vm2, %v982_v40, 0 }
 0x2a3   :  { %4091 = vmatpush3.bf16.msra.mxu1 %v891_v19  ;;  %4092 = vmatprep.mubr.msk.bf16.mxu1 %vm4603_vm0, %v4602_v3 }
 0x2a4   :  { %v639_v36 = vpack.c.bf16 %v631_v34, %v631_v34  ;;  %4102 = vmatprep.subr.bf16.mxu1 %v4602_v3 }
 0x2a5   :  { %v4500_v35 = vpop.eup %4499 }
 0x2a6   :  { %4087 = vmatmul.mubr.msk.bf16.vlgmr.msra.gmra.mrb[24].mxu0 %vm645_vm4, %v639_v36  ;;  %v632_v38 = vmul.f32 %v4500_v35, %v4817_v45 }
 0x2a7   :  { %4097 = vmatpush3.bf16.msra.mxu0 %v939_v37  ;;  %4098 = vmatprep.mubr.msk.bf16.mxu0 %vm4603_vm0, %v4602_v3 }
 0x2a8   :  { %v640_v41 = vpack.c.bf16 %v632_v38, %v632_v38  ;;  %4108 = vmatprep.subr.bf16.mxu0 %v4602_v3 }
 0x2aa   :  { %4093 = vmatmul.mubr.msk.bf16.vlgmr.msra.gmra.mrb[24].mxu1 %vm645_vm4, %v640_v41 }
 0x2ab   :  { %4103 = vmatpush3.bf16.msra.mxu1 %v987_v42  ;;  %4104 = vmatprep.mubr.msk.bf16.mxu1 %vm4603_vm0, %v4602_v3 }
 0x2ac   :  { %4114 = vmatprep.subr.bf16.mxu1 %v4602_v3 }
 0x2cb   :  { %v615_v43 = vpop.xlane.xlu1 %614 }
 0x2cc   :  { %4501 = vrcp.f32 %v615_v43 }
 0x2cf   :  { %v618_v45 = vpop.xlane.xlu0 %617  ;;  %v1084_v46 = vpop.permute.xlu1 %1083 }
 0x2d0   :  { %4503 = vrcp.f32 %v618_v45  ;;  %v1089_v63 = vsel %vm58_vm1, %v1084_v46, 0 }
 0x2d3   :  { %v1033_v47 = vpop.permute.xlu0 %1032  ;;  %v1082_v48 = vpop.permute.xlu1 %1081 }
 0x2d4   :  { %v1038_v55 = vsel %vm58_vm1, %v1033_v47, 0 }
 0x2d6   :  { %v4502_v50 = vpop.eup %4501 }
 0x2d7   :  { %v633_v51 = vmul.f32 %v4502_v50, %v4826_v56  ;;  %v1031_v52 = vpop.permute.xlu0 %1030  ;;  %v1186_v53 = vpop.permute.xlu1 %1185 }
 0x2d8   :  { %v1191_v9 = vsel %vm58_vm1, %v1186_v53, 0 }
 0x2d9   :  { %v641_v57 = vpack.c.bf16 %v633_v51, %v633_v51 }
 0x2da   :  { %v4504_v61 = vpop.eup %4503 }
 0x2db   :  { %4099 = vmatmul.mubr.msk.bf16.vlgmr.msra.gmra.mrb[28].mxu0 %vm645_vm4, %v641_v57  ;;  %v634_v60 = vmul.f32 %v4504_v61, %v4830_v58  ;;  %v1135_v62 = vpop.permute.xlu0 %1134  ;;  %v1184_v6 = vpop.permute.xlu1 %1183 }
 0x2dc   :  { %4109 = vmatpush3.bf16.xpose.msra.mxu0 %v1038_v55  ;;  %4110 = vmatprep.mubr.msk.bf16.mxu0 %vm4603_vm0, %v4602_v3  ;;  %v1140_v58 = vsel %vm58_vm1, %v1135_v62, 0 }
 0x2dd   :  { %v642_v1 = vpack.c.bf16 %v634_v60, %v634_v60  ;;  %4120 = vmatprep.subr.bf16.mxu0 %v4602_v3 }
 0x2df   :  { %4105 = vmatmul.mubr.msk.bf16.vlgmr.msra.gmra.mrb[28].mxu1 %vm645_vm4, %v642_v1  ;;  %v1133_v56 = vpop.permute.xlu0 %1132  ;;  %v1288_v10 = vpop.permute.xlu1 %1287 }
 0x2e0   :  { %4115 = vmatpush3.bf16.xpose.msra.mxu1 %v1089_v63  ;;  %4116 = vmatprep.mubr.msk.bf16.mxu1 %vm4603_vm0, %v4602_v3  ;;  %v1293_v15 = vsel %vm58_vm1, %v1288_v10, 0 }
 0x2e1   :  { %4126 = vmatprep.subr.bf16.mxu1 %v4602_v3 }
 0x2e3   :  { %4111 = vmatmul.mubr.msk.bf16.vlgmr.msra.gmra.mrb[32].mxu0 %vm58_vm1, %v1031_v52  ;;  %v1237_v8 = vpop.permute.xlu0 %1236  ;;  %v1286_v14 = vpop.permute.xlu1 %1285 }
 0x2e4   :  { %4121 = vmatpush3.bf16.xpose.msra.mxu0 %v1140_v58  ;;  %4122 = vmatprep.mubr.msk.bf16.mxu0 %vm4603_vm0, %v4602_v3  ;;  %v1242_v13 = vsel %vm58_vm1, %v1237_v8, 0 }
 0x2e5   :  { %4132 = vmatprep.subr.bf16.mxu0 %v4602_v3 }
 0x2e7   :  { %4117 = vmatmul.mubr.msk.bf16.vlgmr.msra.gmra.mrb[32].mxu1 %vm58_vm1, %v1082_v48  ;;  %v1235_v11 = vpop.permute.xlu0 %1234  ;;  %v1390_v23 = vpop.permute.xlu1 %1389 }
 0x2e8   :  { %4127 = vmatpush3.bf16.xpose.msra.mxu1 %v1191_v9  ;;  %4128 = vmatprep.mubr.msk.bf16.mxu1 %vm4603_vm0, %v4602_v3  ;;  %v1395_v2 = vsel %vm58_vm1, %v1390_v23, 0 }
 0x2e9   :  { %4138 = vmatprep.subr.bf16.mxu1 %v4602_v3 }
 0x2eb   :  { %4123 = vmatmul.mubr.msk.bf16.vlgmr.msra.gmra.mrb[36].mxu0 %vm58_vm1, %v1133_v56  ;;  %v1339_v16 = vpop.permute.xlu0 %1338  ;;  %v1388_v25 = vpop.permute.xlu1 %1387 }
 0x2ec   :  { %4133 = vmatpush3.bf16.xpose.msra.mxu0 %v1242_v13  ;;  %4134 = vmatprep.mubr.msk.bf16.mxu0 %vm4603_vm0, %v4602_v3  ;;  %v1344_v22 = vsel %vm58_vm1, %v1339_v16, 0 }
 0x2ed   :  { %4144 = vmatprep.subr.bf16.mxu0 %v4602_v3 }
 0x2ef   :  { %4129 = vmatmul.mubr.msk.bf16.vlgmr.msra.gmra.mrb[36].mxu1 %vm58_vm1, %v1184_v6  ;;  %v1337_v24 = vpop.permute.xlu0 %1336  ;;  %v1534_v38 = vpop.permute.xlu1 %1533 }
 0x2f0   :  { %4139 = vmatpush3.bf16.xpose.msra.mxu1 %v1293_v15  ;;  %4140 = vmatprep.mubr.msk.bf16.mxu1 %vm4603_vm0, %v4602_v3  ;;  %v1539_v41 = vsel %vm649_vm2, %v1534_v38, 0 }
 0x2f1   :  { %4150 = vmatprep.subr.bf16.mxu1 %v4602_v3 }
 0x2f3   :  { %4135 = vmatmul.mubr.msk.bf16.vlgmr.msra.gmra.mrb[40].mxu0 %vm58_vm1, %v1235_v11  ;;  %v1582_v42 = vpop.permute.xlu0 %1581 }
 0x2f4   :  { %4145 = vmatpush3.bf16.xpose.msra.mxu0 %v1344_v22  ;;  %4146 = vmatprep.mubr.msk.bf16.mxu0 %vm4603_vm0, %v4602_v3  ;;  %v1587_v45 = vsel %vm649_vm2, %v1582_v42, 0 }
 0x2f5   :  { %4156 = vmatprep.subr.bf16.mxu0 %v4602_v3 }
 0x2f7   :  { %4141 = vmatmul.mubr.msk.bf16.vlgmr.msra.gmra.mrb[40].mxu1 %vm58_vm1, %v1286_v14 }
 0x2f8   :  { %4151 = vmatpush3.bf16.xpose.msra.mxu1 %v1395_v2  ;;  %4152 = vmatprep.mubr.msk.bf16.mxu1 %vm4603_vm0, %v4602_v3 }
 0x2f9   :  { %4162 = vmatprep.subr.bf16.mxu1 %v4602_v3 }
 0x2fb   :  { %4147 = vmatmul.mubr.msk.bf16.vlgmr.msra.gmra.mrb[44].mxu0 %vm58_vm1, %v1337_v24 }
 0x2fc   :  { %4158 = vmatprep.mubr.msk.bf16.mxu0 %vm4603_vm0, %v4602_v3  ;;  %4157 = vmatpush3.bf16.msra.mxu0 %v1539_v41 }
 0x2fd   :  { %4168 = vmatprep.subr.bf16.mxu0 %v4602_v3 }
 0x2ff   :  { %4153 = vmatmul.mubr.msk.bf16.vlgmr.msra.gmra.mrb[44].mxu1 %vm58_vm1, %v1388_v25 }
 0x300   :  { %4164 = vmatprep.mubr.msk.bf16.mxu1 %vm4603_vm0, %v4602_v3  ;;  %4163 = vmatpush3.bf16.msra.mxu1 %v1587_v45 }
 0x301   :  { %4174 = vmatprep.subr.bf16.mxu1 %v4602_v3 }
 0x369   :  { %v4944_v31 = vpop.f32.mrb[16].mxu0 }
 0x36a   :  { %v4064_v32 = vpop.f32.mrb[17].mxu0 }
 0x36b   :  { %v690_v4 = vpop.f32.mrb[18].mxu0 }
 0x36c   :  { %v4065_v12 = vpop.f32.mrb[19].mxu0 }
 0x36d   :  { %v4946_v33 = vpop.f32.mrb[16].mxu1 }
 0x36e   :  { %v4070_v19 = vpop.f32.mrb[17].mxu1 }
 0x36f   :  { %v738_v34 = vpop.f32.mrb[18].mxu1 }
 0x370   :  { %v4071_v28 = vpop.f32.mrb[19].mxu1 }
 0x371   :  { %v4948_v36 = vpop.f32.mrb[20].mxu0 }
 0x372   :  { %v4076_v35 = vpop.f32.mrb[21].mxu0 }
 0x373   :  { %v786_v37 = vpop.f32.mrb[22].mxu0 }
 0x374   :  { %v4077_v40 = vpop.f32.mrb[23].mxu0 }
 0x375   :  { %v4951_v43 = vpop.f32.mrb[20].mxu1 }
 0x376   :  { %v4082_v46 = vpop.f32.mrb[21].mxu1 }
 0x377   :  { %v834_v47 = vpop.f32.mrb[22].mxu1 }
 0x378   :  { %v4083_v48 = vpop.f32.mrb[23].mxu1 }
 0x379   :  { %v4956_v50 = vpop.f32.mrb[24].mxu0 }
 0x37a   :  { %v4088_v51 = vpop.f32.mrb[25].mxu0 }
 0x37b   :  { %v882_v52 = vpop.f32.mrb[26].mxu0 }
 0x37c   :  { %v4089_v55 = vpop.f32.mrb[27].mxu0 }
 0x37d   :  { %v4958_v57 = vpop.f32.mrb[24].mxu1 }
 0x37e   :  { %v4094_v61 = vpop.f32.mrb[25].mxu1 }
 0x37f   :  { %v930_v53 = vpop.f32.mrb[26].mxu1 }
 0x380   :  { %v4095_v60 = vpop.f32.mrb[27].mxu1 }
 0x3ae   :  { %v4960_v62 = vpop.f32.mrb[28].mxu0 }
 0x3af   :  { %v4100_v63 = vpop.f32.mrb[29].mxu0 }
 0x3b0   :  { %v978_v1 = vpop.f32.mrb[30].mxu0 }
 0x3b1   :  { %v4101_v56 = vpop.f32.mrb[31].mxu0 }
 0x3b2   :  { %v4962_v6 = vpop.f32.mrb[28].mxu1 }
 0x3b3   :  { %v4106_v58 = vpop.f32.mrb[29].mxu1 }
 0x3b4   :  { %v1026_v8 = vpop.f32.mrb[30].mxu1 }
 0x3b5   :  { %v4107_v9 = vpop.f32.mrb[31].mxu1 }
 0x3b6   :  { %v1074_v10 = vpop.f32.mrb[32].mxu0 }
 0x3b7   :  { %v4112_v11 = vpop.f32.mrb[33].mxu0  ;;  %v1437_v13 = vsel %vm546_vm3, %v1074_v10, -inf }
 0x3b8   :  { %1438 = vmax.xlane.f32.xlu0 %v1437_v13  ;;  %v1077_v14 = vpop.f32.mrb[34].mxu0  ;;  %v4979_v13 = vpop.permute.xlu1 %1629 }
 0x3b9   :  { %v4113_v15 = vpop.f32.mrb[35].mxu0 }
 0x3ba   :  { %v1125_v16 = vpop.f32.mrb[32].mxu1 }
 0x3bb   :  { %v4118_v22 = vpop.f32.mrb[33].mxu1  ;;  %v1440_v23 = vsel %vm546_vm3, %v1125_v16, -inf }
 0x3bc   :  { %1441 = vmax.xlane.f32.xlu1 %v1440_v23  ;;  %v1128_v2 = vpop.f32.mrb[34].mxu1  ;;  %v4981_v14 = vpop.permute.xlu1 %1677 }
 0x3bd   :  { %v4119_v24 = vpop.f32.mrb[35].mxu1 }
 0x3be   :  { %v1176_v25 = vpop.f32.mrb[36].mxu0 }
 0x3bf   :  { %v4124_v32 = vpop.f32.mrb[37].mxu0  ;;  %v1443_v4 = vsel %vm546_vm3, %v1176_v25, -inf }
 0x3c0   :  { %1444 = vmax.xlane.f32.xlu0 %v1443_v4  ;;  %v1179_v12 = vpop.f32.mrb[38].mxu0 }
 0x3c1   :  { %v4125_v19 = vpop.f32.mrb[39].mxu0 }
 0x3c2   :  { %v1227_v34 = vpop.f32.mrb[36].mxu1 }
 0x3c3   :  { %v4130_v28 = vpop.f32.mrb[37].mxu1  ;;  %v1446_v35 = vsel %vm546_vm3, %v1227_v34, -inf }
 0x3c4   :  { %v1230_v37 = vpop.f32.mrb[38].mxu1  ;;  %1447 = vmax.xlane.f32.xlu0 %v1446_v35 }
 0x3c5   :  { %v4131_v38 = vpop.f32.mrb[39].mxu1 }
 0x3c6   :  { %v1278_v40 = vpop.f32.mrb[40].mxu0 }
 0x3c7   :  { %v4136_v41 = vpop.f32.mrb[41].mxu0  ;;  %v1449_v42 = vsel %vm546_vm3, %v1278_v40, -inf }
 0x3c8   :  { %1450 = vmax.xlane.f32.xlu1 %v1449_v42  ;;  %v1281_v45 = vpop.f32.mrb[42].mxu0 }
 0x3c9   :  { %v4137_v46 = vpop.f32.mrb[43].mxu0 }
 0x3ca   :  { %v1329_v47 = vpop.f32.mrb[40].mxu1 }
 0x3cb   :  { %v4142_v48 = vpop.f32.mrb[41].mxu1  ;;  %v1452_v51 = vsel %vm546_vm3, %v1329_v47, -inf }
 0x3cc   :  { %v1332_v52 = vpop.f32.mrb[42].mxu1  ;;  %1453 = vmax.xlane.f32.xlu0 %v1452_v51 }
 0x3cd   :  { %v4143_v55 = vpop.f32.mrb[43].mxu1 }
 0x3ce   :  { %v4970_v61 = vpop.f32.mrb[44].mxu0 }
 0x3cf   :  { %v1455_v53 = vsel %vm546_vm3, %v4970_v61, -inf  ;;  %v4148_v60 = vpop.f32.mrb[45].mxu0 }
 0x3d0   :  { %1456 = vmax.xlane.f32.xlu1 %v1455_v53  ;;  %v1383_v63 = vpop.f32.mrb[46].mxu0 }
 0x3d1   :  { %v4149_v1 = vpop.f32.mrb[47].mxu0 }
 0x3d2   :  { %v1431_v56 = vpop.f32.mrb[44].mxu1 }
 0x3d3   :  { %v1458_v58 = vsel %vm546_vm3, %v1431_v56, -inf  ;;  %v4154_v8 = vpop.f32.mrb[45].mxu1 }
 0x3d4   :  { %1459 = vmax.xlane.f32.xlu0 %v1458_v58  ;;  %v1434_v9 = vpop.f32.mrb[46].mxu1 }
 0x3d5   :  { %v4155_v11 = vpop.f32.mrb[47].mxu1 }
 0x3e1   :  { %1773 = vrot.lane.b32.xlu1 %v4686_v27, %s4608_s25 }
 0x3ea   :  { %1725 = vrot.lane.b32.xlu0 %v4684_v26, %s4608_s25 }
 0x445   :  { %v1439_v15 = vpop.xlane.xlu0 %1438 }
 0x446   :  { %v1461_v22 = vsub.f32 %v1074_v10, %v1439_v15 }
 0x448   :  { %v1469_v23 = vmul.f32 1.442695, %v1461_v22 }
 0x449   :  { %v1442_v2 = vpop.xlane.xlu1 %1441 }
 0x44a   :  { %4505 = vpow2.f32 %v1469_v23  ;;  %v1462_v24 = vsub.f32 %v1125_v16, %v1442_v2 }
 0x44c   :  { %v1471_v32 = vmul.f32 1.442695, %v1462_v24 }
 0x44d   :  { %v1445_v4 = vpop.xlane.xlu0 %1444 }
 0x44e   :  { %4507 = vpow2.f32 %v1471_v32  ;;  %v1463_v12 = vsub.f32 %v1176_v25, %v1445_v4 }
 0x450   :  { %v1473_v19 = vmul.f32 1.442695, %v1463_v12 }
 0x451   :  { %v1448_v28 = vpop.xlane.xlu0 %1447 }
 0x452   :  { %4509 = vpow2.f32 %v1473_v19  ;;  %v1464_v35 = vsub.f32 %v1227_v34, %v1448_v28 }
 0x454   :  { %v4983_v37 = vpop.eup %4505  ;;  %v1475_v38 = vmul.f32 1.442695, %v1464_v35 }
 0x455   :  { %v1451_v41 = vpop.xlane.xlu1 %1450  ;;  %v1485_v42 = vsel %vm546_vm3, %v4983_v37, 0.0 }
 0x456   :  { %4511 = vpow2.f32 %v1475_v38  ;;  %v1465_v10 = vsub.f32 %v1278_v40, %v1451_v41  ;;  %1486 = vadd.xlane.f32.xlu1 %v1485_v42  ;;  %v1635_v42 = vsel %vm649_vm2, %v4979_v13, 0 }
 0x458   :  { %v4987_v45 = vpop.eup %4507  ;;  %v1477_v16 = vmul.f32 1.442695, %v1465_v10 }
 0x459   :  { %v1454_v46 = vpop.xlane.xlu0 %1453  ;;  %v1488_v25 = vsel %vm546_vm3, %v4987_v45, 0.0 }
 0x45a   :  { %4513 = vpow2.f32 %v1477_v16  ;;  %v1466_v48 = vsub.f32 %v1329_v47, %v1454_v46  ;;  %1489 = vadd.xlane.f32.xlu0 %v1488_v25  ;;  %v1683_v25 = vsel %vm649_vm2, %v4981_v14, 0 }
 0x45c   :  { %v4991_v34 = vpop.eup %4509  ;;  %v1479_v51 = vmul.f32 1.442695, %v1466_v48 }
 0x45d   :  { %v1491_v52 = vsel %vm546_vm3, %v4991_v34, 0.0  ;;  %v1457_v1 = vpop.xlane.xlu1 %1456 }
 0x45e   :  { %4515 = vpow2.f32 %v1479_v51  ;;  %1492 = vadd.xlane.f32.xlu1 %v1491_v52  ;;  %v1467_v58 = vsub.f32 %v4970_v61, %v1457_v1 }
 0x460   :  { %v4995_v40 = vpop.eup %4511  ;;  %v1481_v9 = vmul.f32 1.442695, %v1467_v58 }
 0x461   :  { %v1494_v55 = vsel %vm546_vm3, %v4995_v40, 0.0  ;;  %v1460_v8 = vpop.xlane.xlu0 %1459  ;;  %v1774_v61 = vpop.permute.xlu1 %1773 }
 0x462   :  { %1495 = vadd.xlane.f32.xlu0 %v1494_v55  ;;  %v1468_v11 = vsub.f32 %v1431_v56, %v1460_v8  ;;  %4517 = vpow2.f32 %v1481_v9 }
 0x464   :  { %v4999_v53 = vpop.eup %4513  ;;  %v1483_v15 = vmul.f32 1.442695, %v1468_v11 }
 0x465   :  { %v1497_v47 = vsel %vm546_vm3, %v4999_v53, 0.0  ;;  %v1726_v56 = vpop.permute.xlu0 %1725 }
 0x466   :  { %1498 = vadd.xlane.f32.xlu1 %v1497_v47  ;;  %4519 = vpow2.f32 %v1483_v15  ;;  %v1731_v52 = vsel %vm649_vm2, %v1726_v56, 0  ;;  %v1779_v47 = vsel %vm649_vm2, %v1774_v61, 0 }
 0x468   :  { %v5003_v60 = vpop.eup %4515 }
 0x469   :  { %v1500_v63 = vsel %vm546_vm3, %v5003_v60, 0.0 }
 0x46a   :  { %1501 = vadd.xlane.f32.xlu0 %v1500_v63 }
 0x46c   :  { %v5012_v22 = vpop.eup %4517 }
 0x46d   :  { %v1503_v23 = vsel %vm546_vm3, %v5012_v22, 0.0 }
 0x470   :  { %v5016_v2 = vpop.eup %4519 }
 0x471   :  { %v1506_v24 = vsel %vm546_vm3, %v5016_v2, 0.0 }
 0x477   :  { %1869 = vrot.lane.b32.xlu1 %v4693_v30, %s4608_s25 }
 0x480   :  { %1821 = vrot.lane.b32.xlu0 %v4691_v29, %s4608_s25 }
 0x49b   :  { %1504 = vadd.xlane.f32.xlu1 %v1503_v23 }
 0x49f   :  { %1507 = vadd.xlane.f32.xlu0 %v1506_v24 }
 0x4ac   :  { %1969 = vrot.lane.b32.xlu1 %v4665_v20, %s4609_s26 }
 0x4b0   :  { %1967 = vrot.lane.b32.xlu1 %v4714_v44, %s4610_s27 }
 0x4b4   :  { %2069 = vrot.lane.b32.xlu1 %v4668_v21, %s4609_s26 }
 0x4b5   :  { %1919 = vrot.lane.b32.xlu0 %v4659_v17, %s4609_s26 }
 0x4b8   :  { %2067 = vrot.lane.b32.xlu1 %v4732_v54, %s4610_s27 }
 0x4b9   :  { %1917 = vrot.lane.b32.xlu0 %v4708_v39, %s4610_s27 }
 0x4bc   :  { %2169 = vrot.lane.b32.xlu1 %v4686_v27, %s4609_s26 }
 0x4bd   :  { %2019 = vrot.lane.b32.xlu0 %v4661_v18, %s4609_s26 }
 0x4c0   :  { %2167 = vrot.lane.b32.xlu1 %v4750_v0, %s4610_s27 }
 0x4c1   :  { %2017 = vrot.lane.b32.xlu0 %v4723_v49, %s4610_s27 }
 0x4c4   :  { %2269 = vrot.lane.b32.xlu1 %v4693_v30, %s4609_s26 }
 0x4c5   :  { %2119 = vrot.lane.b32.xlu0 %v4684_v26, %s4609_s26 }
 0x4c8   :  { %2267 = vrot.lane.b32.xlu1 %v4766_v7, %s4610_s27 }
 0x4c9   :  { %2117 = vrot.lane.b32.xlu0 %v4741_v59, %s4610_s27 }
 0x4cc   :  { %2413 = vrot.lane.b32.xlu1 %v4659_v17, %s4611_s28 }
 0x4cd   :  { %2219 = vrot.lane.b32.xlu0 %v4691_v29, %s4609_s26 }
 0x4d0   :  { %2509 = vrot.lane.b32.xlu1 %v4661_v18, %s4611_s28 }
 0x4d1   :  { %2217 = vrot.lane.b32.xlu0 %v4759_v5, %s4610_s27 }
 0x4d4   :  { %2557 = vrot.lane.b32.xlu1 %v4668_v21, %s4611_s28 }
 0x4d5   :  { %2461 = vrot.lane.b32.xlu0 %v4665_v20, %s4611_s28 }
 0x4e3   :  { %v1487_v32 = vpop.xlane.xlu1 %1486 }
 0x4e4   :  { %4521 = vrcp.f32 %v1487_v32 }
 0x4e7   :  { %v1490_v4 = vpop.xlane.xlu0 %1489 }
 0x4e8   :  { %4523 = vrcp.f32 %v1490_v4 }
 0x4eb   :  { %v1493_v12 = vpop.xlane.xlu1 %1492 }
 0x4ec   :  { %4525 = vrcp.f32 %v1493_v12 }
 0x4ee   :  { %v4522_v19 = vpop.eup %4521 }
 0x4ef   :  { %v1496_v28 = vpop.xlane.xlu0 %1495  ;;  %v1517_v35 = vmul.f32 %v4522_v19, %v4983_v37 }
 0x4f0   :  { %4527 = vrcp.f32 %v1496_v28 }
 0x4f1   :  { %v1525_v38 = vpack.c.bf16 %v1517_v35, %v1517_v35 }
 0x4f2   :  { %v4524_v41 = vpop.eup %4523 }
 0x4f3   :  { %4159 = vmatmul.mubr.msk.bf16.vlgmr.msra.gmra.mrb[48].mxu0 %vm645_vm4, %v1525_v38  ;;  %v1499_v10 = vpop.xlane.xlu1 %1498  ;;  %v1518_v16 = vmul.f32 %v4524_v41, %v4987_v45 }
 0x4f4   :  { %4169 = vmatpush3.bf16.msra.mxu0 %v1635_v42  ;;  %4529 = vrcp.f32 %v1499_v10  ;;  %4170 = vmatprep.mubr.msk.bf16.mxu0 %vm4603_vm0, %v4602_v3 }
 0x4f5   :  { %v1526_v46 = vpack.c.bf16 %v1518_v16, %v1518_v16  ;;  %4180 = vmatprep.subr.bf16.mxu0 %v4602_v3 }
 0x4f6   :  { %v4526_v37 = vpop.eup %4525 }
 0x4f7   :  { %4165 = vmatmul.mubr.msk.bf16.vlgmr.msra.gmra.mrb[48].mxu1 %vm645_vm4, %v1526_v46  ;;  %v1502_v13 = vpop.xlane.xlu0 %1501  ;;  %v1519_v48 = vmul.f32 %v4526_v37, %v4991_v34  ;;  %v1870_v11 = vpop.permute.xlu1 %1869 }
 0x4f8   :  { %4175 = vmatpush3.bf16.msra.mxu1 %v1683_v25  ;;  %4531 = vrcp.f32 %v1502_v13  ;;  %4176 = vmatprep.mubr.msk.bf16.mxu1 %vm4603_vm0, %v4602_v3  ;;  %v1875_v15 = vsel %vm649_vm2, %v1870_v11, 0 }
 0x4f9   :  { %v1527_v45 = vpack.c.bf16 %v1519_v48, %v1519_v48  ;;  %4186 = vmatprep.subr.bf16.mxu1 %v4602_v3 }
 0x4fa   :  { %v4528_v51 = vpop.eup %4527 }
 0x4fb   :  { %4171 = vmatmul.mubr.msk.bf16.vlgmr.msra.gmra.mrb[52].mxu0 %vm645_vm4, %v1527_v45  ;;  %v1520_v14 = vmul.f32 %v4528_v51, %v4995_v40  ;;  %v1822_v1 = vpop.permute.xlu0 %1821 }
 0x4fc   :  { %4181 = vmatpush3.bf16.msra.mxu0 %v1731_v52  ;;  %4182 = vmatprep.mubr.msk.bf16.mxu0 %vm4603_vm0, %v4602_v3  ;;  %v1827_v9 = vsel %vm649_vm2, %v1822_v1, 0 }
 0x4fd   :  { %v1528_v34 = vpack.c.bf16 %v1520_v14, %v1520_v14  ;;  %4192 = vmatprep.subr.bf16.mxu0 %v4602_v3 }
 0x4fe   :  { %v4530_v55 = vpop.eup %4529 }
 0x4ff   :  { %v1521_v63 = vmul.f32 %v4530_v55, %v4999_v53  ;;  %4177 = vmatmul.mubr.msk.bf16.vlgmr.msra.gmra.mrb[52].mxu1 %vm645_vm4, %v1528_v34 }
 0x500   :  { %4187 = vmatpush3.bf16.msra.mxu1 %v1779_v47  ;;  %4188 = vmatprep.mubr.msk.bf16.mxu1 %vm4603_vm0, %v4602_v3 }
 0x501   :  { %v1529_v40 = vpack.c.bf16 %v1521_v63, %v1521_v63  ;;  %4198 = vmatprep.subr.bf16.mxu1 %v4602_v3 }
 0x502   :  { %v4532_v58 = vpop.eup %4531 }
 0x503   :  { %v1522_v8 = vmul.f32 %v4532_v58, %v5003_v60  ;;  %4183 = vmatmul.mubr.msk.bf16.vlgmr.msra.gmra.mrb[56].mxu0 %vm645_vm4, %v1529_v40 }
 0x504   :  { %4193 = vmatpush3.bf16.msra.mxu0 %v1827_v9  ;;  %4194 = vmatprep.mubr.msk.bf16.mxu0 %vm4603_vm0, %v4602_v3 }
 0x505   :  { %v1530_v53 = vpack.c.bf16 %v1522_v8, %v1522_v8  ;;  %4204 = vmatprep.subr.bf16.mxu0 %v4602_v3 }
 0x507   :  { %4189 = vmatmul.mubr.msk.bf16.vlgmr.msra.gmra.mrb[56].mxu1 %vm645_vm4, %v1530_v53 }
 0x508   :  { %4199 = vmatpush3.bf16.msra.mxu1 %v1875_v15  ;;  %4200 = vmatprep.mubr.msk.bf16.mxu1 %vm4603_vm0, %v4602_v3 }
 0x509   :  { %4210 = vmatprep.subr.bf16.mxu1 %v4602_v3 }
 0x528   :  { %v1505_v60 = vpop.xlane.xlu1 %1504 }
 0x529   :  { %4533 = vrcp.f32 %v1505_v60 }
 0x52c   :  { %v1508_v23 = vpop.xlane.xlu0 %1507  ;;  %v1970_v24 = vpop.permute.xlu1 %1969 }
 0x52d   :  { %4535 = vrcp.f32 %v1508_v23  ;;  %v1975_v10 = vsel %vm58_vm1, %v1970_v24, 0 }
 0x530   :  { %v1920_v61 = vpop.permute.xlu0 %1919  ;;  %v1968_v56 = vpop.permute.xlu1 %1967 }
 0x531   :  { %v1925_v19 = vsel %vm58_vm1, %v1920_v61, 0 }
 0x533   :  { %v4534_v32 = vpop.eup %4533 }
 0x534   :  { %v1523_v4 = vmul.f32 %v4534_v32, %v5012_v22  ;;  %v1918_v12 = vpop.permute.xlu0 %1917  ;;  %v2070_v38 = vpop.permute.xlu1 %2069 }
 0x535   :  { %v2075_v25 = vsel %vm58_vm1, %v2070_v38, 0 }
 0x536   :  { %v1531_v28 = vpack.c.bf16 %v1523_v4, %v1523_v4 }
 0x537   :  { %v4536_v35 = vpop.eup %4535 }
 0x538   :  { %v1524_v41 = vmul.f32 %v4536_v35, %v5016_v2  ;;  %4195 = vmatmul.mubr.msk.bf16.vlgmr.msra.gmra.mrb[60].mxu0 %vm645_vm4, %v1531_v28  ;;  %v2020_v42 = vpop.permute.xlu0 %2019  ;;  %v2068_v2 = vpop.permute.xlu1 %2067 }
 0x539   :  { %4205 = vmatpush3.bf16.xpose.msra.mxu0 %v1925_v19  ;;  %4206 = vmatprep.mubr.msk.bf16.mxu0 %vm4603_vm0, %v4602_v3  ;;  %v2025_v46 = vsel %vm58_vm1, %v2020_v42, 0 }
 0x53a   :  { %v1532_v16 = vpack.c.bf16 %v1524_v41, %v1524_v41  ;;  %4216 = vmatprep.subr.bf16.mxu0 %v4602_v3 }
 0x53c   :  { %4201 = vmatmul.mubr.msk.bf16.vlgmr.msra.gmra.mrb[60].mxu1 %vm645_vm4, %v1532_v16  ;;  %v2018_v22 = vpop.permute.xlu0 %2017  ;;  %v2170_v13 = vpop.permute.xlu1 %2169 }
 0x53d   :  { %4211 = vmatpush3.bf16.xpose.msra.mxu1 %v1975_v10  ;;  %4212 = vmatprep.mubr.msk.bf16.mxu1 %vm4603_vm0, %v4602_v3  ;;  %v2175_v52 = vsel %vm58_vm1, %v2170_v13, 0 }
 0x53e   :  { %4222 = vmatprep.subr.bf16.mxu1 %v4602_v3 }
 0x540   :  { %4207 = vmatmul.mubr.msk.bf16.vlgmr.msra.gmra.mrb[64].mxu0 %vm58_vm1, %v1918_v12  ;;  %v2120_v37 = vpop.permute.xlu0 %2119  ;;  %v2168_v51 = vpop.permute.xlu1 %2167 }
 0x541   :  { %4217 = vmatpush3.bf16.xpose.msra.mxu0 %v2025_v46  ;;  %4218 = vmatprep.mubr.msk.bf16.mxu0 %vm4603_vm0, %v4602_v3  ;;  %v2125_v45 = vsel %vm58_vm1, %v2120_v37, 0 }
 0x542   :  { %4228 = vmatprep.subr.bf16.mxu0 %v4602_v3 }
 0x544   :  { %4213 = vmatmul.mubr.msk.bf16.vlgmr.msra.gmra.mrb[64].mxu1 %vm58_vm1, %v1968_v56  ;;  %v2118_v48 = vpop.permute.xlu0 %2117  ;;  %v2270_v55 = vpop.permute.xlu1 %2269 }
 0x545   :  { %4223 = vmatpush3.bf16.xpose.msra.mxu1 %v2075_v25  ;;  %4224 = vmatprep.mubr.msk.bf16.mxu1 %vm4603_vm0, %v4602_v3  ;;  %v2275_v47 = vsel %vm58_vm1, %v2270_v55, 0 }
 0x546   :  { %4234 = vmatprep.subr.bf16.mxu1 %v4602_v3 }
 0x548   :  { %4219 = vmatmul.mubr.msk.bf16.vlgmr.msra.gmra.mrb[68].mxu0 %vm58_vm1, %v2018_v22  ;;  %v2220_v14 = vpop.permute.xlu0 %2219  ;;  %v2268_v1 = vpop.permute.xlu1 %2267 }
 0x549   :  { %4229 = vmatpush3.bf16.xpose.msra.mxu0 %v2125_v45  ;;  %4230 = vmatprep.mubr.msk.bf16.mxu0 %vm4603_vm0, %v4602_v3  ;;  %v2225_v34 = vsel %vm58_vm1, %v2220_v14, 0 }
 0x54a   :  { %4240 = vmatprep.subr.bf16.mxu0 %v4602_v3 }
 0x54c   :  { %4225 = vmatmul.mubr.msk.bf16.vlgmr.msra.gmra.mrb[68].mxu1 %vm58_vm1, %v2068_v2  ;;  %v2218_v63 = vpop.permute.xlu0 %2217  ;;  %v2414_v32 = vpop.permute.xlu1 %2413 }
 0x54d   :  { %4235 = vmatpush3.bf16.xpose.msra.mxu1 %v2175_v52  ;;  %4236 = vmatprep.mubr.msk.bf16.mxu1 %vm4603_vm0, %v4602_v3  ;;  %v2419_v12 = vsel %vm649_vm2, %v2414_v32, 0 }
 0x54e   :  { %4246 = vmatprep.subr.bf16.mxu1 %v4602_v3 }
 0x550   :  { %4231 = vmatmul.mubr.msk.bf16.vlgmr.msra.gmra.mrb[72].mxu0 %vm58_vm1, %v2118_v48  ;;  %v2462_v19 = vpop.permute.xlu0 %2461 }
 0x551   :  { %4241 = vmatpush3.bf16.xpose.msra.mxu0 %v2225_v34  ;;  %4242 = vmatprep.mubr.msk.bf16.mxu0 %vm4603_vm0, %v4602_v3  ;;  %v2467_v35 = vsel %vm649_vm2, %v2462_v19, 0 }
 0x552   :  { %4252 = vmatprep.subr.bf16.mxu0 %v4602_v3 }
 0x554   :  { %4237 = vmatmul.mubr.msk.bf16.vlgmr.msra.gmra.mrb[72].mxu1 %vm58_vm1, %v2168_v51 }
 0x555   :  { %4247 = vmatpush3.bf16.xpose.msra.mxu1 %v2275_v47  ;;  %4248 = vmatprep.mubr.msk.bf16.mxu1 %vm4603_vm0, %v4602_v3 }
 0x556   :  { %4258 = vmatprep.subr.bf16.mxu1 %v4602_v3 }
 0x558   :  { %4243 = vmatmul.mubr.msk.bf16.vlgmr.msra.gmra.mrb[76].mxu0 %vm58_vm1, %v2218_v63 }
 0x559   :  { %4254 = vmatprep.mubr.msk.bf16.mxu0 %vm4603_vm0, %v4602_v3  ;;  %4253 = vmatpush3.bf16.msra.mxu0 %v2419_v12 }
 0x55a   :  { %4264 = vmatprep.subr.bf16.mxu0 %v4602_v3 }
 0x55c   :  { %4249 = vmatmul.mubr.msk.bf16.vlgmr.msra.gmra.mrb[76].mxu1 %vm58_vm1, %v2268_v1 }
 0x55d   :  { %4260 = vmatprep.mubr.msk.bf16.mxu1 %vm4603_vm0, %v4602_v3  ;;  %4259 = vmatpush3.bf16.msra.mxu1 %v2467_v35 }
 0x55e   :  { %4270 = vmatprep.subr.bf16.mxu1 %v4602_v3 }
 0x5c6   :  { %v5130_v40 = vpop.f32.mrb[48].mxu0 }
 0x5c7   :  { %v4160_v58 = vpop.f32.mrb[49].mxu0 }
 0x5c8   :  { %v1578_v8 = vpop.f32.mrb[50].mxu0 }
 0x5c9   :  { %v4161_v9 = vpop.f32.mrb[51].mxu0 }
 0x5ca   :  { %v5132_v11 = vpop.f32.mrb[48].mxu1 }
 0x5cb   :  { %v4413_v53 = vpack.i.bf16 %v5132_v11, %v5130_v40  ;;  %v4166_v15 = vpop.f32.mrb[49].mxu1 }
 0x5cc   :  { %v1626_v60 = vpop.f32.mrb[50].mxu1 }
 0x5cd   :  { %v4167_v23 = vpop.f32.mrb[51].mxu1 }
 0x5ce   :  { %v5136_v24 = vpop.f32.mrb[52].mxu0 }
 0x5cf   :  { %v4172_v61 = vpop.f32.mrb[53].mxu0 }
 0x5d0   :  { %v1674_v56 = vpop.f32.mrb[54].mxu0 }
 0x5d1   :  { %v4173_v4 = vpop.f32.mrb[55].mxu0 }
 0x5d2   :  { %v5139_v28 = vpop.f32.mrb[52].mxu1 }
 0x5d3   :  { %v4418_v38 = vpack.i.bf16 %v5139_v28, %v5136_v24  ;;  %v4178_v41 = vpop.f32.mrb[53].mxu1 }
 0x5d4   :  { %v1722_v42 = vpop.f32.mrb[54].mxu1 }
 0x5d5   :  { %v4179_v10 = vpop.f32.mrb[55].mxu1 }
 0x5d6   :  { %v5146_v16 = vpop.f32.mrb[56].mxu0 }
 0x5d7   :  { %v4184_v22 = vpop.f32.mrb[57].mxu0 }
 0x5d8   :  { %v1770_v2 = vpop.f32.mrb[58].mxu0 }
 0x5d9   :  { %v4185_v46 = vpop.f32.mrb[59].mxu0 }
 0x5da   :  { %v5148_v37 = vpop.f32.mrb[56].mxu1 }
 0x5db   :  { %v4423_v25 = vpack.i.bf16 %v5148_v37, %v5146_v16  ;;  %v4190_v13 = vpop.f32.mrb[57].mxu1 }
 0x5dc   :  { %v1818_v48 = vpop.f32.mrb[58].mxu1 }
 0x5dd   :  { %v4191_v45 = vpop.f32.mrb[59].mxu1 }
 0x60b   :  { %v5152_v51 = vpop.f32.mrb[60].mxu0 }
 0x60c   :  { %v4196_v52 = vpop.f32.mrb[61].mxu0 }
 0x60d   :  { %v1866_v14 = vpop.f32.mrb[62].mxu0 }
 0x60e   :  { %v4197_v34 = vpop.f32.mrb[63].mxu0 }
 0x60f   :  { %v5154_v55 = vpop.f32.mrb[60].mxu1 }
 0x610   :  { %v4428_v47 = vpack.i.bf16 %v5154_v55, %v5152_v51  ;;  %v4202_v63 = vpop.f32.mrb[61].mxu1 }
 0x611   :  { %v1914_v1 = vpop.f32.mrb[62].mxu1 }
 0x612   :  { %v4203_v58 = vpop.f32.mrb[63].mxu1 }
 0x613   :  { %v1961_v8 = vpop.f32.mrb[64].mxu0 }
 0x614   :  { %v4208_v9 = vpop.f32.mrb[65].mxu0  ;;  %v2317_v15 = vsel %vm546_vm3, %v1961_v8, -inf }
 0x615   :  { %2318 = vmax.xlane.f32.xlu0 %v2317_v15  ;;  %v1964_v60 = vpop.f32.mrb[66].mxu0 }
 0x616   :  { %v4209_v23 = vpop.f32.mrb[67].mxu0 }
 0x617   :  { %v2011_v61 = vpop.f32.mrb[64].mxu1 }
 0x618   :  { %v4214_v56 = vpop.f32.mrb[65].mxu1  ;;  %v2320_v32 = vsel %vm546_vm3, %v2011_v61, -inf }
 0x619   :  { %2321 = vmax.xlane.f32.xlu1 %v2320_v32  ;;  %v2014_v4 = vpop.f32.mrb[66].mxu1 }
 0x61a   :  { %v4215_v12 = vpop.f32.mrb[67].mxu1 }
 0x61b   :  { %v2061_v19 = vpop.f32.mrb[68].mxu0 }
 0x61c   :  { %v4220_v35 = vpop.f32.mrb[69].mxu0  ;;  %v2323_v41 = vsel %vm546_vm3, %v2061_v19, -inf }
 0x61d   :  { %2324 = vmax.xlane.f32.xlu0 %v2323_v41  ;;  %v2064_v42 = vpop.f32.mrb[70].mxu0 }
 0x61e   :  { %v4221_v10 = vpop.f32.mrb[71].mxu0 }
 0x61f   :  { %v2111_v22 = vpop.f32.mrb[68].mxu1 }
 0x620   :  { %v4226_v2 = vpop.f32.mrb[69].mxu1  ;;  %v2326_v46 = vsel %vm546_vm3, %v2111_v22, -inf }
 0x621   :  { %v2114_v13 = vpop.f32.mrb[70].mxu1  ;;  %2327 = vmax.xlane.f32.xlu0 %v2326_v46  ;;  %v5173_v46 = vpop.permute.xlu1 %2509 }
 0x622   :  { %v4227_v48 = vpop.f32.mrb[71].mxu1 }
 0x623   :  { %v2161_v45 = vpop.f32.mrb[72].mxu0 }
 0x624   :  { %v4232_v52 = vpop.f32.mrb[73].mxu0  ;;  %v2329_v14 = vsel %vm546_vm3, %v2161_v45, -inf }
 0x625   :  { %2330 = vmax.xlane.f32.xlu1 %v2329_v14  ;;  %v2164_v34 = vpop.f32.mrb[74].mxu0  ;;  %v5175_v13 = vpop.permute.xlu1 %2557 }
 0x626   :  { %v4233_v63 = vpop.f32.mrb[75].mxu0 }
 0x627   :  { %v2211_v1 = vpop.f32.mrb[72].mxu1 }
 0x628   :  { %v4238_v58 = vpop.f32.mrb[73].mxu1  ;;  %v2332_v9 = vsel %vm546_vm3, %v2211_v1, -inf }
 0x629   :  { %v2214_v15 = vpop.f32.mrb[74].mxu1  ;;  %2333 = vmax.xlane.f32.xlu0 %v2332_v9 }
 0x62a   :  { %v4239_v60 = vpop.f32.mrb[75].mxu1 }
 0x62b   :  { %v5164_v23 = vpop.f32.mrb[76].mxu0 }
 0x62c   :  { %v2335_v56 = vsel %vm546_vm3, %v5164_v23, -inf  ;;  %v4244_v32 = vpop.f32.mrb[77].mxu0 }
 0x62d   :  { %2336 = vmax.xlane.f32.xlu1 %v2335_v56  ;;  %v2264_v4 = vpop.f32.mrb[78].mxu0 }
 0x62e   :  { %v4245_v12 = vpop.f32.mrb[79].mxu0 }
 0x62f   :  { %v2311_v35 = vpop.f32.mrb[76].mxu1 }
 0x630   :  { %v2338_v41 = vsel %vm546_vm3, %v2311_v35, -inf  ;;  %v4250_v42 = vpop.f32.mrb[77].mxu1 }
 0x631   :  { %2339 = vmax.xlane.f32.xlu0 %v2338_v41  ;;  %v2314_v10 = vpop.f32.mrb[78].mxu1 }
 0x632   :  { %v4251_v2 = vpop.f32.mrb[79].mxu1 }
 0x63e   :  { %2653 = vrot.lane.b32.xlu1 %v4686_v27, %s4611_s28 }
 0x647   :  { %2605 = vrot.lane.b32.xlu0 %v4684_v26, %s4611_s28 }
 0x6a2   :  { %v2319_v48 = vpop.xlane.xlu0 %2318 }
 0x6a3   :  { %v2341_v52 = vsub.f32 %v1961_v8, %v2319_v48 }
 0x6a5   :  { %v2349_v14 = vmul.f32 1.442695, %v2341_v52 }
 0x6a6   :  { %v2322_v34 = vpop.xlane.xlu1 %2321 }
 0x6a7   :  { %4537 = vpow2.f32 %v2349_v14  ;;  %v2342_v63 = vsub.f32 %v2011_v61, %v2322_v34 }
 0x6a9   :  { %v2351_v58 = vmul.f32 1.442695, %v2342_v63 }
 0x6aa   :  { %v2325_v9 = vpop.xlane.xlu0 %2324 }
 0x6ab   :  { %4539 = vpow2.f32 %v2351_v58  ;;  %v2343_v15 = vsub.f32 %v2061_v19, %v2325_v9 }
 0x6ad   :  { %v2353_v60 = vmul.f32 1.442695, %v2343_v15 }
 0x6ae   :  { %v2328_v56 = vpop.xlane.xlu0 %2327 }
 0x6af   :  { %4541 = vpow2.f32 %v2353_v60  ;;  %v2344_v32 = vsub.f32 %v2111_v22, %v2328_v56 }
 0x6b1   :  { %v5177_v4 = vpop.eup %4537  ;;  %v2355_v12 = vmul.f32 1.442695, %v2344_v32 }
 0x6b2   :  { %v2331_v41 = vpop.xlane.xlu1 %2330  ;;  %v2365_v42 = vsel %vm546_vm3, %v5177_v4, 0.0 }
 0x6b3   :  { %4543 = vpow2.f32 %v2355_v12  ;;  %v2345_v8 = vsub.f32 %v2161_v45, %v2331_v41  ;;  %2366 = vadd.xlane.f32.xlu1 %v2365_v42 }
 0x6b5   :  { %v5181_v10 = vpop.eup %4539  ;;  %v2357_v61 = vmul.f32 1.442695, %v2345_v8 }
 0x6b6   :  { %v2334_v2 = vpop.xlane.xlu0 %2333  ;;  %v2368_v19 = vsel %vm546_vm3, %v5181_v10, 0.0 }
 0x6b7   :  { %4545 = vpow2.f32 %v2357_v61  ;;  %v2346_v48 = vsub.f32 %v2211_v1, %v2334_v2  ;;  %2369 = vadd.xlane.f32.xlu0 %v2368_v19 }
 0x6b9   :  { %v5185_v22 = vpop.eup %4541  ;;  %v2359_v52 = vmul.f32 1.442695, %v2346_v48 }
 0x6ba   :  { %v2371_v14 = vsel %vm546_vm3, %v5185_v22, 0.0  ;;  %v2337_v15 = vpop.xlane.xlu1 %2336 }
 0x6bb   :  { %4547 = vpow2.f32 %v2359_v52  ;;  %2372 = vadd.xlane.f32.xlu1 %v2371_v14  ;;  %v2347_v60 = vsub.f32 %v5164_v23, %v2337_v15 }
 0x6bd   :  { %v5189_v45 = vpop.eup %4543  ;;  %v2361_v32 = vmul.f32 1.442695, %v2347_v60 }
 0x6be   :  { %v2374_v34 = vsel %vm546_vm3, %v5189_v45, 0.0  ;;  %v2340_v56 = vpop.xlane.xlu0 %2339 }
 0x6bf   :  { %2375 = vadd.xlane.f32.xlu0 %v2374_v34  ;;  %v2348_v12 = vsub.f32 %v2311_v35, %v2340_v56  ;;  %4549 = vpow2.f32 %v2361_v32  ;;  %v2563_v34 = vsel %vm649_vm2, %v5175_v13, 0 }
 0x6c1   :  { %v5193_v63 = vpop.eup %4545  ;;  %v2363_v41 = vmul.f32 1.442695, %v2348_v12 }
 0x6c2   :  { %v2377_v1 = vsel %vm546_vm3, %v5193_v63, 0.0 }
 0x6c3   :  { %2378 = vadd.xlane.f32.xlu1 %v2377_v1  ;;  %4551 = vpow2.f32 %v2363_v41 }
 0x6c5   :  { %v5197_v58 = vpop.eup %4547 }
 0x6c6   :  { %v2380_v9 = vsel %vm546_vm3, %v5197_v58, 0.0 }
 0x6c7   :  { %2381 = vadd.xlane.f32.xlu0 %v2380_v9 }
 0x6c9   :  { %v5206_v42 = vpop.eup %4549 }
 0x6ca   :  { %v2383_v8 = vsel %vm546_vm3, %v5206_v42, 0.0 }
 0x6cd   :  { %v5210_v61 = vpop.eup %4551 }
 0x6ce   :  { %v2386_v2 = vsel %vm546_vm3, %v5210_v61, 0.0 }
 0x6d4   :  { %2749 = vrot.lane.b32.xlu1 %v4693_v30, %s4611_s28 }
 0x6dd   :  { %2701 = vrot.lane.b32.xlu0 %v4691_v29, %s4611_s28 }
 0x6f8   :  { %2384 = vadd.xlane.f32.xlu1 %v2383_v8 }
 0x6fc   :  { %2387 = vadd.xlane.f32.xlu0 %v2386_v2 }
 0x709   :  { %2849 = vrot.lane.b32.xlu1 %v4665_v20, %s4612_s29 }
 0x70d   :  { %2847 = vrot.lane.b32.xlu1 %v4714_v44, %s4613_s30  ;;  %v2606_v44 = vpop.permute.xlu0 %2605 }
 0x70e   :  { %v2611_v15 = vsel %vm649_vm2, %v2606_v44, 0 }
 0x711   :  { %2949 = vrot.lane.b32.xlu1 %v4668_v21, %s4612_s29 }
 0x712   :  { %2799 = vrot.lane.b32.xlu0 %v4659_v17, %s4612_s29 }
 0x715   :  { %2947 = vrot.lane.b32.xlu1 %v4732_v54, %s4613_s30 }
 0x716   :  { %2797 = vrot.lane.b32.xlu0 %v4708_v39, %s4613_s30  ;;  %v2654_v39 = vpop.permute.xlu1 %2653 }
 0x717   :  { %v2659_v56 = vsel %vm649_vm2, %v2654_v39, 0 }
 0x719   :  { %3049 = vrot.lane.b32.xlu1 %v4686_v27, %s4612_s29 }
 0x71a   :  { %2899 = vrot.lane.b32.xlu0 %v4661_v18, %s4612_s29 }
 0x71d   :  { %3047 = vrot.lane.b32.xlu1 %v4750_v0, %s4613_s30 }
 0x71e   :  { %2897 = vrot.lane.b32.xlu0 %v4723_v49, %s4613_s30 }
 0x721   :  { %3149 = vrot.lane.b32.xlu1 %v4693_v30, %s4612_s29 }
 0x722   :  { %2999 = vrot.lane.b32.xlu0 %v4684_v26, %s4612_s29 }
 0x725   :  { %3147 = vrot.lane.b32.xlu1 %v4766_v7, %s4613_s30 }
 0x726   :  { %2997 = vrot.lane.b32.xlu0 %v4741_v59, %s4613_s30  ;;  %v2515_v59 = vsel %vm649_vm2, %v5173_v46, 0 }
 0x729   :  { %3293 = vrot.lane.b32.xlu1 %v4659_v17, %s4614_s2 }
 0x72a   :  { %3099 = vrot.lane.b32.xlu0 %v4691_v29, %s4612_s29 }
 0x72e   :  { %3097 = vrot.lane.b32.xlu0 %v4759_v5, %s4613_s30 }
 0x740   :  { %v2367_v54 = vpop.xlane.xlu1 %2366 }
 0x741   :  { %4553 = vrcp.f32 %v2367_v54 }
 0x744   :  { %v2370_v23 = vpop.xlane.xlu0 %2369 }
 0x745   :  { %4555 = vrcp.f32 %v2370_v23 }
 0x748   :  { %v2373_v0 = vpop.xlane.xlu1 %2372 }
 0x749   :  { %4557 = vrcp.f32 %v2373_v0 }
 0x74b   :  { %v4554_v49 = vpop.eup %4553 }
 0x74c   :  { %v2397_v35 = vmul.f32 %v4554_v49, %v5177_v4  ;;  %v2376_v19 = vpop.xlane.xlu0 %2375 }
 0x74d   :  { %4559 = vrcp.f32 %v2376_v19 }
 0x74e   :  { %v2405_v7 = vpack.c.bf16 %v2397_v35, %v2397_v35 }
 0x74f   :  { %v4556_v48 = vpop.eup %4555 }
 0x750   :  { %v2398_v5 = vmul.f32 %v4556_v48, %v5181_v10  ;;  %4255 = vmatmul.mubr.msk.bf16.vlgmr.msra.gmra.mrb[80].mxu0 %vm645_vm4, %v2405_v7  ;;  %v2379_v52 = vpop.xlane.xlu1 %2378 }
 0x751   :  { %4265 = vmatpush3.bf16.msra.mxu0 %v2515_v59  ;;  %4561 = vrcp.f32 %v2379_v52  ;;  %4266 = vmatprep.mubr.msk.bf16.mxu0 %vm4603_vm0, %v4602_v3 }
 0x752   :  { %v2406_v14 = vpack.c.bf16 %v2398_v5, %v2398_v5  ;;  %4276 = vmatprep.subr.bf16.mxu0 %v4602_v3 }
 0x753   :  { %v4558_v4 = vpop.eup %4557 }
 0x754   :  { %v2399_v1 = vmul.f32 %v4558_v4, %v5185_v22  ;;  %4261 = vmatmul.mubr.msk.bf16.vlgmr.msra.gmra.mrb[80].mxu1 %vm645_vm4, %v2406_v14  ;;  %v2382_v46 = vpop.xlane.xlu0 %2381  ;;  %v2750_v39 = vpop.permute.xlu1 %2749 }
 0x755   :  { %4271 = vmatpush3.bf16.msra.mxu1 %v2563_v34  ;;  %4563 = vrcp.f32 %v2382_v46  ;;  %4272 = vmatprep.mubr.msk.bf16.mxu1 %vm4603_vm0, %v4602_v3  ;;  %v2755_v44 = vsel %vm649_vm2, %v2750_v39, 0 }
 0x756   :  { %v2407_v10 = vpack.c.bf16 %v2399_v1, %v2399_v1  ;;  %4282 = vmatprep.subr.bf16.mxu1 %v4602_v3 }
 0x757   :  { %v4560_v9 = vpop.eup %4559 }
 0x758   :  { %v2400_v60 = vmul.f32 %v4560_v9, %v5189_v45  ;;  %4267 = vmatmul.mubr.msk.bf16.vlgmr.msra.gmra.mrb[84].mxu0 %vm645_vm4, %v2407_v10  ;;  %v2702_v12 = vpop.permute.xlu0 %2701 }
 0x759   :  { %4277 = vmatpush3.bf16.msra.mxu0 %v2611_v15  ;;  %4278 = vmatprep.mubr.msk.bf16.mxu0 %vm4603_vm0, %v4602_v3  ;;  %v2707_v2 = vsel %vm649_vm2, %v2702_v12, 0 }
 0x75a   :  { %v2408_v13 = vpack.c.bf16 %v2400_v60, %v2400_v60  ;;  %4288 = vmatprep.subr.bf16.mxu0 %v4602_v3 }
 0x75b   :  { %v4562_v22 = vpop.eup %4561 }
 0x75c   :  { %v2401_v32 = vmul.f32 %v4562_v22, %v5193_v63  ;;  %4273 = vmatmul.mubr.msk.bf16.vlgmr.msra.gmra.mrb[84].mxu1 %vm645_vm4, %v2408_v13 }
 0x75d   :  { %4283 = vmatpush3.bf16.msra.mxu1 %v2659_v56  ;;  %4284 = vmatprep.mubr.msk.bf16.mxu1 %vm4603_vm0, %v4602_v3 }
 0x75e   :  { %v2409_v45 = vpack.c.bf16 %v2401_v32, %v2401_v32  ;;  %4294 = vmatprep.subr.bf16.mxu1 %v4602_v3 }
 0x75f   :  { %v4564_v41 = vpop.eup %4563 }
 0x760   :  { %v2402_v8 = vmul.f32 %v4564_v41, %v5197_v58  ;;  %4279 = vmatmul.mubr.msk.bf16.vlgmr.msra.gmra.mrb[88].mxu0 %vm645_vm4, %v2409_v45 }
 0x761   :  { %4289 = vmatpush3.bf16.msra.mxu0 %v2707_v2  ;;  %4290 = vmatprep.mubr.msk.bf16.mxu0 %vm4603_vm0, %v4602_v3 }
 0x762   :  { %v2410_v63 = vpack.c.bf16 %v2402_v8, %v2402_v8  ;;  %4300 = vmatprep.subr.bf16.mxu0 %v4602_v3 }
 0x764   :  { %4285 = vmatmul.mubr.msk.bf16.vlgmr.msra.gmra.mrb[88].mxu1 %vm645_vm4, %v2410_v63 }
 0x765   :  { %4295 = vmatpush3.bf16.msra.mxu1 %v2755_v44  ;;  %4296 = vmatprep.mubr.msk.bf16.mxu1 %vm4603_vm0, %v4602_v3 }
 0x766   :  { %4306 = vmatprep.subr.bf16.mxu1 %v4602_v3 }
 0x785   :  { %v2385_v58 = vpop.xlane.xlu1 %2384 }
 0x786   :  { %4565 = vrcp.f32 %v2385_v58 }
 0x789   :  { %v2388_v54 = vpop.xlane.xlu0 %2387  ;;  %v2850_v23 = vpop.permute.xlu1 %2849 }
 0x78a   :  { %4567 = vrcp.f32 %v2388_v54  ;;  %v2855_v34 = vsel %vm58_vm1, %v2850_v23, 0 }
 0x78d   :  { %v2800_v0 = vpop.permute.xlu0 %2799  ;;  %v2848_v49 = vpop.permute.xlu1 %2847 }
 0x78e   :  { %v2805_v48 = vsel %vm58_vm1, %v2800_v0, 0 }
 0x790   :  { %v4566_v35 = vpop.eup %4565 }
 0x791   :  { %v2403_v19 = vmul.f32 %v4566_v35, %v5206_v42  ;;  %v2798_v7 = vpop.permute.xlu0 %2797  ;;  %v2950_v52 = vpop.permute.xlu1 %2949 }
 0x792   :  { %v2955_v9 = vsel %vm58_vm1, %v2950_v52, 0 }
 0x793   :  { %v2411_v59 = vpack.c.bf16 %v2403_v19, %v2403_v19 }
 0x794   :  { %v4568_v5 = vpop.eup %4567 }
 0x795   :  { %v2404_v14 = vmul.f32 %v4568_v5, %v5210_v61  ;;  %4291 = vmatmul.mubr.msk.bf16.vlgmr.msra.gmra.mrb[92].mxu0 %vm645_vm4, %v2411_v59  ;;  %v2900_v4 = vpop.permute.xlu0 %2899  ;;  %v2948_v61 = vpop.permute.xlu1 %2947 }
 0x796   :  { %4301 = vmatpush3.bf16.xpose.msra.mxu0 %v2805_v48  ;;  %4302 = vmatprep.mubr.msk.bf16.mxu0 %vm4603_vm0, %v4602_v3  ;;  %v2905_v46 = vsel %vm58_vm1, %v2900_v4, 0 }
 0x797   :  { %v2412_v1 = vpack.c.bf16 %v2404_v14, %v2404_v14  ;;  %4312 = vmatprep.subr.bf16.mxu0 %v4602_v3 }
 0x799   :  { %4297 = vmatmul.mubr.msk.bf16.vlgmr.msra.gmra.mrb[92].mxu1 %vm645_vm4, %v2412_v1  ;;  %v2898_v42 = vpop.permute.xlu0 %2897  ;;  %v3050_v15 = vpop.permute.xlu1 %3049 }
 0x79a   :  { %4307 = vmatpush3.bf16.xpose.msra.mxu1 %v2855_v34  ;;  %4308 = vmatprep.mubr.msk.bf16.mxu1 %vm4603_vm0, %v4602_v3  ;;  %v3055_v56 = vsel %vm58_vm1, %v3050_v15, 0 }
 0x79b   :  { %4318 = vmatprep.subr.bf16.mxu1 %v4602_v3 }
 0x79d   :  { %4303 = vmatmul.mubr.msk.bf16.vlgmr.msra.gmra.mrb[96].mxu0 %vm58_vm1, %v2798_v7  ;;  %v3000_v10 = vpop.permute.xlu0 %2999  ;;  %v3048_v22 = vpop.permute.xlu1 %3047 }
 0x79e   :  { %4313 = vmatpush3.bf16.xpose.msra.mxu0 %v2905_v46  ;;  %4314 = vmatprep.mubr.msk.bf16.mxu0 %vm4603_vm0, %v4602_v3  ;;  %v3005_v13 = vsel %vm58_vm1, %v3000_v10, 0 }
 0x79f   :  { %4324 = vmatprep.subr.bf16.mxu0 %v4602_v3 }
 0x7a1   :  { %4309 = vmatmul.mubr.msk.bf16.vlgmr.msra.gmra.mrb[96].mxu1 %vm58_vm1, %v2848_v49  ;;  %v2998_v60 = vpop.permute.xlu0 %2997  ;;  %v3150_v45 = vpop.permute.xlu1 %3149 }
 0x7a2   :  { %4319 = vmatpush3.bf16.xpose.msra.mxu1 %v2955_v9  ;;  %4320 = vmatprep.mubr.msk.bf16.mxu1 %vm4603_vm0, %v4602_v3  ;;  %v3155_v41 = vsel %vm58_vm1, %v3150_v45, 0 }
 0x7a3   :  { %4330 = vmatprep.subr.bf16.mxu1 %v4602_v3 }
 0x7a5   :  { %4315 = vmatmul.mubr.msk.bf16.vlgmr.msra.gmra.mrb[100].mxu0 %vm58_vm1, %v2898_v42  ;;  %v3100_v32 = vpop.permute.xlu0 %3099  ;;  %v3148_v2 = vpop.permute.xlu1 %3147 }
 0x7a6   :  { %4325 = vmatpush3.bf16.xpose.msra.mxu0 %v3005_v13  ;;  %4326 = vmatprep.mubr.msk.bf16.mxu0 %vm4603_vm0, %v4602_v3  ;;  %v3105_v12 = vsel %vm58_vm1, %v3100_v32, 0 }
 0x7a7   :  { %4336 = vmatprep.subr.bf16.mxu0 %v4602_v3 }
 0x7a9   :  { %4321 = vmatmul.mubr.msk.bf16.vlgmr.msra.gmra.mrb[100].mxu1 %vm58_vm1, %v2948_v61  ;;  %v3098_v8 = vpop.permute.xlu0 %3097  ;;  %v3294_v59 = vpop.permute.xlu1 %3293 }
 0x7aa   :  { %4331 = vmatpush3.bf16.xpose.msra.mxu1 %v3055_v56  ;;  %4332 = vmatprep.mubr.msk.bf16.mxu1 %vm4603_vm0, %v4602_v3  ;;  %v3299_v17 = vsel %vm649_vm2, %v3294_v59, 0 }
 0x7ab   :  { %4342 = vmatprep.subr.bf16.mxu1 %v4602_v3 }
 0x7ad   :  { %4327 = vmatmul.mubr.msk.bf16.vlgmr.msra.gmra.mrb[104].mxu0 %vm58_vm1, %v2998_v60 }
 0x7ae   :  { %4337 = vmatpush3.bf16.xpose.msra.mxu0 %v3105_v12  ;;  %4338 = vmatprep.mubr.msk.bf16.mxu0 %vm4603_vm0, %v4602_v3 }
 0x7af   :  { %4348 = vmatprep.subr.bf16.mxu0 %v4602_v3 }
 0x7b1   :  { %4333 = vmatmul.mubr.msk.bf16.vlgmr.msra.gmra.mrb[104].mxu1 %vm58_vm1, %v3048_v22 }
 0x7b2   :  { %4343 = vmatpush3.bf16.xpose.msra.mxu1 %v3155_v41  ;;  %4344 = vmatprep.mubr.msk.bf16.mxu1 %vm4603_vm0, %v4602_v3 }
 0x7b3   :  { %4354 = vmatprep.subr.bf16.mxu1 %v4602_v3 }
 0x7b5   :  { %4339 = vmatmul.mubr.msk.bf16.vlgmr.msra.gmra.mrb[108].mxu0 %vm58_vm1, %v3098_v8 }
 0x7b6   :  { %4350 = vmatprep.mubr.msk.bf16.mxu0 %vm4603_vm0, %v4602_v3  ;;  %4349 = vmatpush3.bf16.msra.mxu0 %v3299_v17 }
 0x7b7   :  { %4360 = vmatprep.subr.bf16.mxu0 %v4602_v3 }
 0x7b9   :  { %4345 = vmatmul.mubr.msk.bf16.vlgmr.msra.gmra.mrb[108].mxu1 %vm58_vm1, %v3148_v2 }
 0x7ba   :  { %4356 = vmatprep.mubr.msk.bf16.mxu1 %vm4603_vm0, %v4602_v3 }
 0x823   :  { %v5318_v39 = vpop.f32.mrb[80].mxu0 }
 0x824   :  { %v4256_v63 = vpop.f32.mrb[81].mxu0 }
 0x825   :  { %v2458_v44 = vpop.f32.mrb[82].mxu0 }
 0x826   :  { %v4257_v58 = vpop.f32.mrb[83].mxu0 }
 0x827   :  { %v5320_v54 = vpop.f32.mrb[80].mxu1 }
 0x828   :  { %v4433_v23 = vpack.i.bf16 %v5320_v54, %v5318_v39  ;;  %v4262_v0 = vpop.f32.mrb[81].mxu1 }
 0x829   :  { %v2506_v49 = vpop.f32.mrb[82].mxu1 }
 0x82a   :  { %v4263_v35 = vpop.f32.mrb[83].mxu1 }
 0x82b   :  { %v5324_v19 = vpop.f32.mrb[84].mxu0 }
 0x82c   :  { %v4268_v7 = vpop.f32.mrb[85].mxu0 }
 0x82d   :  { %v2554_v48 = vpop.f32.mrb[86].mxu0 }
 0x82e   :  { %v4269_v5 = vpop.f32.mrb[87].mxu0 }
 0x82f   :  { %v5327_v52 = vpop.f32.mrb[84].mxu1 }
 0x830   :  { %v4438_v14 = vpack.i.bf16 %v5327_v52, %v5324_v19  ;;  %v4274_v4 = vpop.f32.mrb[85].mxu1 }
 0x831   :  { %v2602_v34 = vpop.f32.mrb[86].mxu1 }
 0x832   :  { %v4275_v1 = vpop.f32.mrb[87].mxu1 }
 0x833   :  { %v5332_v42 = vpop.f32.mrb[88].mxu0 }
 0x834   :  { %v4280_v61 = vpop.f32.mrb[89].mxu0 }
 0x835   :  { %v2650_v46 = vpop.f32.mrb[90].mxu0 }
 0x836   :  { %v4281_v10 = vpop.f32.mrb[91].mxu0 }
 0x837   :  { %v5334_v9 = vpop.f32.mrb[88].mxu1 }
 0x838   :  { %v4443_v15 = vpack.i.bf16 %v5334_v9, %v5332_v42  ;;  %v4286_v60 = vpop.f32.mrb[89].mxu1 }
 0x839   :  { %v2698_v13 = vpop.f32.mrb[90].mxu1 }
 0x83a   :  { %v4287_v22 = vpop.f32.mrb[91].mxu1 }
 0x868   :  { %v5338_v56 = vpop.f32.mrb[92].mxu0 }
 0x869   :  { %v4292_v32 = vpop.f32.mrb[93].mxu0 }
 0x86a   :  { %v2746_v12 = vpop.f32.mrb[94].mxu0 }
 0x86b   :  { %v4293_v45 = vpop.f32.mrb[95].mxu0 }
 0x86c   :  { %v5340_v41 = vpop.f32.mrb[92].mxu1 }
 0x86d   :  { %v4448_v8 = vpack.i.bf16 %v5340_v41, %v5338_v56  ;;  %v4298_v2 = vpop.f32.mrb[93].mxu1 }
 0x86e   :  { %v2794_v63 = vpop.f32.mrb[94].mxu1 }
 0x86f   :  { %v4299_v44 = vpop.f32.mrb[95].mxu1 }
 0x870   :  { %v2841_v58 = vpop.f32.mrb[96].mxu0 }
 0x871   :  { %v4304_v0 = vpop.f32.mrb[97].mxu0  ;;  %v3197_v49 = vsel %vm546_vm3, %v2841_v58, -inf }
 0x872   :  { %3198 = vmax.xlane.f32.xlu0 %v3197_v49  ;;  %v2844_v35 = vpop.f32.mrb[98].mxu0 }
 0x873   :  { %v4305_v7 = vpop.f32.mrb[99].mxu0 }
 0x874   :  { %v2891_v48 = vpop.f32.mrb[96].mxu1 }
 0x875   :  { %v4310_v59 = vpop.f32.mrb[97].mxu1  ;;  %v3200_v5 = vsel %vm546_vm3, %v2891_v48, -inf }
 0x876   :  { %3201 = vmax.xlane.f32.xlu1 %v3200_v5  ;;  %v2894_v17 = vpop.f32.mrb[98].mxu1 }
 0x877   :  { %v4311_v4 = vpop.f32.mrb[99].mxu1 }
 0x878   :  { %v2941_v34 = vpop.f32.mrb[100].mxu0 }
 0x879   :  { %v4316_v1 = vpop.f32.mrb[101].mxu0  ;;  %v3203_v61 = vsel %vm546_vm3, %v2941_v34, -inf }
 0x87a   :  { %3204 = vmax.xlane.f32.xlu0 %v3203_v61  ;;  %v2944_v46 = vpop.f32.mrb[102].mxu0 }
 0x87b   :  { %v4317_v10 = vpop.f32.mrb[103].mxu0 }
 0x87c   :  { %v2991_v60 = vpop.f32.mrb[100].mxu1 }
 0x87d   :  { %v4322_v13 = vpop.f32.mrb[101].mxu1  ;;  %v3206_v22 = vsel %vm546_vm3, %v2991_v60, -inf }
 0x87e   :  { %v2994_v32 = vpop.f32.mrb[102].mxu1  ;;  %3207 = vmax.xlane.f32.xlu0 %v3206_v22 }
 0x87f   :  { %v4323_v12 = vpop.f32.mrb[103].mxu1 }
 0x880   :  { %v5348_v45 = vpop.f32.mrb[104].mxu0 }
 0x881   :  { %v3209_v2 = vsel %vm546_vm3, %v5348_v45, -inf  ;;  %v4328_v63 = vpop.f32.mrb[105].mxu0 }
 0x882   :  { %3210 = vmax.xlane.f32.xlu1 %v3209_v2  ;;  %v3044_v44 = vpop.f32.mrb[106].mxu0 }
 0x883   :  { %v4329_v0 = vpop.f32.mrb[107].mxu0 }
 0x884   :  { %v5352_v49 = vpop.f32.mrb[104].mxu1 }
 0x885   :  { %v3212_v35 = vsel %vm546_vm3, %v5352_v49, -inf  ;;  %v4334_v7 = vpop.f32.mrb[105].mxu1 }
 0x886   :  { %3213 = vmax.xlane.f32.xlu0 %v3212_v35  ;;  %v3094_v59 = vpop.f32.mrb[106].mxu1 }
 0x887   :  { %v4335_v5 = vpop.f32.mrb[107].mxu1 }
 0x888   :  { %v3141_v17 = vpop.f32.mrb[108].mxu0 }
 0x889   :  { %v3215_v4 = vsel %vm546_vm3, %v3141_v17, -inf  ;;  %v4340_v1 = vpop.f32.mrb[109].mxu0 }
 0x88a   :  { %3216 = vmax.xlane.f32.xlu1 %v3215_v4  ;;  %v3144_v61 = vpop.f32.mrb[110].mxu0 }
 0x88b   :  { %v4341_v46 = vpop.f32.mrb[111].mxu0 }
 0x88c   :  { %v3191_v10 = vpop.f32.mrb[108].mxu1 }
 0x88d   :  { %v3218_v13 = vsel %vm546_vm3, %v3191_v10, -inf  ;;  %v4346_v22 = vpop.f32.mrb[109].mxu1 }
 0x88e   :  { %3219 = vmax.xlane.f32.xlu0 %v3218_v13  ;;  %v3194_v32 = vpop.f32.mrb[110].mxu1 }
 0x88f   :  { %v4347_v12 = vpop.f32.mrb[111].mxu1 }
 0x89b   :  { %3389 = vrot.lane.b32.xlu1 %v4661_v18, %s4614_s2 }
 0x89f   :  { %3437 = vrot.lane.b32.xlu1 %v4668_v21, %s4614_s2 }
 0x8a4   :  { %3341 = vrot.lane.b32.xlu0 %v4665_v20, %s4614_s2 }
 0x8ff   :  { %v3199_v2 = vpop.xlane.xlu0 %3198 }
 0x900   :  { %v3221_v63 = vsub.f32 %v2841_v58, %v3199_v2 }
 0x902   :  { %v3229_v44 = vmul.f32 1.442695, %v3221_v63 }
 0x903   :  { %v3202_v0 = vpop.xlane.xlu1 %3201 }
 0x904   :  { %4569 = vpow2.f32 %v3229_v44  ;;  %v3222_v35 = vsub.f32 %v2891_v48, %v3202_v0 }
 0x906   :  { %v3231_v7 = vmul.f32 1.442695, %v3222_v35 }
 0x907   :  { %v3205_v59 = vpop.xlane.xlu0 %3204 }
 0x908   :  { %4571 = vpow2.f32 %v3231_v7  ;;  %v3223_v5 = vsub.f32 %v2941_v34, %v3205_v59 }
 0x90a   :  { %v3233_v4 = vmul.f32 1.442695, %v3223_v5 }
 0x90b   :  { %v3208_v1 = vpop.xlane.xlu0 %3207 }
 0x90c   :  { %4573 = vpow2.f32 %v3233_v4  ;;  %v3224_v18 = vsub.f32 %v2991_v60, %v3208_v1 }
 0x90e   :  { %v5364_v61 = vpop.eup %4569  ;;  %v3235_v21 = vmul.f32 1.442695, %v3224_v18 }
 0x90f   :  { %v3245_v20 = vsel %vm546_vm3, %v5364_v61, 0.0  ;;  %v3211_v63 = vpop.xlane.xlu1 %3210 }
 0x910   :  { %4575 = vpow2.f32 %v3235_v21  ;;  %3246 = vadd.xlane.f32.xlu1 %v3245_v20  ;;  %v3225_v44 = vsub.f32 %v5348_v45, %v3211_v63 }
 0x912   :  { %v5368_v58 = vpop.eup %4571  ;;  %v3237_v7 = vmul.f32 1.442695, %v3225_v44 }
 0x913   :  { %v3248_v48 = vsel %vm546_vm3, %v5368_v58, 0.0  ;;  %v3214_v34 = vpop.xlane.xlu0 %3213 }
 0x914   :  { %3249 = vadd.xlane.f32.xlu0 %v3248_v48  ;;  %v3226_v35 = vsub.f32 %v5352_v49, %v3214_v34  ;;  %4577 = vpow2.f32 %v3237_v7 }
 0x916   :  { %v5372_v46 = vpop.eup %4573  ;;  %v3239_v5 = vmul.f32 1.442695, %v3226_v35 }
 0x917   :  { %v3251_v60 = vsel %vm546_vm3, %v5372_v46, 0.0  ;;  %v3217_v0 = vpop.xlane.xlu1 %3216 }
 0x918   :  { %3252 = vadd.xlane.f32.xlu1 %v3251_v60  ;;  %v3227_v59 = vsub.f32 %v3141_v17, %v3217_v0  ;;  %4579 = vpow2.f32 %v3239_v5 }
 0x91a   :  { %v5376_v13 = vpop.eup %4575  ;;  %v3241_v4 = vmul.f32 1.442695, %v3227_v59 }
 0x91b   :  { %v3220_v22 = vpop.xlane.xlu0 %3219  ;;  %v3254_v32 = vsel %vm546_vm3, %v5376_v13, 0.0 }
 0x91c   :  { %3255 = vadd.xlane.f32.xlu0 %v3254_v32  ;;  %v3228_v1 = vsub.f32 %v3191_v10, %v3220_v22  ;;  %4581 = vpow2.f32 %v3241_v4 }
 0x91e   :  { %v3243_v18 = vmul.f32 1.442695, %v3228_v1 }
 0x91f   :  { %v3342_v12 = vpop.permute.xlu0 %3341 }
 0x920   :  { %v3347_v2 = vsel %vm649_vm2, %v3342_v12, 0  ;;  %4583 = vpow2.f32 %v3243_v18 }
 0x921   :  { %4355 = vmatpush3.bf16.msra.mxu1 %v3347_v2 }
 0x922   :  { %4366 = vmatprep.subr.bf16.mxu1 %v4602_v3 }
 0x929   :  { %3533 = vrot.lane.b32.xlu1 %v4686_v27, %s4614_s2  ;;  %v5388_v27 = vpop.eup %4577 }
 0x92a   :  { %v5390_v21 = vpop.eup %4579 }
 0x92b   :  { %v5394_v45 = vpop.eup %4581  ;;  %v3260_v49 = vsel %vm546_vm3, %v5390_v21, 0.0 }
 0x92c   :  { %v3263_v17 = vsel %vm546_vm3, %v5394_v45, 0.0  ;;  %v5400_v10 = vpop.eup %4583 }
 0x92d   :  { %v3266_v20 = vsel %vm546_vm3, %v5400_v10, 0.0 }
 0x932   :  { %3485 = vrot.lane.b32.xlu0 %v4684_v26, %s4614_s2  ;;  %v3257_v26 = vsel %vm546_vm3, %v5388_v27, 0.0 }
 0x94d   :  { %3258 = vadd.xlane.f32.xlu1 %v3257_v26 }
 0x951   :  { %3261 = vadd.xlane.f32.xlu0 %v3260_v49  ;;  %3264 = vadd.xlane.f32.xlu1 %v3263_v17 }
 0x955   :  { %3267 = vadd.xlane.f32.xlu0 %v3266_v20 }
 0x962   :  { %3629 = vrot.lane.b32.xlu1 %v4693_v30, %s4614_s2 }
 0x966   :  { %4419 = vrot.lane.b32.xlu1 %v4418_v38, %s4615_s3 }
 0x96a   :  { %4429 = vrot.lane.b32.xlu1 %v4428_v47, %s4615_s3 }
 0x96b   :  { %3581 = vrot.lane.b32.xlu0 %v4691_v29, %s4614_s2  ;;  %v3390_v29 = vpop.permute.xlu1 %3389 }
 0x96e   :  { %4439 = vrot.lane.b32.xlu1 %v4438_v14, %s4616_s4 }
 0x96f   :  { %4414 = vrot.lane.b32.xlu0 %v4413_v53, %s4615_s3  ;;  %v3438_v30 = vpop.permute.xlu1 %3437 }
 0x970   :  { %v3443_v39 = vsel %vm649_vm2, %v3438_v30, 0 }
 0x972   :  { %4449 = vrot.lane.b32.xlu1 %v4448_v8, %s4616_s4 }
 0x973   :  { %4424 = vrot.lane.b32.xlu0 %v4423_v25, %s4615_s3  ;;  %v3395_v25 = vsel %vm649_vm2, %v3390_v29, 0 }
 0x977   :  { %4434 = vrot.lane.b32.xlu0 %v4433_v23, %s4616_s4 }
 0x97b   :  { %4444 = vrot.lane.b32.xlu0 %v4443_v15, %s4616_s4 }
 0x99d   :  { %v3247_v40 = vpop.xlane.xlu1 %3246 }
 0x99e   :  { %4585 = vrcp.f32 %v3247_v40 }
 0x9a1   :  { %v3250_v11 = vpop.xlane.xlu0 %3249 }
 0x9a2   :  { %4587 = vrcp.f32 %v3250_v11 }
 0x9a5   :  { %v3253_v53 = vpop.xlane.xlu1 %3252 }
 0x9a6   :  { %4589 = vrcp.f32 %v3253_v53 }
 0x9a8   :  { %v4586_v24 = vpop.eup %4585 }
 0x9a9   :  { %v3277_v28 = vmul.f32 %v4586_v24, %v5364_v61  ;;  %v3256_v38 = vpop.xlane.xlu0 %3255  ;;  %v3534_v9 = vpop.permute.xlu1 %3533 }
 0x9aa   :  { %4591 = vrcp.f32 %v3256_v38  ;;  %v3539_v56 = vsel %vm649_vm2, %v3534_v9, 0 }
 0x9ab   :  { %v3285_v16 = vpack.c.bf16 %v3277_v28, %v3277_v28 }
 0x9ac   :  { %v4588_v37 = vpop.eup %4587 }
 0x9ad   :  { %v3278_v51 = vmul.f32 %v4588_v37, %v5368_v58  ;;  %4351 = vmatmul.mubr.msk.bf16.vlgmr.msra.gmra.mrb[112].mxu0 %vm645_vm4, %v3285_v16  ;;  %v3486_v23 = vpop.permute.xlu0 %3485 }
 0x9ae   :  { %4361 = vmatpush3.bf16.msra.mxu0 %v3395_v25  ;;  %4362 = vmatprep.mubr.msk.bf16.mxu0 %vm4603_vm0, %v4602_v3  ;;  %v3491_v42 = vsel %vm649_vm2, %v3486_v23, 0 }
 0x9af   :  { %v3286_v55 = vpack.c.bf16 %v3278_v51, %v3278_v51  ;;  %4372 = vmatprep.subr.bf16.mxu0 %v4602_v3 }
 0x9b0   :  { %v4590_v47 = vpop.eup %4589 }
 0x9b1   :  { %v3279_v54 = vmul.f32 %v4590_v47, %v5372_v46  ;;  %4357 = vmatmul.mubr.msk.bf16.vlgmr.msra.gmra.mrb[112].mxu1 %vm645_vm4, %v3286_v55 }
 0x9b2   :  { %4367 = vmatpush3.bf16.msra.mxu1 %v3443_v39  ;;  %4368 = vmatprep.mubr.msk.bf16.mxu1 %vm4603_vm0, %v4602_v3 }
 0x9b3   :  { %v3287_v19 = vpack.c.bf16 %v3279_v54, %v3279_v54  ;;  %4378 = vmatprep.subr.bf16.mxu1 %v4602_v3 }
 0x9b4   :  { %v4592_v52 = vpop.eup %4591 }
 0x9b5   :  { %v3280_v14 = vmul.f32 %v4592_v52, %v5376_v13  ;;  %4363 = vmatmul.mubr.msk.bf16.vlgmr.msra.gmra.mrb[116].mxu0 %vm645_vm4, %v3287_v19 }
 0x9b6   :  { %4373 = vmatpush3.bf16.msra.mxu0 %v3491_v42  ;;  %4374 = vmatprep.mubr.msk.bf16.mxu0 %vm4603_vm0, %v4602_v3 }
 0x9b7   :  { %v3288_v15 = vpack.c.bf16 %v3280_v14, %v3280_v14  ;;  %4384 = vmatprep.subr.bf16.mxu0 %v4602_v3 }
 0x9b9   :  { %4369 = vmatmul.mubr.msk.bf16.vlgmr.msra.gmra.mrb[116].mxu1 %vm645_vm4, %v3288_v15 }
 0x9ba   :  { %4379 = vmatpush3.bf16.msra.mxu1 %v3539_v56  ;;  %4380 = vmatprep.mubr.msk.bf16.mxu1 %vm4603_vm0, %v4602_v3 }
 0x9bb   :  { %4390 = vmatprep.subr.bf16.mxu1 %v4602_v3 }
 0x9da   :  { %v3259_v41 = vpop.xlane.xlu1 %3258 }
 0x9db   :  { %4593 = vrcp.f32 %v3259_v41 }
 0x9de   :  { %v3262_v8 = vpop.xlane.xlu0 %3261  ;;  %v3265_v61 = vpop.xlane.xlu1 %3264 }
 0x9df   :  { %4595 = vrcp.f32 %v3262_v8 }
 0x9e0   :  { %4597 = vrcp.f32 %v3265_v61 }
 0x9e2   :  { %v3268_v58 = vpop.xlane.xlu0 %3267  ;;  %v3630_v48 = vpop.permute.xlu1 %3629 }
 0x9e3   :  { %4599 = vrcp.f32 %v3268_v58  ;;  %v3635_v59 = vsel %vm649_vm2, %v3630_v48, 0 }
 0x9e5   :  { %v4594_v46 = vpop.eup %4593 }
 0x9e6   :  { %v3281_v34 = vmul.f32 %v4594_v46, %v5388_v27  ;;  %v3582_v60 = vpop.permute.xlu0 %3581  ;;  %v5457_v13 = vpop.permute.xlu1 %4419 }
 0x9e7   :  { %v3587_v22 = vsel %vm649_vm2, %v3582_v60, 0 }
 0x9e8   :  { %v3289_v32 = vpack.c.bf16 %v3281_v34, %v3281_v34 }
 0x9e9   :  { %v4596_v12 = vpop.eup %4595 }
 0x9ea   :  { %v4598_v2 = vpop.eup %4597  ;;  %v3282_v63 = vmul.f32 %v4596_v12, %v5390_v21  ;;  %v5461_v44 = vpop.permute.xlu0 %4414  ;;  %4375 = vmatmul.mubr.msk.bf16.vlgmr.msra.gmra.mrb[120].mxu0 %vm645_vm4, %v3289_v32 }
 0x9eb   :  { %v4430_v0 = vpop.permute.xlu1 %4429  ;;  %4385 = vmatpush3.bf16.msra.mxu0 %v3587_v22  ;;  %4386 = vmatprep.mubr.msk.bf16.mxu0 %vm4603_vm0, %v4602_v3  ;;  %v3283_v7 = vmul.f32 %v4598_v2, %v5394_v45 }
 0x9ec   :  { %v4432_v35 = vunpack.i.h.bf16 %v4430_v0  ;;  %v4431_v5 = vunpack.i.l.bf16 %v4430_v0  ;;  %v3290_v4 = vpack.c.bf16 %v3282_v63, %v3282_v63 }
 0x9ed   :  { %v4600_v1 = vpop.eup %4599  ;;  %v3291_v20 = vpack.c.bf16 %v3283_v7, %v3283_v7 }
 0x9ee   :  { %v3780_v18 = vsel %vm58_vm1, %v4962_v6, %v4432_v35  ;;  %v3779_v27 = vsel %vm58_vm1, %v4960_v62, %v4431_v5  ;;  %v4425_v21 = vpop.permute.xlu0 %4424  ;;  %4381 = vmatmul.mubr.msk.bf16.vlgmr.msra.gmra.mrb[120].mxu1 %vm645_vm4, %v3290_v4  ;;  %v3284_v45 = vmul.f32 %v4600_v1, %v5400_v10 }
 0x9ef   :  { %v5473_v26 = vpop.permute.xlu1 %4439  ;;  %v4427_v49 = vunpack.i.h.bf16 %v4425_v21  ;;  %v4426_v17 = vunpack.i.l.bf16 %v4425_v21  ;;  %4391 = vmatpush3.bf16.msra.mxu1 %v3635_v59  ;;  %4392 = vmatprep.mubr.msk.bf16.mxu1 %vm4603_vm0, %v4602_v3 }
 0x9f0   :  { %v3292_v53 = vpack.c.bf16 %v3284_v45, %v3284_v45 }
 0x9f1   :  { %v3778_v6 = vsel %vm58_vm1, %v4958_v57, %v4427_v49  ;;  %v3777_v62 = vsel %vm58_vm1, %v4956_v50, %v4426_v17 }
 0x9f2   :  { %v5482_v29 = vpop.permute.xlu0 %4434  ;;  %4387 = vmatmul.mubr.msk.bf16.vlgmr.msra.gmra.mrb[124].mxu0 %vm645_vm4, %v3291_v20 }
 0x9f3   :  { %v4450_v30 = vpop.permute.xlu1 %4449  ;;  %v4437_v21 = vunpack.i.h.bf16 %v5482_v29  ;;  %v4436_v49 = vunpack.i.l.bf16 %v5482_v29 }
 0x9f4   :  { %v4452_v40 = vunpack.i.h.bf16 %v4450_v30  ;;  %v4451_v11 = vunpack.i.l.bf16 %v4450_v30 }
 0x9f6   :  { %v5486_v3 = vsel %vm3781_vm5, %v3779_v27, %v4451_v11  ;;  %v5489_v10 = vsel %vm3781_vm5, %v3780_v18, %v4452_v40  ;;  %v4445_v24 = vpop.permute.xlu0 %4444  ;;  %4393 = vmatmul.mubr.msk.bf16.vlgmr.msra.gmra.mrb[124].mxu1 %vm645_vm4, %v3292_v53  ;;  %v4417_v18 = vunpack.i.h.bf16 %v5461_v44  ;;  %v4416_v27 = vunpack.i.l.bf16 %v5461_v44 }
 0x9f7   :  { %v4447_v57 = vunpack.i.h.bf16 %v4445_v24  ;;  %v4446_v50 = vunpack.i.l.bf16 %v4445_v24  ;;  %v4422_v24 = vunpack.i.h.bf16 %v5457_v13 }
 0x9f8   :  { %v3774_v45 = vsel %vm58_vm1, %v4946_v33, %v4417_v18  ;;  %v3773_v20 = vsel %vm58_vm1, %v4944_v31, %v4416_v27  ;;  %v4421_v33 = vunpack.i.l.bf16 %v5457_v13  ;;  %v4441_v31 = vunpack.i.l.bf16 %v5473_v26 }
 0x9f9   :  { %v5493_v28 = vsel %vm3781_vm5, %v3777_v62, %v4446_v50  ;;  %v5496_v38 = vsel %vm3781_vm5, %v3778_v6, %v4447_v57  ;;  %v3782_v30 = vsel %vm3781_vm5, %v3773_v20, %v4436_v49  ;;  %v3783_v40 = vsel %vm3781_vm5, %v3774_v45, %v4437_v21 }
 0x9fa   :  { %v4442_v57 = vunpack.i.h.bf16 %v5473_v26  ;;  %v3775_v13 = vsel %vm58_vm1, %v4948_v36, %v4421_v33 }
 0x9fb   :  { %v3784_v26 = vsel %vm3781_vm5, %v3775_v13, %v4441_v31 }
 0xa80   :  { %v3335_v16 = vpop.f32.mrb[112].mxu0 }
 0xa81   :  { %v4352_v37 = vpop.f32.mrb[113].mxu0 }
 0xa82   :  { %v3338_v25 = vpop.f32.mrb[114].mxu0 }
 0xa83   :  { %v4353_v51 = vpop.f32.mrb[115].mxu0 }
 0xa84   :  { %v3383_v55 = vpop.f32.mrb[112].mxu1 }
 0xa85   :  { %v4453_v47 = vpack.i.bf16 %v3383_v55, %v3335_v16  ;;  %v4358_v39 = vpop.f32.mrb[113].mxu1  ;;  %v3776_v16 = vsel %vm58_vm1, %v4951_v43, %v4422_v24 }
 0xa86   :  { %v3386_v54 = vpop.f32.mrb[114].mxu1  ;;  %v3785_v51 = vsel %vm3781_vm5, %v3776_v16, %v4442_v57 }
 0xa87   :  { %v4359_v23 = vpop.f32.mrb[115].mxu1  ;;  %4454 = vrot.lane.b32.xlu0 %v4453_v47, %s4617_s5 }
 0xa88   :  { %v3431_v19 = vpop.f32.mrb[116].mxu0 }
 0xa89   :  { %v4364_v52 = vpop.f32.mrb[117].mxu0 }
 0xa8a   :  { %v3434_v14 = vpop.f32.mrb[118].mxu0 }
 0xa8b   :  { %v4365_v42 = vpop.f32.mrb[119].mxu0 }
 0xa8c   :  { %v3479_v9 = vpop.f32.mrb[116].mxu1 }
 0xa8d   :  { %v4458_v15 = vpack.i.bf16 %v3479_v9, %v3431_v19  ;;  %v4370_v56 = vpop.f32.mrb[117].mxu1 }
 0xa8e   :  { %v3482_v41 = vpop.f32.mrb[118].mxu1 }
 0xa8f   :  { %v4371_v8 = vpop.f32.mrb[119].mxu1  ;;  %4459 = vrot.lane.b32.xlu1 %v4458_v15, %s4617_s5 }
 0xabd   :  { %v3527_v61 = vpop.f32.mrb[120].mxu0 }
 0xabe   :  { %v4376_v58 = vpop.f32.mrb[121].mxu0 }
 0xabf   :  { %v3530_v48 = vpop.f32.mrb[122].mxu0 }
 0xac0   :  { %v4377_v46 = vpop.f32.mrb[123].mxu0 }
 0xac1   :  { %v3575_v34 = vpop.f32.mrb[120].mxu1 }
 0xac2   :  { %v4463_v60 = vpack.i.bf16 %v3575_v34, %v3527_v61  ;;  %v4382_v22 = vpop.f32.mrb[121].mxu1 }
 0xac3   :  { %v3578_v32 = vpop.f32.mrb[122].mxu1 }
 0xac4   :  { %v4383_v12 = vpop.f32.mrb[123].mxu1  ;;  %4464 = vrot.lane.b32.xlu0 %v4463_v60, %s4617_s5 }
 0xac5   :  { %v3623_v2 = vpop.f32.mrb[124].mxu0 }
 0xac6   :  { %v4388_v63 = vpop.f32.mrb[125].mxu0 }
 0xac7   :  { %v3626_v0 = vpop.f32.mrb[126].mxu0 }
 0xac8   :  { %v4389_v35 = vpop.f32.mrb[127].mxu0 }
 0xac9   :  { %v3671_v7 = vpop.f32.mrb[124].mxu1 }
 0xaca   :  { %v4468_v59 = vpack.i.bf16 %v3671_v7, %v3623_v2  ;;  %v4394_v5 = vpop.f32.mrb[125].mxu1 }
 0xacb   :  { %v3674_v4 = vpop.f32.mrb[126].mxu1 }
 0xacc   :  { %v4395_v1 = vpop.f32.mrb[127].mxu1  ;;  %4469 = vrot.lane.b32.xlu1 %v4468_v59, %s4617_s5 }
 0xaf9   :  { %v4455_v17 = vpop.permute.xlu0 %4454 }
 0xafa   :  { %v4457_v6 = vunpack.i.h.bf16 %v4455_v17  ;;  %v4456_v62 = vunpack.i.l.bf16 %v4455_v17 }
 0xafc   :  { %v3792_v44 = vsel %vm3790_vm6, %v3783_v40, %v4457_v6  ;;  %v3791_v11 = vsel %vm3790_vm6, %v3782_v30, %v4456_v62 }
 0xafd   :  { %v3800_v29 = vpack.c.bf16 %v3792_v44, %v3792_v44  ;;  %v3799_v53 = vpack.c.bf16 %v3791_v11, %v3791_v11 }
 0xaff   :  { %3809 = vst.msk [vmem:[%s5567_s1 + $0x1] sm:$0x1] %vm3807_vm7, %v3800_v29  ;;  %3808 = vst.msk [vmem:[%s5567_s1] sm:$0x1] %vm3807_vm7, %v3799_v53 }
 0xb01   :  { %v4460_v50 = vpop.permute.xlu1 %4459 }
 0xb02   :  { %v4462_v37 = vunpack.i.h.bf16 %v4460_v50  ;;  %v4461_v25 = vunpack.i.l.bf16 %v4460_v50 }
 0xb04   :  { %v3794_v55 = vsel %vm3790_vm6, %v3785_v51, %v4462_v37  ;;  %v3793_v47 = vsel %vm3790_vm6, %v3784_v26, %v4461_v25 }
 0xb05   :  { %v3802_v39 = vpack.c.bf16 %v3794_v55, %v3794_v55  ;;  %v3801_v54 = vpack.c.bf16 %v3793_v47, %v3793_v47 }
 0xb07   :  { %3811 = vst.msk [vmem:[%s5567_s1 + $0x3] sm:$0x1] %vm3807_vm7, %v3802_v39  ;;  %3810 = vst.msk [vmem:[%s5567_s1 + $0x2] sm:$0x1] %vm3807_vm7, %v3801_v54 }
 0xb36   :  { %v4465_v36 = vpop.permute.xlu0 %4464 }
 0xb37   :  { %v4467_v43 = vunpack.i.h.bf16 %v4465_v36  ;;  %v4466_v23 = vunpack.i.l.bf16 %v4465_v36 }
 0xb39   :  { %v3796_v19 = vsel %vm3790_vm6, %v5496_v38, %v4467_v43  ;;  %v3795_v52 = vsel %vm3790_vm6, %v5493_v28, %v4466_v23 }
 0xb3a   :  { %v3804_v14 = vpack.c.bf16 %v3796_v19, %v3796_v19  ;;  %v3803_v42 = vpack.c.bf16 %v3795_v52, %v3795_v52 }
 0xb3c   :  { %3813 = vst.msk [vmem:[%s5567_s1 + $0x5] sm:$0x1] %vm3807_vm7, %v3804_v14  ;;  %3812 = vst.msk [vmem:[%s5567_s1 + $0x4] sm:$0x1] %vm3807_vm7, %v3803_v42 }
 0xb3e   :  { %v4470_v9 = vpop.permute.xlu1 %4469 }
 0xb3f   :  { %v4472_v15 = vunpack.i.h.bf16 %v4470_v9  ;;  %v4471_v56 = vunpack.i.l.bf16 %v4470_v9 }
 0xb41   :  { %v3798_v38 = vsel %vm3790_vm6, %v5489_v10, %v4472_v15  ;;  %v3797_v28 = vsel %vm3790_vm6, %v5486_v3, %v4471_v56 }
 0xb42   :  { %v3806_v41 = vpack.c.bf16 %v3798_v38, %v3798_v38  ;;  %v3805_v8 = vpack.c.bf16 %v3797_v28, %v3797_v28 }
 0xb44   :  { %3815 = vst.msk [vmem:[%s5567_s1 + $0x7] sm:$0x1] %vm3807_vm7, %v3806_v41  ;;  %3814 = vst.msk [vmem:[%s5567_s1 + $0x6] sm:$0x1] %vm3807_vm7, %v3805_v8 }

// kernel: vit_forward.37
= control target key start
LH: loop header
LB: loop body
LE: loop exit
PB: predicated region body
PF: predicated region fallthrough
CT: control target
= control target key end

     0   :  { %vm17_vm0 = vcmask 261120   ;;  %vm24_vm1 = vcmask 254976   ;;  %vm92_vm2 = vcmask 257024   ;;  %vm95_vm3 = vcmask 253952   ;;  %s165_s0 = inlined_call_operand.vmem [shape: f32[18,32], index: 0, kind: input, shape index: {}]   ;;  %s166_s1 = inlined_call_operand.vmem [shape: f32[1,32], index: 1, kind: input, shape index: {}]   ;;  %s167_s2 = inlined_call_operand.vmem [shape: f32[1,32], index: 2, kind: input, shape index: {}]   ;;  %s168_s3 = inlined_call_operand.vmem [shape: bf16[18,32], index: 3, kind: output, shape index: {}]  }
   0x1   :  { %v14_v0 = vld [vmem:[%s165_s0] sm:$0xff]  ;;  %v16_v1 = vld [vmem:[%s165_s0 + $0x10] sm:$0x3]  ;;  %v15_v2 = vld [vmem:[%s165_s0 + $0x8] sm:$0xff] }
   0x2   :  { %v18_v3 = vsel %vm17_vm0, %v14_v0, 0.0  ;;  %v25_v4 = vsel %vm24_vm1, %v16_v1, 0.0  ;;  %v21_v5 = vsel %vm17_vm0, %v15_v2, 0.0  ;;  %v101_v31 = vld [vmem:[%s166_s1] ss:$0 sm:$0xff] }
   0x3   :  { %19 = vadd.xlane.f32.xlu0 %v18_v3  ;;  %26 = vadd.xlane.f32.xlu1 %v25_v4  ;;  %v102_v33 = vld [vmem:[%s167_s2] ss:$0 sm:$0xff] }
   0x7   :  { %22 = vadd.xlane.f32.xlu0 %v21_v5 }
  0x90   :  { %v20_v6 = vpop.xlane.xlu0 %19  ;;  %v27_v7 = vpop.xlane.xlu1 %26 }
  0x91   :  { %v29_v8 = vmul.f32 0.03125, %v20_v6  ;;  %v31_v9 = vmul.f32 0.03125, %v27_v7 }
  0x93   :  { %v32_v10 = vsub.f32 %v14_v0, %v29_v8  ;;  %v34_v11 = vsub.f32 %v16_v1, %v31_v9 }
  0x94   :  { %v23_v12 = vpop.xlane.xlu0 %22 }
  0x95   :  { %v30_v13 = vmul.f32 0.03125, %v23_v12  ;;  %v35_v14 = vmul.f32 %v32_v10, %v32_v10  ;;  %v37_v15 = vmul.f32 %v34_v11, %v34_v11 }
  0x97   :  { %v33_v16 = vsub.f32 %v15_v2, %v30_v13  ;;  %v38_v17 = vsel %vm17_vm0, %v35_v14, 0.0  ;;  %v44_v18 = vsel %vm24_vm1, %v37_v15, 0.0 }
  0x98   :  { %39 = vadd.xlane.f32.xlu1 %v38_v17 }
  0x99   :  { %v36_v19 = vmul.f32 %v33_v16, %v33_v16 }
  0x9b   :  { %v41_v20 = vsel %vm17_vm0, %v36_v19, 0.0 }
  0x9c   :  { %45 = vadd.xlane.f32.xlu1 %v44_v18  ;;  %42 = vadd.xlane.f32.xlu0 %v41_v20 }
 0x125   :  { %v40_v21 = vpop.xlane.xlu1 %39 }
 0x126   :  { %v47_v22 = vmul.f32 0.03125, %v40_v21 }
 0x128   :  { %v50_v23 = vadd.f32 1e-06, %v47_v22 }
 0x129   :  { %v46_v24 = vpop.xlane.xlu1 %45  ;;  %v43_v25 = vpop.xlane.xlu0 %42 }
 0x12a   :  { %109 = vrsqrt.f32 %v50_v23  ;;  %v49_v26 = vmul.f32 0.03125, %v46_v24  ;;  %v48_v27 = vmul.f32 0.03125, %v43_v25 }
 0x12c   :  { %v52_v28 = vadd.f32 1e-06, %v49_v26  ;;  %v51_v29 = vadd.f32 1e-06, %v48_v27 }
 0x12e   :  { %111 = vrsqrt.f32 %v52_v28 }
 0x12f   :  { %113 = vrsqrt.f32 %v51_v29 }
 0x134   :  { %v110_v30 = vpop.eup %109 }
 0x135   :  { %v56_v32 = vmul.f32 %v110_v30, %v32_v10 }
 0x137   :  { %v66_v34 = vmul.f32 %v101_v31, %v56_v32 }
 0x138   :  { %v112_v35 = vpop.eup %111 }
 0x139   :  { %v114_v36 = vpop.eup %113  ;;  %v76_v37 = vadd.f32 %v102_v33, %v66_v34  ;;  %v58_v38 = vmul.f32 %v112_v35, %v34_v11 }
 0x13a   :  { %v57_v39 = vmul.f32 %v114_v36, %v33_v16 }
 0x13b   :  { %v106_v40 = vpack.c.bf16 %v76_v37, %v76_v37  ;;  %v68_v41 = vmul.f32 %v101_v31, %v58_v38 }
 0x13c   :  { %v67_v42 = vmul.f32 %v101_v31, %v57_v39 }
 0x13d   :  { %93 = vst.msk [vmem:[%s168_s3] sm:$0xf] %vm92_vm2, %v106_v40  ;;  %v78_v43 = vadd.f32 %v102_v33, %v68_v41 }
 0x13e   :  { %v77_v44 = vadd.f32 %v102_v33, %v67_v42 }
 0x13f   :  { %v108_v45 = vpack.c.bf16 %v78_v43, %v78_v43 }
 0x140   :  { %v107_v46 = vpack.c.bf16 %v77_v44, %v77_v44 }
 0x141   :  { %96 = vst.msk [vmem:[%s168_s3 + $0x8] sm:$0x1] %vm95_vm3, %v108_v45 }
 0x142   :  { %94 = vst.msk [vmem:[%s168_s3 + $0x4] sm:$0xf] %vm92_vm2, %v107_v46 }

// kernel: vit_forward.38
= control target key start
LH: loop header
LB: loop body
LE: loop exit
PB: predicated region body
PF: predicated region fallthrough
CT: control target
= control target key end

     0   :  { %vm49_vm0 = vcmask 261120   ;;  %s178_s1 = inlined_call_operand.vmem [shape: bf16[32,128], index: 1, kind: input, shape index: {}]   ;;  %s179_s0 = inlined_call_operand.vmem [shape: bf16[18,32], index: 0, kind: input, shape index: {}]   ;;  %s180_s2 = inlined_call_operand.vmem [shape: f32[1,128], index: 2, kind: input, shape index: {}]   ;;  %s181_s3 = inlined_call_operand.vmem [shape: f32[18,128], index: 3, kind: output, shape index: {}]  }
   0x1   :  { %v130_v0 = vld [vmem:[%s178_s1] sm:$0xff]   ;;  %v131_v1 = vld [vmem:[%s178_s1 + $0x8] sm:$0xff]  }
   0x2   :  { %122 = vmatprep.subr.bf16.mxu0 %v130_v0  ;;  %v132_v2 = vld [vmem:[%s179_s0] sm:$0xff]   ;;  %v133_v3 = vld [vmem:[%s179_s0 + $0x8] ss:$0 sps:$4 sm:$0x11]  }
   0x3   :  { %123 = vmatpush3.bf16.msra.mxu0 %v130_v0  ;;  %126 = vmatprep.mubr.msk.bf16.mxu0 %vm49_vm0, %v132_v2  ;;  %v111_v4 = vld [vmem:[%s180_s2] ss:$0 sm:$0xff] }
   0x4   :  { %124 = vmatprep.subr.bf16.mxu0 %v131_v1 }
   0x7   :  { %125 = vmatpush3.bf16.msra.mxu0 %v131_v1 }
   0xa   :  { %127 = vmatmul.mubr.msk.bf16.vlgmr.msra.gmra.mrb[0].mxu0 %vm49_vm0, %v133_v3 }
  0xdd   :  { %v128_v5 = vpop.f32.mrb[0].mxu0 }
  0xde   :  { %v99_v6 = vadd.f32 %v128_v5, %v111_v4  ;;  %v90_v7 = vpop.f32.mrb[1].mxu0 }
  0xdf   :  { %v91_v8 = vadd.f32 %v111_v4, %v90_v7  ;;  %v129_v9 = vpop.f32.mrb[2].mxu0 }
  0xe0   :  { %106 = vst [vmem:[%s181_s3 + $0x10] sm:$0x3] %v99_v6  ;;  %v93_v10 = vpop.f32.mrb[3].mxu0 }
  0xe1   :  { %104 = vst [vmem:[%s181_s3] sm:$0xff] %v91_v8  ;;  %v94_v11 = vadd.f32 %v111_v4, %v93_v10 }
  0xe3   :  { %105 = vst [vmem:[%s181_s3 + $0x8] sm:$0xff] %v94_v11 }

// kernel: vit_forward.35
= control target key start
LH: loop header
LB: loop body
LE: loop exit
PB: predicated region body
PF: predicated region fallthrough
CT: control target
= control target key end

     0   :  { %v2292_v3 = vmov 0.0   ;;  %vm2293_vm0 = vmmov 0   ;;  %s2294_s14 = smov 96   ;;  %vm30_vm1 = vcmask 64512   ;;  %vm230_vm2 = vcmask 36864   ;;  %s2297_s15 = smov 88   ;;  %s2689_s0 = inlined_call_operand.vmem [shape: bf16[4,5,96], index: 0, kind: input, shape index: {}]   ;;  %s2690_s1 = inlined_call_operand.vmem [shape: bf16[4,5,32], index: 1, kind: output, shape index: {}]  }
   0x1   :  { %v9_v0 = vld [vmem:[%s2689_s0] sm:$0x7]  ;;  %v10_v1 = vld [vmem:[%s2689_s0 + $0x4] sm:$0x7]  ;;  %v11_v2 = vld [vmem:[%s2689_s0 + $0x8] sm:$0x7]  ;;  %1985 = vmatprep.subr.bf16.mxu0 %v2292_v3  ;;  %1991 = vmatprep.subr.bf16.mxu1 %v2292_v3 }
   0x2   :  { %v2330_v4 = vcombine.low %v9_v0, %v9_v0  ;;  %v2332_v5 = vcombine.low %v11_v2, %v11_v2  ;;  %v12_v6 = vld [vmem:[%s2689_s0 + $0xc] sm:$0x7]  ;;  %1987 = vmatprep.mubr.msk.bf16.mxu0 %vm2293_vm0, %v2292_v3  ;;  %1993 = vmatprep.mubr.msk.bf16.mxu1 %vm2293_vm0, %v2292_v3  ;;  %v2342_v7 = vcombine.low %v10_v1, %v10_v1  ;;  %v13_v9 = vunpack.c.l.bf16 %v9_v0  ;;  %s2295_s0 = smov 64   ;;  %s2298_s16 = smov 120  }
   0x3   :  { %v2345_v8 = vcombine.low %v12_v6, %v12_v6  ;;  %v14_v13 = vunpack.c.l.bf16 %v10_v1  ;;  %v15_v19 = vunpack.c.l.bf16 %v11_v2  ;;  %v16_v24 = vunpack.c.l.bf16 %v12_v6  ;;  %s2299_s17 = smov 56   ;;  %s2300_s18 = smov 80  }
   0x4   :  { %28 = vrot.lane.b32.xlu0 %v2330_v4, %s2294_s14  ;;  %131 = vrot.lane.b32.xlu1 %v2332_v5, %s2294_s14  ;;  %v17_v12 = vmul.f32 0.35355338, %v13_v9  ;;  %vm285_vm3 = vcmask 1041408   ;;  %vm286_vm4 = vcmask 1042432   ;;  %v2296_v52 = vmov 65535   ;;  %s2301_s19 = smov 112  }
   0x5   :  { %v18_v18 = vmul.f32 0.35355338, %v14_v13  ;;  %v19_v23 = vmul.f32 0.35355338, %v15_v19  ;;  %v20_v27 = vmul.f32 0.35355338, %v16_v24 }
   0x6   :  { %v2352_v17 = vpack.c.bf16 %v17_v12, %v17_v12  ;;  %v287_v53 = vsel %vm285_vm3, 4294967295, %v2296_v52  ;;  %vm281_vm5 = vcmask 39936   ;;  %s2302_s20 = smov 48   ;;  %s2303_s21 = smov 72   ;;  %vm1852_vm6 = vcmask 130048  }
   0x7   :  { %v2358_v22 = vpack.c.bf16 %v18_v18, %v18_v18  ;;  %v2366_v26 = vpack.c.bf16 %v19_v23, %v19_v23  ;;  %v2373_v28 = vpack.c.bf16 %v20_v27, %v20_v27  ;;  %v2386_v56 = vsel %vm286_vm4, %v287_v53, 0  ;;  %s2304_s22 = smov 104   ;;  %s2305_s23 = smov 40  }
   0x8   :  { %80 = vrot.lane.b32.xlu0 %v2342_v7, %s2294_s14  ;;  %182 = vrot.lane.b32.xlu1 %v2345_v8, %s2294_s14  ;;  %s2306_s24 = smov 8   ;;  %s2307_s25 = smov 16   ;;  %vm1857_vm7 = vcmask 195584   ;;  %vm1866_vm8 = vcmask 256000   ;;  %vm1867_vm9 = vsmask.f32 2304 }
   0x9   :  { %s2308_s26 = smov 24   ;;  %vm2643_vm10 = vmand %vm1866_vm8, %vm1867_vm9 }
  0x76   :  { %v29_v10 = vpop.permute.xlu0 %28  ;;  %v132_v14 = vpop.permute.xlu1 %131 }
  0x77   :  { %v35_v11 = vsel %vm30_vm1, %v29_v10, 0  ;;  %v137_v20 = vsel %vm30_vm1, %v132_v14, 0 }
  0x78   :  { %1986 = vmatpush3.bf16.xpose.msra.mxu0 %v35_v11 }
  0x79   :  { %1997 = vmatprep.subr.bf16.mxu0 %v2292_v3 }
  0x7a   :  { %v81_v15 = vpop.permute.xlu0 %80  ;;  %v183_v21 = vpop.permute.xlu1 %182 }
  0x7b   :  { %v86_v16 = vsel %vm30_vm1, %v81_v15, 0  ;;  %v188_v25 = vsel %vm30_vm1, %v183_v21, 0 }
  0x7c   :  { %1992 = vmatpush3.bf16.xpose.msra.mxu1 %v86_v16 }
  0x7d   :  { %2003 = vmatprep.subr.bf16.mxu1 %v2292_v3 }
  0x7f   :  { %1988 = vmatmul.mubr.msk.bf16.vlgmr.msra.gmra.mrb[0].mxu0 %vm30_vm1, %v2352_v17 }
  0x80   :  { %1998 = vmatpush3.bf16.xpose.msra.mxu0 %v137_v20  ;;  %1999 = vmatprep.mubr.msk.bf16.mxu0 %vm2293_vm0, %v2292_v3 }
  0x81   :  { %2009 = vmatprep.subr.bf16.mxu0 %v2292_v3 }
  0x83   :  { %1994 = vmatmul.mubr.msk.bf16.vlgmr.msra.gmra.mrb[0].mxu1 %vm30_vm1, %v2358_v22 }
  0x84   :  { %2004 = vmatpush3.bf16.xpose.msra.mxu1 %v188_v25  ;;  %2005 = vmatprep.mubr.msk.bf16.mxu1 %vm2293_vm0, %v2292_v3 }
  0x85   :  { %2015 = vmatprep.subr.bf16.mxu1 %v2292_v3 }
  0x87   :  { %2000 = vmatmul.mubr.msk.bf16.vlgmr.msra.gmra.mrb[4].mxu0 %vm30_vm1, %v2366_v26 }
  0x88   :  { %2011 = vmatprep.mubr.msk.bf16.mxu0 %vm2293_vm0, %v2292_v3 }
  0x8b   :  { %2006 = vmatmul.mubr.msk.bf16.vlgmr.msra.gmra.mrb[4].mxu1 %vm30_vm1, %v2373_v28 }
  0x8c   :  { %2017 = vmatprep.mubr.msk.bf16.mxu1 %vm2293_vm0, %v2292_v3 }
 0x152   :  { %v71_v29 = vpop.f32.mrb[0].mxu0 }
 0x153   :  { %v1989_v30 = vpop.f32.mrb[1].mxu0  ;;  %v231_v31 = vsel %vm230_vm2, %v71_v29, -inf }
 0x154   :  { %232 = vmax.xlane.f32.xlu0 %v231_v31  ;;  %v74_v32 = vpop.f32.mrb[2].mxu0 }
 0x155   :  { %v1990_v33 = vpop.f32.mrb[3].mxu0 }
 0x156   :  { %v122_v34 = vpop.f32.mrb[0].mxu1 }
 0x157   :  { %v234_v35 = vsel %vm230_vm2, %v122_v34, -inf  ;;  %v1995_v36 = vpop.f32.mrb[1].mxu1 }
 0x158   :  { %235 = vmax.xlane.f32.xlu1 %v234_v35  ;;  %v125_v37 = vpop.f32.mrb[2].mxu1 }
 0x159   :  { %v1996_v38 = vpop.f32.mrb[3].mxu1 }
 0x15a   :  { %v173_v39 = vpop.f32.mrb[4].mxu0 }
 0x15b   :  { %v237_v40 = vsel %vm230_vm2, %v173_v39, -inf  ;;  %v2001_v41 = vpop.f32.mrb[5].mxu0 }
 0x15c   :  { %238 = vmax.xlane.f32.xlu0 %v237_v40  ;;  %v176_v42 = vpop.f32.mrb[6].mxu0 }
 0x15d   :  { %v2002_v43 = vpop.f32.mrb[7].mxu0 }
 0x15e   :  { %v224_v44 = vpop.f32.mrb[4].mxu1 }
 0x15f   :  { %v240_v45 = vsel %vm230_vm2, %v224_v44, -inf  ;;  %v2007_v46 = vpop.f32.mrb[5].mxu1 }
 0x160   :  { %241 = vmax.xlane.f32.xlu0 %v240_v45  ;;  %v227_v47 = vpop.f32.mrb[6].mxu1 }
 0x161   :  { %v2008_v48 = vpop.f32.mrb[7].mxu1 }
 0x169   :  { %279 = vrot.lane.b32.xlu1 %v2330_v4, %s2295_s0 }
 0x1e1   :  { %v233_v49 = vpop.xlane.xlu0 %232 }
 0x1e2   :  { %v243_v50 = vsub.f32 %v71_v29, %v233_v49 }
 0x1e4   :  { %v247_v51 = vmul.f32 1.442695, %v243_v50 }
 0x1e5   :  { %v236_v54 = vpop.xlane.xlu1 %235 }
 0x1e6   :  { %2228 = vpow2.f32 %v247_v51  ;;  %v244_v55 = vsub.f32 %v122_v34, %v236_v54 }
 0x1e8   :  { %v249_v57 = vmul.f32 1.442695, %v244_v55 }
 0x1e9   :  { %v280_v58 = vpop.permute.xlu1 %279  ;;  %v239_v0 = vpop.xlane.xlu0 %238 }
 0x1ea   :  { %2230 = vpow2.f32 %v249_v57  ;;  %v290_v59 = vand.u32 %v2386_v56, %v280_v58  ;;  %v245_v2 = vsub.f32 %v173_v39, %v239_v0 }
 0x1ec   :  { %2010 = vmatpush3.bf16.msra.mxu0 %v290_v59  ;;  %v251_v9 = vmul.f32 1.442695, %v245_v2 }
 0x1ed   :  { %2021 = vmatprep.subr.bf16.mxu0 %v2292_v3  ;;  %v242_v1 = vpop.xlane.xlu0 %241 }
 0x1ee   :  { %v246_v6 = vsub.f32 %v224_v44, %v242_v1  ;;  %2232 = vpow2.f32 %v251_v9 }
 0x1f0   :  { %v2229_v60 = vpop.eup %2228  ;;  %v253_v10 = vmul.f32 1.442695, %v246_v6 }
 0x1f1   :  { %v255_v61 = vsel %vm230_vm2, %v2229_v60, 0.0 }
 0x1f2   :  { %256 = vadd.xlane.f32.xlu1 %v255_v61  ;;  %2234 = vpow2.f32 %v253_v10 }
 0x1f4   :  { %v2231_v62 = vpop.eup %2230 }
 0x1f5   :  { %v258_v63 = vsel %vm230_vm2, %v2231_v62, 0.0 }
 0x1f6   :  { %259 = vadd.xlane.f32.xlu0 %v258_v63 }
 0x1f8   :  { %v2233_v11 = vpop.eup %2232 }
 0x1f9   :  { %v261_v13 = vsel %vm230_vm2, %v2233_v11, 0.0 }
 0x1fc   :  { %v2235_v12 = vpop.eup %2234 }
 0x1fd   :  { %v264_v14 = vsel %vm230_vm2, %v2235_v12, 0.0 }
 0x203   :  { %380 = vrot.lane.b32.xlu1 %v2332_v5, %s2295_s0 }
 0x207   :  { %428 = vrot.lane.b32.xlu1 %v2345_v8, %s2295_s0 }
 0x20c   :  { %332 = vrot.lane.b32.xlu0 %v2342_v7, %s2295_s0 }
 0x22b   :  { %262 = vadd.xlane.f32.xlu1 %v261_v13  ;;  %265 = vadd.xlane.f32.xlu0 %v264_v14 }
 0x23c   :  { %530 = vrot.lane.b32.xlu1 %v2342_v7, %s2297_s15 }
 0x240   :  { %528 = vrot.lane.b32.xlu1 %v2358_v22, %s2298_s16 }
 0x241   :  { %479 = vrot.lane.b32.xlu0 %v2330_v4, %s2297_s15 }
 0x244   :  { %632 = vrot.lane.b32.xlu1 %v2345_v8, %s2297_s15 }
 0x245   :  { %477 = vrot.lane.b32.xlu0 %v2352_v17, %s2298_s16 }
 0x248   :  { %630 = vrot.lane.b32.xlu1 %v2373_v28, %s2298_s16 }
 0x249   :  { %581 = vrot.lane.b32.xlu0 %v2332_v5, %s2297_s15 }
 0x24d   :  { %579 = vrot.lane.b32.xlu0 %v2366_v26, %s2298_s16 }
 0x27f   :  { %v257_v15 = vpop.xlane.xlu1 %256 }
 0x280   :  { %2236 = vrcp.f32 %v257_v15 }
 0x283   :  { %v260_v16 = vpop.xlane.xlu0 %259  ;;  %v381_v20 = vpop.permute.xlu1 %380 }
 0x284   :  { %2238 = vrcp.f32 %v260_v16  ;;  %v386_v27 = vand.u32 %v381_v20, %v2386_v56 }
 0x287   :  { %v333_v18 = vpop.permute.xlu0 %332  ;;  %v429_v30 = vpop.permute.xlu1 %428 }
 0x288   :  { %v338_v19 = vand.u32 %v333_v18, %v2386_v56  ;;  %v434_v32 = vand.u32 %v429_v30, %v2386_v56 }
 0x28a   :  { %v2237_v21 = vpop.eup %2236  ;;  %2016 = vmatpush3.bf16.msra.mxu1 %v338_v19 }
 0x28b   :  { %v271_v23 = vmul.f32 %v2237_v21, %v2229_v60  ;;  %2027 = vmatprep.subr.bf16.mxu1 %v2292_v3 }
 0x28d   :  { %v275_v24 = vpack.c.bf16 %v271_v23, %v271_v23 }
 0x28e   :  { %v2239_v25 = vpop.eup %2238 }
 0x28f   :  { %v272_v29 = vmul.f32 %v2239_v25, %v2231_v62  ;;  %2012 = vmatmul.mubr.msk.bf16.vlgmr.msra.gmra.mrb[8].mxu0 %vm281_vm5, %v275_v24 }
 0x290   :  { %2022 = vmatpush3.bf16.msra.mxu0 %v386_v27  ;;  %2023 = vmatprep.mubr.msk.bf16.mxu0 %vm2293_vm0, %v2292_v3 }
 0x291   :  { %v276_v31 = vpack.c.bf16 %v272_v29, %v272_v29  ;;  %2033 = vmatprep.subr.bf16.mxu0 %v2292_v3 }
 0x293   :  { %2018 = vmatmul.mubr.msk.bf16.vlgmr.msra.gmra.mrb[8].mxu1 %vm281_vm5, %v276_v31 }
 0x294   :  { %2028 = vmatpush3.bf16.msra.mxu1 %v434_v32  ;;  %2029 = vmatprep.mubr.msk.bf16.mxu1 %vm2293_vm0, %v2292_v3 }
 0x295   :  { %2039 = vmatprep.subr.bf16.mxu1 %v2292_v3 }
 0x2b8   :  { %v263_v33 = vpop.xlane.xlu1 %262  ;;  %v266_v34 = vpop.xlane.xlu0 %265 }
 0x2b9   :  { %2240 = vrcp.f32 %v263_v33 }
 0x2ba   :  { %2242 = vrcp.f32 %v266_v34 }
 0x2bc   :  { %v480_v35 = vpop.permute.xlu0 %479  ;;  %v531_v36 = vpop.permute.xlu1 %530 }
 0x2bd   :  { %v485_v42 = vsel %vm30_vm1, %v480_v35, 0  ;;  %v536_v45 = vsel %vm30_vm1, %v531_v36, 0 }
 0x2c0   :  { %v478_v41 = vpop.permute.xlu0 %477  ;;  %v529_v44 = vpop.permute.xlu1 %528 }
 0x2c3   :  { %v2241_v37 = vpop.eup %2240 }
 0x2c4   :  { %v2243_v38 = vpop.eup %2242  ;;  %v273_v39 = vmul.f32 %v2241_v37, %v2233_v11  ;;  %v582_v47 = vpop.permute.xlu0 %581 }
 0x2c5   :  { %v274_v40 = vmul.f32 %v2243_v38, %v2235_v12  ;;  %v633_v48 = vpop.permute.xlu1 %632  ;;  %v587_v49 = vsel %vm30_vm1, %v582_v47, 0 }
 0x2c6   :  { %v277_v43 = vpack.c.bf16 %v273_v39, %v273_v39  ;;  %v638_v50 = vsel %vm30_vm1, %v633_v48, 0 }
 0x2c7   :  { %v278_v46 = vpack.c.bf16 %v274_v40, %v274_v40 }
 0x2c8   :  { %2024 = vmatmul.mubr.msk.bf16.vlgmr.msra.gmra.mrb[12].mxu0 %vm281_vm5, %v277_v43  ;;  %v580_v51 = vpop.permute.xlu0 %579 }
 0x2c9   :  { %2030 = vmatmul.mubr.msk.bf16.vlgmr.msra.gmra.mrb[12].mxu1 %vm281_vm5, %v278_v46  ;;  %2034 = vmatpush3.bf16.xpose.msra.mxu0 %v485_v42  ;;  %v631_v52 = vpop.permute.xlu1 %630 }
 0x2ca   :  { %2040 = vmatpush3.bf16.xpose.msra.mxu1 %v536_v45  ;;  %2035 = vmatprep.mubr.msk.bf16.mxu0 %vm2293_vm0, %v2292_v3 }
 0x2cb   :  { %2041 = vmatprep.mubr.msk.bf16.mxu1 %vm2293_vm0, %v2292_v3  ;;  %2045 = vmatprep.subr.bf16.mxu0 %v2292_v3 }
 0x2cc   :  { %2051 = vmatprep.subr.bf16.mxu1 %v2292_v3 }
 0x2d0   :  { %2036 = vmatmul.mubr.msk.bf16.vlgmr.msra.gmra.mrb[16].mxu0 %vm30_vm1, %v478_v41 }
 0x2d1   :  { %2042 = vmatmul.mubr.msk.bf16.vlgmr.msra.gmra.mrb[16].mxu1 %vm30_vm1, %v529_v44  ;;  %2046 = vmatpush3.bf16.xpose.msra.mxu0 %v587_v49 }
 0x2d2   :  { %2052 = vmatpush3.bf16.xpose.msra.mxu1 %v638_v50  ;;  %2047 = vmatprep.mubr.msk.bf16.mxu0 %vm2293_vm0, %v2292_v3 }
 0x2d3   :  { %2053 = vmatprep.mubr.msk.bf16.mxu1 %vm2293_vm0, %v2292_v3  ;;  %2057 = vmatprep.subr.bf16.mxu0 %v2292_v3 }
 0x2d4   :  { %2063 = vmatprep.subr.bf16.mxu1 %v2292_v3 }
 0x2d8   :  { %2048 = vmatmul.mubr.msk.bf16.vlgmr.msra.gmra.mrb[20].mxu0 %vm30_vm1, %v580_v51 }
 0x2d9   :  { %2054 = vmatmul.mubr.msk.bf16.vlgmr.msra.gmra.mrb[20].mxu1 %vm30_vm1, %v631_v52  ;;  %2059 = vmatprep.mubr.msk.bf16.mxu0 %vm2293_vm0, %v2292_v3 }
 0x2da   :  { %2065 = vmatprep.mubr.msk.bf16.mxu1 %vm2293_vm0, %v2292_v3 }
 0x362   :  { %v2443_v53 = vpop.f32.mrb[8].mxu0 }
 0x363   :  { %v2013_v54 = vpop.f32.mrb[9].mxu0 }
 0x364   :  { %v329_v55 = vpop.f32.mrb[10].mxu0 }
 0x365   :  { %v2014_v57 = vpop.f32.mrb[11].mxu0 }
 0x366   :  { %v2445_v58 = vpop.f32.mrb[8].mxu1 }
 0x367   :  { %v2019_v59 = vpop.f32.mrb[9].mxu1 }
 0x368   :  { %v377_v60 = vpop.f32.mrb[10].mxu1 }
 0x369   :  { %v2020_v61 = vpop.f32.mrb[11].mxu1 }
 0x39b   :  { %v2447_v62 = vpop.f32.mrb[12].mxu0 }
 0x39c   :  { %v2449_v63 = vpop.f32.mrb[12].mxu1  ;;  %v2025_v0 = vpop.f32.mrb[13].mxu0 }
 0x39d   :  { %v2031_v1 = vpop.f32.mrb[13].mxu1  ;;  %v425_v2 = vpop.f32.mrb[14].mxu0 }
 0x39e   :  { %v473_v6 = vpop.f32.mrb[14].mxu1  ;;  %v2026_v9 = vpop.f32.mrb[15].mxu0 }
 0x39f   :  { %v2032_v10 = vpop.f32.mrb[15].mxu1 }
 0x3a3   :  { %v521_v11 = vpop.f32.mrb[16].mxu0 }
 0x3a4   :  { %v572_v12 = vpop.f32.mrb[16].mxu1  ;;  %v2037_v13 = vpop.f32.mrb[17].mxu0  ;;  %v680_v14 = vsel %vm230_vm2, %v521_v11, -inf }
 0x3a5   :  { %v683_v15 = vsel %vm230_vm2, %v572_v12, -inf  ;;  %681 = vmax.xlane.f32.xlu0 %v680_v14  ;;  %v524_v16 = vpop.f32.mrb[18].mxu0  ;;  %v2043_v18 = vpop.f32.mrb[17].mxu1 }
 0x3a6   :  { %684 = vmax.xlane.f32.xlu1 %v683_v15  ;;  %v2038_v19 = vpop.f32.mrb[19].mxu0  ;;  %v575_v20 = vpop.f32.mrb[18].mxu1 }
 0x3a7   :  { %v2044_v21 = vpop.f32.mrb[19].mxu1 }
 0x3ab   :  { %v623_v23 = vpop.f32.mrb[20].mxu0 }
 0x3ac   :  { %v686_v24 = vsel %vm230_vm2, %v623_v23, -inf  ;;  %v674_v25 = vpop.f32.mrb[20].mxu1  ;;  %v2049_v27 = vpop.f32.mrb[21].mxu0 }
 0x3ad   :  { %687 = vmax.xlane.f32.xlu0 %v686_v24  ;;  %v626_v29 = vpop.f32.mrb[22].mxu0  ;;  %v2055_v30 = vpop.f32.mrb[21].mxu1  ;;  %v689_v31 = vsel %vm230_vm2, %v674_v25, -inf }
 0x3ae   :  { %v2050_v32 = vpop.f32.mrb[23].mxu0  ;;  %v677_v33 = vpop.f32.mrb[22].mxu1 }
 0x3af   :  { %v2056_v34 = vpop.f32.mrb[23].mxu1 }
 0x3b1   :  { %690 = vmax.xlane.f32.xlu0 %v689_v31 }
 0x3b7   :  { %728 = vrot.lane.b32.xlu1 %v2330_v4, %s2299_s17 }
 0x432   :  { %v682_v35 = vpop.xlane.xlu0 %681 }
 0x433   :  { %v685_v36 = vpop.xlane.xlu1 %684  ;;  %v692_v37 = vsub.f32 %v521_v11, %v682_v35 }
 0x434   :  { %v693_v38 = vsub.f32 %v572_v12, %v685_v36 }
 0x435   :  { %v696_v39 = vmul.f32 1.442695, %v692_v37 }
 0x436   :  { %v698_v40 = vmul.f32 1.442695, %v693_v38 }
 0x437   :  { %2244 = vpow2.f32 %v696_v39  ;;  %v729_v41 = vpop.permute.xlu1 %728 }
 0x438   :  { %2246 = vpow2.f32 %v698_v40  ;;  %v734_v42 = vand.u32 %v729_v41, %v2386_v56 }
 0x43a   :  { %2058 = vmatpush3.bf16.msra.mxu0 %v734_v42  ;;  %v688_v47 = vpop.xlane.xlu0 %687 }
 0x43b   :  { %2069 = vmatprep.subr.bf16.mxu0 %v2292_v3  ;;  %v694_v50 = vsub.f32 %v623_v23, %v688_v47 }
 0x43d   :  { %v700_v52 = vmul.f32 1.442695, %v694_v50 }
 0x43e   :  { %v691_v48 = vpop.xlane.xlu0 %690 }
 0x43f   :  { %v695_v49 = vsub.f32 %v674_v25, %v691_v48 }
 0x441   :  { %v2245_v43 = vpop.eup %2244  ;;  %v702_v51 = vmul.f32 1.442695, %v695_v49 }
 0x442   :  { %v2247_v44 = vpop.eup %2246  ;;  %v704_v45 = vsel %vm230_vm2, %v2245_v43, 0.0 }
 0x443   :  { %705 = vadd.xlane.f32.xlu1 %v704_v45  ;;  %v707_v46 = vsel %vm230_vm2, %v2247_v44, 0.0  ;;  %2248 = vpow2.f32 %v702_v51 }
 0x444   :  { %708 = vadd.xlane.f32.xlu0 %v707_v46  ;;  %2250 = vpow2.f32 %v700_v52 }
 0x44d   :  { %v2249_v54 = vpop.eup %2248 }
 0x44e   :  { %v2251_v55 = vpop.eup %2250  ;;  %v713_v57 = vsel %vm230_vm2, %v2249_v54, 0.0 }
 0x44f   :  { %v710_v59 = vsel %vm230_vm2, %v2251_v55, 0.0 }
 0x454   :  { %824 = vrot.lane.b32.xlu1 %v2332_v5, %s2299_s17 }
 0x458   :  { %872 = vrot.lane.b32.xlu1 %v2345_v8, %s2299_s17 }
 0x45a   :  { %776 = vrot.lane.b32.xlu0 %v2342_v7, %s2299_s17 }
 0x479   :  { %714 = vadd.xlane.f32.xlu0 %v713_v57 }
 0x47c   :  { %711 = vadd.xlane.f32.xlu1 %v710_v59 }
 0x48d   :  { %972 = vrot.lane.b32.xlu1 %v2342_v7, %s2300_s18 }
 0x48f   :  { %922 = vrot.lane.b32.xlu0 %v2330_v4, %s2300_s18 }
 0x491   :  { %970 = vrot.lane.b32.xlu1 %v2358_v22, %s2301_s19 }
 0x493   :  { %920 = vrot.lane.b32.xlu0 %v2352_v17, %s2301_s19 }
 0x495   :  { %1072 = vrot.lane.b32.xlu1 %v2345_v8, %s2300_s18 }
 0x497   :  { %1022 = vrot.lane.b32.xlu0 %v2332_v5, %s2300_s18 }
 0x499   :  { %1070 = vrot.lane.b32.xlu1 %v2373_v28, %s2301_s19 }
 0x49b   :  { %1020 = vrot.lane.b32.xlu0 %v2366_v26, %s2301_s19 }
 0x4d0   :  { %v706_v60 = vpop.xlane.xlu1 %705 }
 0x4d1   :  { %2252 = vrcp.f32 %v706_v60  ;;  %v709_v61 = vpop.xlane.xlu0 %708 }
 0x4d2   :  { %2254 = vrcp.f32 %v709_v61 }
 0x4d4   :  { %v825_v2 = vpop.permute.xlu1 %824 }
 0x4d5   :  { %v777_v0 = vpop.permute.xlu0 %776  ;;  %v830_v14 = vand.u32 %v825_v2, %v2386_v56 }
 0x4d6   :  { %v782_v1 = vand.u32 %v777_v0, %v2386_v56 }
 0x4d8   :  { %2064 = vmatpush3.bf16.msra.mxu1 %v782_v1  ;;  %v873_v12 = vpop.permute.xlu1 %872 }
 0x4d9   :  { %2075 = vmatprep.subr.bf16.mxu1 %v2292_v3  ;;  %v878_v16 = vand.u32 %v873_v12, %v2386_v56 }
 0x4db   :  { %v2253_v6 = vpop.eup %2252 }
 0x4dc   :  { %v2255_v9 = vpop.eup %2254  ;;  %v720_v10 = vmul.f32 %v2253_v6, %v2245_v43 }
 0x4dd   :  { %v721_v11 = vmul.f32 %v2255_v9, %v2247_v44 }
 0x4de   :  { %v724_v13 = vpack.c.bf16 %v720_v10, %v720_v10 }
 0x4df   :  { %v725_v15 = vpack.c.bf16 %v721_v11, %v721_v11 }
 0x4e0   :  { %2060 = vmatmul.mubr.msk.bf16.vlgmr.msra.gmra.mrb[24].mxu0 %vm281_vm5, %v724_v13 }
 0x4e1   :  { %2066 = vmatmul.mubr.msk.bf16.vlgmr.msra.gmra.mrb[24].mxu1 %vm281_vm5, %v725_v15  ;;  %2070 = vmatpush3.bf16.msra.mxu0 %v830_v14 }
 0x4e2   :  { %2076 = vmatpush3.bf16.msra.mxu1 %v878_v16  ;;  %2077 = vmatprep.mubr.msk.bf16.mxu1 %vm2293_vm0, %v2292_v3 }
 0x4e3   :  { %2087 = vmatprep.subr.bf16.mxu1 %v2292_v3  ;;  %2071 = vmatprep.mubr.msk.bf16.mxu0 %vm2293_vm0, %v2292_v3 }
 0x4e4   :  { %2081 = vmatprep.subr.bf16.mxu0 %v2292_v3 }
 0x506   :  { %v715_v18 = vpop.xlane.xlu0 %714 }
 0x507   :  { %2256 = vrcp.f32 %v715_v18 }
 0x509   :  { %v712_v19 = vpop.xlane.xlu1 %711 }
 0x50a   :  { %2258 = vrcp.f32 %v712_v19  ;;  %v923_v20 = vpop.permute.xlu0 %922 }
 0x50b   :  { %v928_v33 = vsel %vm30_vm1, %v923_v20, 0 }
 0x50d   :  { %v973_v23 = vpop.permute.xlu1 %972 }
 0x50e   :  { %v978_v27 = vsel %vm30_vm1, %v973_v23, 0  ;;  %v921_v32 = vpop.permute.xlu0 %920 }
 0x511   :  { %v2257_v21 = vpop.eup %2256  ;;  %v971_v31 = vpop.permute.xlu1 %970 }
 0x512   :  { %v723_v24 = vmul.f32 %v2257_v21, %v2249_v54  ;;  %v1023_v36 = vpop.permute.xlu0 %1022 }
 0x513   :  { %v1028_v38 = vsel %vm30_vm1, %v1023_v36, 0 }
 0x514   :  { %v2259_v25 = vpop.eup %2258  ;;  %v727_v29 = vpack.c.bf16 %v723_v24, %v723_v24 }
 0x515   :  { %v722_v30 = vmul.f32 %v2259_v25, %v2251_v55  ;;  %v1073_v35 = vpop.permute.xlu1 %1072 }
 0x516   :  { %2078 = vmatmul.mubr.msk.bf16.vlgmr.msra.gmra.mrb[28].mxu1 %vm281_vm5, %v727_v29  ;;  %v1078_v37 = vsel %vm30_vm1, %v1073_v35, 0  ;;  %v1021_v40 = vpop.permute.xlu0 %1020 }
 0x517   :  { %2088 = vmatpush3.bf16.xpose.msra.mxu1 %v978_v27  ;;  %v726_v34 = vpack.c.bf16 %v722_v30, %v722_v30  ;;  %2089 = vmatprep.mubr.msk.bf16.mxu1 %vm2293_vm0, %v2292_v3 }
 0x518   :  { %2099 = vmatprep.subr.bf16.mxu1 %v2292_v3 }
 0x519   :  { %2072 = vmatmul.mubr.msk.bf16.vlgmr.msra.gmra.mrb[28].mxu0 %vm281_vm5, %v726_v34  ;;  %v1071_v39 = vpop.permute.xlu1 %1070 }
 0x51a   :  { %2082 = vmatpush3.bf16.xpose.msra.mxu0 %v928_v33  ;;  %2083 = vmatprep.mubr.msk.bf16.mxu0 %vm2293_vm0, %v2292_v3 }
 0x51b   :  { %2093 = vmatprep.subr.bf16.mxu0 %v2292_v3 }
 0x51e   :  { %2090 = vmatmul.mubr.msk.bf16.vlgmr.msra.gmra.mrb[32].mxu1 %vm30_vm1, %v971_v31 }
 0x51f   :  { %2100 = vmatpush3.bf16.xpose.msra.mxu1 %v1078_v37  ;;  %2101 = vmatprep.mubr.msk.bf16.mxu1 %vm2293_vm0, %v2292_v3 }
 0x520   :  { %2111 = vmatprep.subr.bf16.mxu1 %v2292_v3 }
 0x521   :  { %2084 = vmatmul.mubr.msk.bf16.vlgmr.msra.gmra.mrb[32].mxu0 %vm30_vm1, %v921_v32 }
 0x522   :  { %2094 = vmatpush3.bf16.xpose.msra.mxu0 %v1028_v38  ;;  %2095 = vmatprep.mubr.msk.bf16.mxu0 %vm2293_vm0, %v2292_v3 }
 0x523   :  { %2105 = vmatprep.subr.bf16.mxu0 %v2292_v3 }
 0x526   :  { %2102 = vmatmul.mubr.msk.bf16.vlgmr.msra.gmra.mrb[36].mxu1 %vm30_vm1, %v1071_v39 }
 0x527   :  { %2113 = vmatprep.mubr.msk.bf16.mxu1 %vm2293_vm0, %v2292_v3 }
 0x529   :  { %2096 = vmatmul.mubr.msk.bf16.vlgmr.msra.gmra.mrb[36].mxu0 %vm30_vm1, %v1021_v40 }
 0x52a   :  { %2107 = vmatprep.mubr.msk.bf16.mxu0 %vm2293_vm0, %v2292_v3 }
 0x5b3   :  { %v2511_v41 = vpop.f32.mrb[24].mxu0 }
 0x5b4   :  { %v2513_v42 = vpop.f32.mrb[24].mxu1  ;;  %v2061_v43 = vpop.f32.mrb[25].mxu0 }
 0x5b5   :  { %v2194_v44 = vpack.i.bf16 %v2513_v42, %v2511_v41  ;;  %v2067_v45 = vpop.f32.mrb[25].mxu1  ;;  %v773_v46 = vpop.f32.mrb[26].mxu0 }
 0x5b6   :  { %v821_v47 = vpop.f32.mrb[26].mxu1  ;;  %v2062_v48 = vpop.f32.mrb[27].mxu0 }
 0x5b7   :  { %v2068_v49 = vpop.f32.mrb[27].mxu1 }
 0x5e9   :  { %v2517_v50 = vpop.f32.mrb[28].mxu1 }
 0x5ea   :  { %v2079_v51 = vpop.f32.mrb[29].mxu1 }
 0x5eb   :  { %v917_v52 = vpop.f32.mrb[30].mxu1 }
 0x5ec   :  { %v2080_v54 = vpop.f32.mrb[31].mxu1  ;;  %v2519_v55 = vpop.f32.mrb[28].mxu0 }
 0x5ed   :  { %v2199_v57 = vpack.i.bf16 %v2517_v50, %v2519_v55  ;;  %v2073_v59 = vpop.f32.mrb[29].mxu0 }
 0x5ee   :  { %v869_v60 = vpop.f32.mrb[30].mxu0 }
 0x5ef   :  { %v2074_v61 = vpop.f32.mrb[31].mxu0 }
 0x5f1   :  { %v1014_v0 = vpop.f32.mrb[32].mxu1 }
 0x5f2   :  { %v1123_v1 = vsel %vm230_vm2, %v1014_v0, -inf  ;;  %v2091_v2 = vpop.f32.mrb[33].mxu1 }
 0x5f3   :  { %1124 = vmax.xlane.f32.xlu1 %v1123_v1  ;;  %v1017_v6 = vpop.f32.mrb[34].mxu1 }
 0x5f4   :  { %v964_v9 = vpop.f32.mrb[32].mxu0  ;;  %v2092_v10 = vpop.f32.mrb[35].mxu1 }
 0x5f5   :  { %v2085_v11 = vpop.f32.mrb[33].mxu0  ;;  %v1120_v12 = vsel %vm230_vm2, %v964_v9, -inf }
 0x5f6   :  { %1121 = vmax.xlane.f32.xlu0 %v1120_v12  ;;  %v967_v13 = vpop.f32.mrb[34].mxu0 }
 0x5f7   :  { %v2086_v14 = vpop.f32.mrb[35].mxu0 }
 0x5f9   :  { %v1114_v15 = vpop.f32.mrb[36].mxu1 }
 0x5fa   :  { %v2103_v16 = vpop.f32.mrb[37].mxu1  ;;  %v1129_v25 = vsel %vm230_vm2, %v1114_v15, -inf }
 0x5fb   :  { %v1117_v18 = vpop.f32.mrb[38].mxu1 }
 0x5fc   :  { %v1064_v19 = vpop.f32.mrb[36].mxu0  ;;  %v2104_v20 = vpop.f32.mrb[39].mxu1 }
 0x5fd   :  { %v1126_v21 = vsel %vm230_vm2, %v1064_v19, -inf  ;;  %v2097_v23 = vpop.f32.mrb[37].mxu0 }
 0x5fe   :  { %1127 = vmax.xlane.f32.xlu0 %v1126_v21  ;;  %v1067_v24 = vpop.f32.mrb[38].mxu0 }
 0x5ff   :  { %v2098_v27 = vpop.f32.mrb[39].mxu0 }
 0x602   :  { %1130 = vmax.xlane.f32.xlu0 %v1129_v25 }
 0x604   :  { %1168 = vrot.lane.b32.xlu1 %v2330_v4, %s2302_s20 }
 0x680   :  { %v1125_v29 = vpop.xlane.xlu1 %1124 }
 0x681   :  { %v1133_v30 = vsub.f32 %v1014_v0, %v1125_v29 }
 0x683   :  { %v1138_v31 = vmul.f32 1.442695, %v1133_v30  ;;  %v1122_v32 = vpop.xlane.xlu0 %1121 }
 0x684   :  { %v1132_v33 = vsub.f32 %v964_v9, %v1122_v32  ;;  %v1169_v34 = vpop.permute.xlu1 %1168 }
 0x685   :  { %2260 = vpow2.f32 %v1138_v31  ;;  %v1174_v35 = vand.u32 %v1169_v34, %v2386_v56 }
 0x686   :  { %v1136_v36 = vmul.f32 1.442695, %v1132_v33 }
 0x687   :  { %2106 = vmatpush3.bf16.msra.mxu0 %v1174_v35 }
 0x688   :  { %2262 = vpow2.f32 %v1136_v36  ;;  %2117 = vmatprep.subr.bf16.mxu0 %v2292_v3 }
 0x68b   :  { %v1128_v43 = vpop.xlane.xlu0 %1127 }
 0x68c   :  { %v1134_v48 = vsub.f32 %v1064_v19, %v1128_v43 }
 0x68e   :  { %v1140_v49 = vmul.f32 1.442695, %v1134_v48 }
 0x68f   :  { %v2261_v37 = vpop.eup %2260  ;;  %v1131_v45 = vpop.xlane.xlu0 %1130 }
 0x690   :  { %v1147_v38 = vsel %vm230_vm2, %v2261_v37, 0.0  ;;  %v1135_v46 = vsub.f32 %v1114_v15, %v1131_v45 }
 0x691   :  { %1148 = vadd.xlane.f32.xlu0 %v1147_v38 }
 0x692   :  { %v2263_v39 = vpop.eup %2262  ;;  %v1142_v47 = vmul.f32 1.442695, %v1135_v46 }
 0x693   :  { %v1144_v40 = vsel %vm230_vm2, %v2263_v39, 0.0 }
 0x694   :  { %1145 = vadd.xlane.f32.xlu1 %v1144_v40  ;;  %2264 = vpow2.f32 %v1142_v47 }
 0x695   :  { %2266 = vpow2.f32 %v1140_v49 }
 0x69e   :  { %v2265_v51 = vpop.eup %2264 }
 0x69f   :  { %v1153_v52 = vsel %vm230_vm2, %v2265_v51, 0.0  ;;  %v2267_v54 = vpop.eup %2266 }
 0x6a0   :  { %v1150_v59 = vsel %vm230_vm2, %v2267_v54, 0.0 }
 0x6a5   :  { %1264 = vrot.lane.b32.xlu1 %v2332_v5, %s2302_s20 }
 0x6a7   :  { %1216 = vrot.lane.b32.xlu0 %v2342_v7, %s2302_s20 }
 0x6a9   :  { %1312 = vrot.lane.b32.xlu1 %v2345_v8, %s2302_s20 }
 0x6c6   :  { %1154 = vadd.xlane.f32.xlu0 %v1153_v52 }
 0x6cd   :  { %1151 = vadd.xlane.f32.xlu1 %v1150_v59 }
 0x6dc   :  { %1362 = vrot.lane.b32.xlu0 %v2330_v4, %s2303_s21 }
 0x6de   :  { %1412 = vrot.lane.b32.xlu1 %v2342_v7, %s2303_s21 }
 0x6e0   :  { %1360 = vrot.lane.b32.xlu0 %v2352_v17, %s2304_s22 }
 0x6e2   :  { %1410 = vrot.lane.b32.xlu1 %v2358_v22, %s2304_s22 }
 0x6e4   :  { %1462 = vrot.lane.b32.xlu0 %v2332_v5, %s2303_s21 }
 0x6e6   :  { %1512 = vrot.lane.b32.xlu1 %v2345_v8, %s2303_s21 }
 0x6e8   :  { %1460 = vrot.lane.b32.xlu0 %v2366_v26, %s2304_s22 }
 0x6ea   :  { %1510 = vrot.lane.b32.xlu1 %v2373_v28, %s2304_s22 }
 0x71e   :  { %v1149_v60 = vpop.xlane.xlu0 %1148 }
 0x71f   :  { %2268 = vrcp.f32 %v1149_v60 }
 0x721   :  { %v1146_v61 = vpop.xlane.xlu1 %1145 }
 0x722   :  { %2270 = vrcp.f32 %v1146_v61  ;;  %v1217_v0 = vpop.permute.xlu0 %1216 }
 0x723   :  { %v1222_v1 = vand.u32 %v1217_v0, %v2386_v56 }
 0x725   :  { %v1265_v2 = vpop.permute.xlu1 %1264  ;;  %2112 = vmatpush3.bf16.msra.mxu1 %v1222_v1 }
 0x726   :  { %2123 = vmatprep.subr.bf16.mxu1 %v2292_v3  ;;  %v1270_v12 = vand.u32 %v1265_v2, %v2386_v56 }
 0x729   :  { %v2269_v17 = vpop.eup %2268  ;;  %v1313_v22 = vpop.permute.xlu1 %1312 }
 0x72a   :  { %v1161_v6 = vmul.f32 %v2269_v17, %v2261_v37  ;;  %v1318_v9 = vand.u32 %v1313_v22, %v2386_v56 }
 0x72c   :  { %v2271_v10 = vpop.eup %2270  ;;  %v1165_v26 = vpack.c.bf16 %v1161_v6, %v1161_v6 }
 0x72d   :  { %v1160_v11 = vmul.f32 %v2271_v10, %v2263_v39 }
 0x72e   :  { %2114 = vmatmul.mubr.msk.bf16.vlgmr.msra.gmra.mrb[40].mxu1 %vm281_vm5, %v1165_v26 }
 0x72f   :  { %2124 = vmatpush3.bf16.msra.mxu1 %v1318_v9  ;;  %v1164_v28 = vpack.c.bf16 %v1160_v11, %v1160_v11  ;;  %2125 = vmatprep.mubr.msk.bf16.mxu1 %vm2293_vm0, %v2292_v3 }
 0x730   :  { %2135 = vmatprep.subr.bf16.mxu1 %v2292_v3 }
 0x731   :  { %2108 = vmatmul.mubr.msk.bf16.vlgmr.msra.gmra.mrb[40].mxu0 %vm281_vm5, %v1164_v28 }
 0x732   :  { %2118 = vmatpush3.bf16.msra.mxu0 %v1270_v12  ;;  %2119 = vmatprep.mubr.msk.bf16.mxu0 %vm2293_vm0, %v2292_v3 }
 0x733   :  { %2129 = vmatprep.subr.bf16.mxu0 %v2292_v3 }
 0x753   :  { %v1155_v13 = vpop.xlane.xlu0 %1154 }
 0x754   :  { %2272 = vrcp.f32 %v1155_v13 }
 0x757   :  { %v1363_v21 = vpop.permute.xlu0 %1362 }
 0x758   :  { %v1368_v30 = vsel %vm30_vm1, %v1363_v21, 0 }
 0x75a   :  { %v1152_v14 = vpop.xlane.xlu1 %1151 }
 0x75b   :  { %2274 = vrcp.f32 %v1152_v14  ;;  %v1361_v27 = vpop.permute.xlu0 %1360 }
 0x75e   :  { %v2273_v15 = vpop.eup %2272  ;;  %v1413_v16 = vpop.permute.xlu1 %1412 }
 0x75f   :  { %v1163_v18 = vmul.f32 %v2273_v15, %v2265_v51  ;;  %v1418_v19 = vsel %vm30_vm1, %v1413_v16, 0  ;;  %v1463_v33 = vpop.permute.xlu0 %1462 }
 0x760   :  { %v1468_v34 = vsel %vm30_vm1, %v1463_v33, 0 }
 0x761   :  { %v1167_v20 = vpack.c.bf16 %v1163_v18, %v1163_v18 }
 0x762   :  { %v1411_v23 = vpop.permute.xlu1 %1410 }
 0x763   :  { %2126 = vmatmul.mubr.msk.bf16.vlgmr.msra.gmra.mrb[44].mxu1 %vm281_vm5, %v1167_v20  ;;  %v1461_v36 = vpop.permute.xlu0 %1460 }
 0x764   :  { %2136 = vmatpush3.bf16.xpose.msra.mxu1 %v1418_v19  ;;  %2137 = vmatprep.mubr.msk.bf16.mxu1 %vm2293_vm0, %v2292_v3 }
 0x765   :  { %v2275_v24 = vpop.eup %2274  ;;  %2147 = vmatprep.subr.bf16.mxu1 %v2292_v3 }
 0x766   :  { %v1162_v25 = vmul.f32 %v2275_v24, %v2267_v54  ;;  %v1513_v29 = vpop.permute.xlu1 %1512 }
 0x767   :  { %v1518_v32 = vsel %vm30_vm1, %v1513_v29, 0 }
 0x768   :  { %v1166_v31 = vpack.c.bf16 %v1162_v25, %v1162_v25 }
 0x76a   :  { %2120 = vmatmul.mubr.msk.bf16.vlgmr.msra.gmra.mrb[44].mxu0 %vm281_vm5, %v1166_v31  ;;  %v1511_v35 = vpop.permute.xlu1 %1510 }
 0x76b   :  { %2138 = vmatmul.mubr.msk.bf16.vlgmr.msra.gmra.mrb[48].mxu1 %vm30_vm1, %v1411_v23  ;;  %2130 = vmatpush3.bf16.xpose.msra.mxu0 %v1368_v30 }
 0x76c   :  { %2131 = vmatprep.mubr.msk.bf16.mxu0 %vm2293_vm0, %v2292_v3  ;;  %2141 = vmatprep.subr.bf16.mxu0 %v2292_v3 }
 0x76d   :  { %2148 = vmatpush3.bf16.xpose.msra.mxu1 %v1518_v32  ;;  %2149 = vmatprep.mubr.msk.bf16.mxu1 %vm2293_vm0, %v2292_v3 }
 0x76e   :  { %2159 = vmatprep.subr.bf16.mxu1 %v2292_v3 }
 0x772   :  { %2132 = vmatmul.mubr.msk.bf16.vlgmr.msra.gmra.mrb[48].mxu0 %vm30_vm1, %v1361_v27 }
 0x773   :  { %2142 = vmatpush3.bf16.xpose.msra.mxu0 %v1468_v34  ;;  %2143 = vmatprep.mubr.msk.bf16.mxu0 %vm2293_vm0, %v2292_v3 }
 0x774   :  { %2150 = vmatmul.mubr.msk.bf16.vlgmr.msra.gmra.mrb[52].mxu1 %vm30_vm1, %v1511_v35  ;;  %2153 = vmatprep.subr.bf16.mxu0 %v2292_v3 }
 0x775   :  { %2161 = vmatprep.mubr.msk.bf16.mxu1 %vm2293_vm0, %v2292_v3 }
 0x77a   :  { %2144 = vmatmul.mubr.msk.bf16.vlgmr.msra.gmra.mrb[52].mxu0 %vm30_vm1, %v1461_v36 }
 0x77b   :  { %2155 = vmatprep.mubr.msk.bf16.mxu0 %vm2293_vm0, %v2292_v3 }
 0x801   :  { %v2583_v37 = vpop.f32.mrb[40].mxu1 }
 0x802   :  { %v2115_v38 = vpop.f32.mrb[41].mxu1 }
 0x803   :  { %v1261_v39 = vpop.f32.mrb[42].mxu1 }
 0x804   :  { %v2116_v40 = vpop.f32.mrb[43].mxu1  ;;  %v2585_v43 = vpop.f32.mrb[40].mxu0 }
 0x805   :  { %v2204_v45 = vpack.i.bf16 %v2583_v37, %v2585_v43  ;;  %v2109_v46 = vpop.f32.mrb[41].mxu0 }
 0x806   :  { %v1213_v47 = vpop.f32.mrb[42].mxu0 }
 0x807   :  { %v2110_v48 = vpop.f32.mrb[43].mxu0 }
 0x836   :  { %v2589_v49 = vpop.f32.mrb[44].mxu1 }
 0x837   :  { %v2127_v51 = vpop.f32.mrb[45].mxu1 }
 0x838   :  { %v1357_v52 = vpop.f32.mrb[46].mxu1 }
 0x839   :  { %v2128_v54 = vpop.f32.mrb[47].mxu1 }
 0x83d   :  { %v2591_v59 = vpop.f32.mrb[44].mxu0 }
 0x83e   :  { %v2209_v60 = vpack.i.bf16 %v2589_v49, %v2591_v59  ;;  %v1454_v61 = vpop.f32.mrb[48].mxu1  ;;  %v2121_v0 = vpop.f32.mrb[45].mxu0 }
 0x83f   :  { %v1563_v1 = vsel %vm230_vm2, %v1454_v61, -inf  ;;  %v1309_v2 = vpop.f32.mrb[46].mxu0  ;;  %v2139_v17 = vpop.f32.mrb[49].mxu1 }
 0x840   :  { %1564 = vmax.xlane.f32.xlu1 %v1563_v1  ;;  %v2122_v22 = vpop.f32.mrb[47].mxu0  ;;  %v1457_v6 = vpop.f32.mrb[50].mxu1 }
 0x841   :  { %v2140_v9 = vpop.f32.mrb[51].mxu1 }
 0x845   :  { %v1404_v10 = vpop.f32.mrb[48].mxu0 }
 0x846   :  { %v2133_v26 = vpop.f32.mrb[49].mxu0  ;;  %v1560_v11 = vsel %vm230_vm2, %v1404_v10, -inf }
 0x847   :  { %1561 = vmax.xlane.f32.xlu0 %v1560_v11  ;;  %v1407_v28 = vpop.f32.mrb[50].mxu0  ;;  %v1554_v12 = vpop.f32.mrb[52].mxu1 }
 0x848   :  { %v2134_v13 = vpop.f32.mrb[51].mxu0  ;;  %v2151_v14 = vpop.f32.mrb[53].mxu1  ;;  %v1569_v24 = vsel %vm230_vm2, %v1554_v12, -inf }
 0x849   :  { %v1557_v15 = vpop.f32.mrb[54].mxu1 }
 0x84a   :  { %v2152_v16 = vpop.f32.mrb[55].mxu1 }
 0x84d   :  { %v1504_v18 = vpop.f32.mrb[52].mxu0 }
 0x84e   :  { %v2145_v19 = vpop.f32.mrb[53].mxu0  ;;  %v1566_v20 = vsel %vm230_vm2, %v1504_v18, -inf }
 0x84f   :  { %1567 = vmax.xlane.f32.xlu0 %v1566_v20  ;;  %v1507_v21 = vpop.f32.mrb[54].mxu0 }
 0x850   :  { %v2146_v23 = vpop.f32.mrb[55].mxu0 }
 0x851   :  { %1608 = vrot.lane.b32.xlu1 %v2330_v4, %s2305_s23 }
 0x853   :  { %1570 = vmax.xlane.f32.xlu0 %v1569_v24 }
 0x8cd   :  { %v1565_v25 = vpop.xlane.xlu1 %1564 }
 0x8ce   :  { %v1573_v27 = vsub.f32 %v1454_v61, %v1565_v25 }
 0x8d0   :  { %v1578_v29 = vmul.f32 1.442695, %v1573_v27 }
 0x8d1   :  { %v1609_v30 = vpop.permute.xlu1 %1608 }
 0x8d2   :  { %2276 = vpow2.f32 %v1578_v29  ;;  %v1614_v31 = vand.u32 %v1609_v30, %v2386_v56 }
 0x8d4   :  { %v1562_v32 = vpop.xlane.xlu0 %1561  ;;  %2154 = vmatpush3.bf16.msra.mxu0 %v1614_v31 }
 0x8d5   :  { %v1572_v33 = vsub.f32 %v1404_v10, %v1562_v32  ;;  %2165 = vmatprep.subr.bf16.mxu0 %v2292_v3 }
 0x8d7   :  { %v1576_v34 = vmul.f32 1.442695, %v1572_v33 }
 0x8d9   :  { %2278 = vpow2.f32 %v1576_v34 }
 0x8dc   :  { %v2277_v35 = vpop.eup %2276  ;;  %v1568_v36 = vpop.xlane.xlu0 %1567 }
 0x8dd   :  { %v1574_v38 = vsub.f32 %v1504_v18, %v1568_v36  ;;  %v1587_v4 = vsel %vm230_vm2, %v2277_v35, 0.0 }
 0x8de   :  { %1588 = vadd.xlane.f32.xlu0 %v1587_v4 }
 0x8df   :  { %v1580_v39 = vmul.f32 1.442695, %v1574_v38 }
 0x8e0   :  { %v1571_v40 = vpop.xlane.xlu0 %1570 }
 0x8e1   :  { %2280 = vpow2.f32 %v1580_v39  ;;  %v1575_v46 = vsub.f32 %v1554_v12, %v1571_v40 }
 0x8e3   :  { %v2279_v47 = vpop.eup %2278  ;;  %v1582_v48 = vmul.f32 1.442695, %v1575_v46 }
 0x8e4   :  { %v1584_v51 = vsel %vm230_vm2, %v2279_v47, 0.0 }
 0x8e5   :  { %2282 = vpow2.f32 %v1582_v48  ;;  %1585 = vadd.xlane.f32.xlu1 %v1584_v51 }
 0x8eb   :  { %v2281_v52 = vpop.eup %2280 }
 0x8ec   :  { %v1590_v54 = vsel %vm230_vm2, %v2281_v52, 0.0 }
 0x8ed   :  { %1591 = vadd.xlane.f32.xlu1 %v1590_v54 }
 0x8ef   :  { %v2283_v61 = vpop.eup %2282 }
 0x8f0   :  { %v1593_v0 = vsel %vm230_vm2, %v2283_v61, 0.0 }
 0x8f1   :  { %1594 = vadd.xlane.f32.xlu0 %v1593_v0 }
 0x8fe   :  { %1704 = vrot.lane.b32.xlu1 %v2332_v5, %s2305_s23 }
 0x902   :  { %1752 = vrot.lane.b32.xlu1 %v2345_v8, %s2305_s23 }
 0x906   :  { %2200 = vrot.lane.b32.xlu1 %v2199_v57, %s2306_s24 }
 0x907   :  { %1656 = vrot.lane.b32.xlu0 %v2342_v7, %s2305_s23 }
 0x90a   :  { %2210 = vrot.lane.b32.xlu1 %v2209_v60, %s2307_s25 }
 0x90b   :  { %2195 = vrot.lane.b32.xlu0 %v2194_v44, %s2306_s24 }
 0x90f   :  { %2205 = vrot.lane.b32.xlu0 %v2204_v45, %s2307_s25 }
 0x96b   :  { %v1589_v5 = vpop.xlane.xlu0 %1588 }
 0x972   :  { %v1586_v8 = vpop.xlane.xlu1 %1585 }
 0x973   :  { %2284 = vrcp.f32 %v1586_v8 }
 0x974   :  { %2286 = vrcp.f32 %v1589_v5 }
 0x97a   :  { %v1592_v50 = vpop.xlane.xlu1 %1591 }
 0x97b   :  { %2288 = vrcp.f32 %v1592_v50 }
 0x97d   :  { %v2285_v7 = vpop.eup %2284 }
 0x97e   :  { %v1600_v55 = vmul.f32 %v2285_v7, %v2279_v47  ;;  %v1705_v57 = vpop.permute.xlu1 %1704  ;;  %v1595_v1 = vpop.xlane.xlu0 %1594 }
 0x97f   :  { %v2287_v49 = vpop.eup %2286  ;;  %v1710_v59 = vand.u32 %v1705_v57, %v2386_v56  ;;  %2290 = vrcp.f32 %v1595_v1 }
 0x980   :  { %v1604_v41 = vpack.c.bf16 %v1600_v55, %v1600_v55  ;;  %v1601_v42 = vmul.f32 %v2287_v49, %v2277_v35 }
 0x982   :  { %2156 = vmatmul.mubr.msk.bf16.vlgmr.msra.gmra.mrb[56].mxu0 %vm281_vm5, %v1604_v41  ;;  %v1657_v44 = vpop.permute.xlu0 %1656  ;;  %v1753_v43 = vpop.permute.xlu1 %1752  ;;  %v1605_v17 = vpack.c.bf16 %v1601_v42, %v1601_v42 }
 0x983   :  { %v1662_v37 = vand.u32 %v1657_v44, %v2386_v56  ;;  %2166 = vmatpush3.bf16.msra.mxu0 %v1710_v59  ;;  %2167 = vmatprep.mubr.msk.bf16.mxu0 %vm2293_vm0, %v2292_v3  ;;  %v1758_v60 = vand.u32 %v1753_v43, %v2386_v56  ;;  %v1875_v43 = vld [vmem:[%s2690_s1 + $0x8] sm:$0x7] }
 0x985   :  { %v2289_v45 = vpop.eup %2288  ;;  %2160 = vmatpush3.bf16.msra.mxu1 %v1662_v37 }
 0x986   :  { %v1602_v2 = vmul.f32 %v2289_v45, %v2281_v52  ;;  %2171 = vmatprep.subr.bf16.mxu1 %v2292_v3  ;;  %v2196_v29 = vpop.permute.xlu0 %2195  ;;  %v2201_v31 = vpop.permute.xlu1 %2200  ;;  %v1869_v52 = vld [vmem:[%s2690_s1] sm:$0x7]  ;;  %v1878_v45 = vld [vmem:[%s2690_s1 + $0xc] sm:$0x7] }
 0x987   :  { %v2198_v32 = vunpack.i.h.bf16 %v2196_v29  ;;  %v2197_v33 = vunpack.i.l.bf16 %v2196_v29  ;;  %v2203_v5 = vunpack.i.h.bf16 %v2201_v31  ;;  %v2202_v8 = vunpack.i.l.bf16 %v2201_v31 }
 0x988   :  { %2162 = vmatmul.mubr.msk.bf16.vlgmr.msra.gmra.mrb[56].mxu1 %vm281_vm5, %v1605_v17  ;;  %v1606_v22 = vpack.c.bf16 %v1602_v2, %v1602_v2 }
 0x989   :  { %v2291_v6 = vpop.eup %2290  ;;  %2172 = vmatpush3.bf16.msra.mxu1 %v1758_v60  ;;  %2173 = vmatprep.mubr.msk.bf16.mxu1 %vm2293_vm0, %v2292_v3  ;;  %v1849_v38 = vsel %vm30_vm1, %v2445_v58, %v2198_v32  ;;  %v1848_v4 = vsel %vm30_vm1, %v2443_v53, %v2197_v33  ;;  %v1872_v58 = vld [vmem:[%s2690_s1 + $0x4] sm:$0x7]  ;;  %v1851_v49 = vsel %vm30_vm1, %v2449_v63, %v2203_v5 }
 0x98a   :  { %v1603_v9 = vmul.f32 %v2291_v6, %v2283_v61  ;;  %2168 = vmatmul.mubr.msk.bf16.vlgmr.msra.gmra.mrb[60].mxu0 %vm281_vm5, %v1606_v22  ;;  %v2206_v30 = vpop.permute.xlu0 %2205  ;;  %v2211_v48 = vpop.permute.xlu1 %2210  ;;  %v1850_v59 = vsel %vm30_vm1, %v2447_v62, %v2202_v8 }
 0x98b   :  { %v2208_v34 = vunpack.i.h.bf16 %v2206_v30  ;;  %v2207_v35 = vunpack.i.l.bf16 %v2206_v30  ;;  %v2213_v50 = vunpack.i.h.bf16 %v2211_v48  ;;  %v2212_v7 = vunpack.i.l.bf16 %v2211_v48 }
 0x98c   :  { %v1607_v10 = vpack.c.bf16 %v1603_v9, %v1603_v9 }
 0x98d   :  { %v1853_v46 = vsel %vm1852_vm6, %v1848_v4, %v2207_v35  ;;  %v1854_v47 = vsel %vm1852_vm6, %v1849_v38, %v2208_v34  ;;  %v1855_v44 = vsel %vm1852_vm6, %v1850_v59, %v2212_v7  ;;  %v1856_v37 = vsel %vm1852_vm6, %v1851_v49, %v2213_v50 }
 0x990   :  { %2174 = vmatmul.mubr.msk.bf16.vlgmr.msra.gmra.mrb[60].mxu1 %vm281_vm5, %v1607_v10 }
 0xa55   :  { %v1650_v56 = vpop.f32.mrb[56].mxu0 }
 0xa56   :  { %v2157_v26 = vpop.f32.mrb[57].mxu0 }
 0xa57   :  { %v1653_v11 = vpop.f32.mrb[58].mxu0 }
 0xa58   :  { %v2158_v28 = vpop.f32.mrb[59].mxu0 }
 0xa5b   :  { %v1698_v12 = vpop.f32.mrb[56].mxu1 }
 0xa5c   :  { %v2214_v13 = vpack.i.bf16 %v1698_v12, %v1650_v56  ;;  %v2163_v14 = vpop.f32.mrb[57].mxu1 }
 0xa5d   :  { %v1701_v15 = vpop.f32.mrb[58].mxu1  ;;  %v1746_v16 = vpop.f32.mrb[60].mxu0 }
 0xa5e   :  { %v2164_v18 = vpop.f32.mrb[59].mxu1  ;;  %2215 = vrot.lane.b32.xlu0 %v2214_v13, %s2308_s26  ;;  %v2169_v19 = vpop.f32.mrb[61].mxu0 }
 0xa5f   :  { %v1749_v20 = vpop.f32.mrb[62].mxu0 }
 0xa60   :  { %v2170_v21 = vpop.f32.mrb[63].mxu0 }
 0xa63   :  { %v1794_v23 = vpop.f32.mrb[60].mxu1 }
 0xa64   :  { %v2219_v3 = vpack.i.bf16 %v1794_v23, %v1746_v16  ;;  %v2175_v24 = vpop.f32.mrb[61].mxu1 }
 0xa65   :  { %v1797_v25 = vpop.f32.mrb[62].mxu1 }
 0xa66   :  { %v2176_v27 = vpop.f32.mrb[63].mxu1  ;;  %2220 = vrot.lane.b32.xlu1 %v2219_v3, %s2308_s26 }
 0xad0   :  { %v2216_v36 = vpop.permute.xlu0 %2215 }
 0xad1   :  { %v2218_v39 = vunpack.i.h.bf16 %v2216_v36  ;;  %v2217_v40 = vunpack.i.l.bf16 %v2216_v36 }
 0xad3   :  { %v1859_v53 = vsel %vm1857_vm7, %v1854_v47, %v2218_v39  ;;  %v1858_v54 = vsel %vm1857_vm7, %v1853_v46, %v2217_v40 }
 0xad4   :  { %v1863_v61 = vpack.c.bf16 %v1859_v53, %v1859_v53  ;;  %v1862_v0 = vpack.c.bf16 %v1858_v54, %v1858_v54 }
 0xad6   :  { %v1873_v55 = vsel %vm2643_vm10, %v1863_v61, %v1872_v58  ;;  %v1870_v57 = vsel %vm2643_vm10, %v1862_v0, %v1869_v52 }
 0xad7   :  { %1874 = vst [vmem:[%s2690_s1 + $0x4] sm:$0x7] %v1873_v55  ;;  %1871 = vst [vmem:[%s2690_s1] sm:$0x7] %v1870_v57 }
 0xad8   :  { %v2221_v1 = vpop.permute.xlu1 %2220 }
 0xad9   :  { %v2223_v41 = vunpack.i.h.bf16 %v2221_v1  ;;  %v2222_v42 = vunpack.i.l.bf16 %v2221_v1 }
 0xadb   :  { %v1861_v60 = vsel %vm1857_vm7, %v1856_v37, %v2223_v41  ;;  %v1860_v63 = vsel %vm1857_vm7, %v1855_v44, %v2222_v42 }
 0xadc   :  { %v1865_v2 = vpack.c.bf16 %v1861_v60, %v1861_v60  ;;  %v1864_v62 = vpack.c.bf16 %v1860_v63, %v1860_v63 }
 0xade   :  { %v1879_v17 = vsel %vm2643_vm10, %v1865_v2, %v1878_v45  ;;  %v1876_v22 = vsel %vm2643_vm10, %v1864_v62, %v1875_v43 }
 0xadf   :  { %1880 = vst [vmem:[%s2690_s1 + $0xc] sm:$0x7] %v1879_v17  ;;  %1877 = vst [vmem:[%s2690_s1 + $0x8] sm:$0x7] %v1876_v22 }

// kernel: vit_forward.39
= control target key start
LH: loop header
LB: loop body
LE: loop exit
PB: predicated region body
PF: predicated region fallthrough
CT: control target
= control target key end

     0   :  { %vm159_vm0 = vcmask 254976   ;;  %vm156_vm1 = vcmask 261120   ;;  %s292_s1 = inlined_call_operand.vmem [shape: bf16[128,32], index: 1, kind: input, shape index: {}]   ;;  %s293_s0 = inlined_call_operand.vmem [shape: bf16[18,128], index: 0, kind: input, shape index: {}]   ;;  %s294_s2 = inlined_call_operand.vmem [shape: f32[1,32], index: 2, kind: input, shape index: {}]   ;;  %s295_s3 = inlined_call_operand.vmem [shape: f32[18,32], index: 3, kind: input, shape index: {}]   ;;  %s296_s4 = inlined_call_operand.vmem [shape: f32[18,32], index: 4, kind: output, shape index: {}]  }
   0x1   :  { %v206_v0 = vld [vmem:[%s292_s1] sm:$0xff]   ;;  %v207_v1 = vld [vmem:[%s292_s1 + $0x8] sm:$0xff]   ;;  %v208_v2 = vld [vmem:[%s292_s1 + $0x10] sm:$0xff]  }
   0x2   :  { %186 = vmatprep.subr.bf16.mxu0 %v206_v0  ;;  %v209_v3 = vld [vmem:[%s292_s1 + $0x18] sm:$0xff]   ;;  %v214_v4 = vld [vmem:[%s293_s0] sm:$0xff]   ;;  %v211_v6 = vld [vmem:[%s292_s1 + $0x28] sm:$0xff]  }
   0x3   :  { %187 = vmatpush3.bf16.msra.mxu0 %v206_v0  ;;  %202 = vmatprep.mubr.bf16.mxu0 %v214_v4  ;;  %v210_v5 = vld [vmem:[%s292_s1 + $0x20] sm:$0xff]   ;;  %v212_v7 = vld [vmem:[%s292_s1 + $0x30] sm:$0xff]   ;;  %v213_v8 = vld [vmem:[%s292_s1 + $0x38] sm:$0xff]  }
   0x4   :  { %188 = vmatprep.subr.bf16.mxu0 %v207_v1  ;;  %v215_v9 = vld [vmem:[%s293_s0 + $0x8] ss:$0 sps:$4 sm:$0x11]   ;;  %v165_v10 = vld [vmem:[%s294_s2] ss:$0 sm:$0xff] }
   0x5   :  { %v152_v12 = vld [vmem:[%s295_s3 + $0x10] sm:$0x3]  ;;  %v150_v15 = vld [vmem:[%s295_s3] sm:$0xff]  ;;  %v151_v20 = vld [vmem:[%s295_s3 + $0x8] sm:$0xff] }
   0x7   :  { %189 = vmatpush3.bf16.msra.mxu0 %v207_v1 }
   0x8   :  { %190 = vmatprep.subr.bf16.mxu0 %v208_v2 }
   0xb   :  { %191 = vmatpush3.bf16.msra.mxu0 %v208_v2 }
   0xc   :  { %192 = vmatprep.subr.bf16.mxu0 %v209_v3 }
   0xf   :  { %193 = vmatpush3.bf16.msra.mxu0 %v209_v3 }
  0x10   :  { %194 = vmatprep.subr.bf16.mxu0 %v210_v5 }
  0x13   :  { %195 = vmatpush3.bf16.msra.mxu0 %v210_v5 }
  0x14   :  { %196 = vmatprep.subr.bf16.mxu0 %v211_v6 }
  0x17   :  { %197 = vmatpush3.bf16.msra.mxu0 %v211_v6 }
  0x18   :  { %198 = vmatprep.subr.bf16.mxu0 %v212_v7 }
  0x1b   :  { %199 = vmatpush3.bf16.msra.mxu0 %v212_v7 }
  0x1c   :  { %200 = vmatprep.subr.bf16.mxu0 %v213_v8 }
  0x1f   :  { %201 = vmatpush3.bf16.msra.mxu0 %v213_v8 }
  0x22   :  { %203 = vmatmul.mubr.bf16.vlgmr.msra.gmra.mrb[0].mxu0 %v215_v9 }
  0xf5   :  { %v204_v11 = vpop.f32.mrb[0].mxu0 }
  0xf6   :  { %v145_v13 = vadd.f32 %v204_v11, %v165_v10  ;;  %v136_v14 = vpop.f32.mrb[1].mxu0 }
  0xf7   :  { %v137_v16 = vadd.f32 %v165_v10, %v136_v14  ;;  %v205_v17 = vpop.f32.mrb[2].mxu0 }
  0xf8   :  { %v155_v18 = vadd.f32 %v152_v12, %v145_v13  ;;  %v139_v19 = vpop.f32.mrb[3].mxu0 }
  0xf9   :  { %v153_v21 = vadd.f32 %v150_v15, %v137_v16  ;;  %v140_v22 = vadd.f32 %v165_v10, %v139_v19 }
  0xfa   :  { %160 = vst.msk [vmem:[%s296_s4 + $0x10] sm:$0x3] %vm159_vm0, %v155_v18 }
  0xfb   :  { %157 = vst.msk [vmem:[%s296_s4] sm:$0xff] %vm156_vm1, %v153_v21  ;;  %v154_v23 = vadd.f32 %v151_v20, %v140_v22 }
  0xfd   :  { %158 = vst.msk [vmem:[%s296_s4 + $0x8] sm:$0xff] %vm156_vm1, %v154_v23 }

// kernel: vit_forward.53
= control target key start
LH: loop header
LB: loop body
LE: loop exit
PB: predicated region body
PF: predicated region fallthrough
CT: control target
= control target key end

     0   :  { %v144_v1 = vmov 0.0   ;;  %vm145_vm0 = vmmov 0   ;;  %s191_s0 = inlined_call_operand.vmem [shape: bf16[2,32], index: 0, kind: input, shape index: {}]   ;;  %s192_s1 = inlined_call_operand.vmem [shape: bf16[32,10], index: 1, kind: input, shape index: {}]   ;;  %s193_s2 = inlined_call_operand.vmem [shape: f32[1,10], index: 2, kind: input, shape index: {}]   ;;  %s194_s3 = inlined_call_operand.hbm [shape: f32[2,10], index: 3, kind: output, shape index: {}]  }
   0x1   :  { %v118_v0 = vld [vmem:[%s192_s1] sm:$0xff]   ;;  %107 = vmatprep.subr.bf16.mxu0 %v144_v1  ;;  %v119_v2 = vld [vmem:[%s192_s1 + $0x8] sm:$0xff]   ;;  %111 = vmatprep.mubr.msk.bf16.mxu0 %vm145_vm0, %v144_v1 }
   0x2   :  { %108 = vmatpush3.bf16.msra.mxu0 %v118_v0 }
   0x3   :  { %109 = vmatprep.subr.bf16.mxu0 %v144_v1 }
   0x4   :  { %8 = vsyncpa [#allocation3], 0  ;;  %v16_v3 = vld [vmem:[%s191_s0] sm:$0x1]  ;;  %vm40_vm1 = vcmask 261120   ;;  %s146_s20 = smov [#allocation2]  }
   0x5   :  { %v100_v4 = vld [vmem:[%s193_s2] ss:$0 sm:$0xff]  ;;  %s92_s21 = sshll.u32 %s146_s20, 4  ;;  %vm84_vm2 = vcmask 74752   ;;  %s93_s21 = int_to_ptr.vmem [resolvable:$true] %s92_s21 }
   0x6   :  { %110 = vmatpush3.bf16.msra.mxu0 %v119_v2  ;;  %s120_s1 = scalar_lea.vmem %s93_s21, 32  ;;  %p125_p1 = scmp.lt.s32.totalorder %s93_s21, %s93_s21 }
   0x7   :  { %p121_p0 = scmp.ne.s32.totalorder %s93_s21, %s120_s1  ;;  %p126_p2 = scmp.lt.s32.totalorder %s120_s1, %s120_s1 }
   0x9   :  { %112 = vmatmul.mubr.msk.bf16.vlgmr.msra.gmra.mrb[0].mxu0 %vm40_vm1, %v16_v3  ;;  %p127_p3 = por %p126_p2, %p125_p1 }
   0xb   :  { %p128_p4 = pnand %p127_p3, %p121_p0 }
  0xdc   :  { %v78_v5 = vpop.f32.mrb[0].mxu0 }
  0xdd   :  { %v79_v6 = vadd.f32 %v100_v4, %v78_v5  ;;  %v113_v7 = vpop.f32.mrb[1].mxu0 }
  0xde   :  { %v81_v8 = vpop.f32.mrb[2].mxu0 }
  0xdf   :  { %v114_v9 = vpop.f32.mrb[3].mxu0  ;;  %85 = vst.msk [vmem:[#allocation2] sm:$0x3] %vm84_vm2, %v79_v6 }
  0xe0   :  { %131 = shalt.err (!%p128_p4)
}
  0xe1   :  { %s132_s2 = scalar_lea.hbm %s194_s3, 32 }
  0xe2   :  { %p133_p5 = scmp.ne.s32.totalorder %s194_s3, %s132_s2  ;;  %p136_p6 = scmp.lt.u32.totalorder %s132_s2, %s194_s3 }
  0xe4   :  { %p138_p7 = pnand %p136_p6, %p133_p5 }
  0xe6   :  { %141 = shalt.err (!%p138_p7)
}
  0xe7   :  { %95 = dma.vmem_to_hbm [thread:$0]  %s93_s21, 32, %s194_s3, [#allocation3]  }
  0xe8   :  { %142 = dma.done.wait [#allocation3], 32  }
  0xe9   :  { %143 = vsyncadd [#allocation3], 4294967264 }
  0xea   :  { %99 = vsyncpa [#allocation3], 1 }

</bundles_post_ra>
